<compile_context>
chip_gen: v7x
topology: tpu7x:2x2x1
jax: 0.10.0
libtpu: 0.0.40
codegen_flags: <defaults>
</compile_context>

<pallas_src>
import numpy as np
import jax
import jax.numpy as jnp
from jax.experimental import pallas as pl
from jax.experimental.pallas import tpu as pltpu


_COMPILER_PARAMS = pltpu.CompilerParams(
    dimension_semantics=("parallel",),
    vmem_limit_bytes=48 * 1024 * 1024,
)
_EPS = 1e-5


# ---------------------------------------------------------------------------
# Spatial operator matrices (trace-time numpy constants; all tiny).
# ---------------------------------------------------------------------------
def _shift_mats_3x3(h, w):
    """(9, h*w, h*w) 0/1 matrices: S_k @ x_flat == zero-padded 3x3 tap shift."""
    hw = h * w
    s = np.zeros((9, hw, hw), np.float32)
    k = 0
    for dy in range(3):
        for dx in range(3):
            for i in range(h):
                for j in range(w):
                    si, sj = i + dy - 1, j + dx - 1
                    if 0 <= si < h and 0 <= sj < w:
                        s[k, i * w + j, si * w + sj] = 1.0
            k += 1
    return s


def _adaptive_avg_pool_mat(h_in, w_in, h_out, w_out):
    """(h_out*w_out, h_in*w_in) matrix == AdaptiveAvgPool2d on flattened spatial."""
    p = np.zeros((h_out * w_out, h_in * w_in), np.float32)
    for oh in range(h_out):
        h0 = (oh * h_in) // h_out
        h1 = ((oh + 1) * h_in + h_out - 1) // h_out
        for ow in range(w_out):
            w0 = (ow * w_in) // w_out
            w1 = ((ow + 1) * w_in + w_out - 1) // w_out
            val = 1.0 / ((h1 - h0) * (w1 - w0))
            for hh in range(h0, h1):
                for ww in range(w0, w1):
                    p[oh * w_out + ow, hh * w_in + ww] = val
    return p


def _bilinear_mat_align_true(n_in, n_out):
    """(n_out, n_in) 1-D bilinear interpolation matrix, align_corners=True."""
    m = np.zeros((n_out, n_in), np.float32)
    for j in range(n_out):
        src = j * (n_in - 1) / (n_out - 1) if n_out > 1 else 0.0
        i0 = min(int(np.floor(src)), n_in - 1)
        i1 = min(i0 + 1, n_in - 1)
        frac = src - i0
        m[j, i0] += 1.0 - frac
        m[j, i1] += frac
    return m


def _maxpool2x2_select_mats(h, w):
    """4 selection matrices (ho*wo, h*w); elementwise max of the 4 == MaxPool2d(2)."""
    ho, wo = h // 2, w // 2
    q = np.zeros((4, ho * wo, h * w), np.float32)
    for s, (sy, sx) in enumerate(((0, 0), (0, 1), (1, 0), (1, 1))):
        for i in range(ho):
            for j in range(wo):
                q[s, i * wo + j, (2 * i + sy) * w + (2 * j + sx)] = 1.0
    return q


# ---------------------------------------------------------------------------
# Kernel 1 (x4 levels): PolypIrr SE + scale + AdaptiveAvgPool(7) + conv3x3 + ReLU
#                       + bilinear (align_corners=True) upsample to (H5, W5).
# ---------------------------------------------------------------------------
def _level_call(x_flat, se_w1, se_w2, pool_shift, conv_w, conv_b, up_mat):
    n, hw_in, c = x_flat.shape
    o = conv_w.shape[2]
    p = pool_shift.shape[1]          # 49 pooled positions
    hw_out = up_mat.shape[0]         # H5 * W5

    def kernel(x_ref, w1_ref, w2_ref, pk_ref, wc_ref, bc_ref, up_ref, o_ref):
        xf = x_ref[0]                                               # (hw_in, c) f32
        # PolypIrr: global avg-pool -> FC -> ReLU -> FC -> sigmoid  (per-channel gate)
        m = jnp.mean(xf, axis=0, keepdims=True)                     # (1, c)
        hmid = jnp.maximum(
            jnp.dot(m, w1_ref[...], preferred_element_type=jnp.float32), 0.0)
        gate = 1.0 / (1.0 + jnp.exp(
            -jnp.dot(hmid, w2_ref[...], preferred_element_type=jnp.float32)))
        xs = xf * gate                                              # x_i = r_i * a_i
        # conv3x3 on the 7x7 adaptive-pooled image: 9 (pool . shift) matmuls + taps
        acc = jnp.zeros((p, o), jnp.float32)
        for k in range(9):
            t = jnp.dot(pk_ref[k], xs, preferred_element_type=jnp.float32)  # (p, c)
            acc = acc + jnp.dot(t.astype(jnp.bfloat16), wc_ref[k],
                                preferred_element_type=jnp.float32)
        y = jnp.maximum(acc + bc_ref[...], 0.0)                     # conv + ReLU
        # bilinear 7x7 -> (H5, W5), align_corners=True, as a single matmul
        o_ref[0] = jnp.dot(up_ref[...], y, preferred_element_type=jnp.float32)

    return pl.pallas_call(
        kernel,
        out_shape=jax.ShapeDtypeStruct((n, hw_out, o), jnp.float32),
        grid_spec=pltpu.PrefetchScalarGridSpec(
            num_scalar_prefetch=0,
            grid=(n,),
            in_specs=[
                pl.BlockSpec((1, hw_in, c), lambda i: (i, 0, 0)),
                pl.BlockSpec(se_w1.shape, lambda i: (0, 0)),
                pl.BlockSpec(se_w2.shape, lambda i: (0, 0)),
                pl.BlockSpec(pool_shift.shape, lambda i: (0, 0, 0)),
                pl.BlockSpec(conv_w.shape, lambda i: (0, 0, 0)),
                pl.BlockSpec(conv_b.shape, lambda i: (0, 0)),
                pl.BlockSpec(up_mat.shape, lambda i: (0, 0)),
            ],
            out_specs=pl.BlockSpec((1, hw_out, o), lambda i: (i, 0, 0)),
        ),
        compiler_params=_COMPILER_PARAMS,
    )(x_flat, se_w1, se_w2, pool_shift, conv_w, conv_b, up_mat)


# ---------------------------------------------------------------------------
# Kernel 2: level-5 PolypIrr SE + scale + conv3x3(512->512) + ReLU.
# ---------------------------------------------------------------------------
def _c5_conv_call(x_flat, se_w1, se_w2, shift, conv_w, conv_b):
    n, hw, c = x_flat.shape
    o = conv_w.shape[2]

    def kernel(x_ref, w1_ref, w2_ref, s_ref, wc_ref, bc_ref, u_ref, acc_ref):
        xf = x_ref[0]
        m = jnp.mean(xf, axis=0, keepdims=True)
        hmid = jnp.maximum(
            jnp.dot(m, w1_ref[...], preferred_element_type=jnp.float32), 0.0)
        gate = 1.0 / (1.0 + jnp.exp(
            -jnp.dot(hmid, w2_ref[...], preferred_element_type=jnp.float32)))
        xs = xf * gate
        acc_ref[...] = jnp.zeros_like(acc_ref)
        for k in range(9):
            t = jnp.dot(s_ref[k], xs, preferred_element_type=jnp.float32)   # (hw, c)
            acc_ref[...] += jnp.dot(t.astype(jnp.bfloat16), wc_ref[k],
                                    preferred_element_type=jnp.float32)
        u_ref[0] = jnp.maximum(acc_ref[...] + bc_ref[...], 0.0)

    return pl.pallas_call(
        kernel,
        out_shape=jax.ShapeDtypeStruct((n, hw, o), jnp.float32),
        grid_spec=pltpu.PrefetchScalarGridSpec(
            num_scalar_prefetch=0,
            grid=(n,),
            in_specs=[
                pl.BlockSpec((1, hw, c), lambda i: (i, 0, 0)),
                pl.BlockSpec(se_w1.shape, lambda i: (0, 0)),
                pl.BlockSpec(se_w2.shape, lambda i: (0, 0)),
                pl.BlockSpec(shift.shape, lambda i: (0, 0, 0)),
                pl.BlockSpec(conv_w.shape, lambda i: (0, 0, 0)),
                pl.BlockSpec(conv_b.shape, lambda i: (0, 0)),
            ],
            out_specs=pl.BlockSpec((1, hw, o), lambda i: (i, 0, 0)),
            scratch_shapes=[pltpu.VMEM((hw, o), jnp.float32)],
        ),
        compiler_params=_COMPILER_PARAMS,
    )(x_flat, se_w1, se_w2, shift, conv_w, conv_b)


# ---------------------------------------------------------------------------
# Kernel 3: NonLocalBlock core (theta/phi/g 1x1, 2x2 maxpool, attention, W 1x1)
#           + per-batch partial BN statistics of W_y.
# ---------------------------------------------------------------------------
def _nonlocal_call(u_flat, nl, qsel):
    n, hw, c = u_flat.shape

    def kernel(u_ref, wt_ref, bt_ref, wp_ref, bp_ref, wg_ref, bg_ref,
               q_ref, ww_ref, bw_ref, wy_ref, sum_ref, sq_ref):
        u = u_ref[0]
        ub = u.astype(jnp.bfloat16)

        def pool2x2(v):                              # MaxPool2d(2) via 4 selections
            r = jnp.dot(q_ref[0], v, preferred_element_type=jnp.float32)
            for s in range(1, 4):
                r = jnp.maximum(
                    r, jnp.dot(q_ref[s], v, preferred_element_type=jnp.float32))
            return r

        phi = jnp.dot(ub, wp_ref[...], preferred_element_type=jnp.float32) + bp_ref[...]
        phi_p = pool2x2(phi)                                         # (hw/4, inter)
        gxx = jnp.dot(ub, wg_ref[...], preferred_element_type=jnp.float32) + bg_ref[...]
        g_p = pool2x2(gxx)                                           # (hw/4, inter)
        theta = jnp.dot(ub, wt_ref[...], preferred_element_type=jnp.float32) + bt_ref[...]

        # f = theta @ phi^T, softmax over pooled keys, y = softmax @ g
        f = jax.lax.dot_general(theta.astype(jnp.bfloat16), phi_p.astype(jnp.bfloat16),
                                (((1,), (1,)), ((), ())),
                                preferred_element_type=jnp.float32)  # (hw, hw/4)
        fmax = jnp.max(f, axis=-1, keepdims=True)
        e = jnp.exp(f - fmax)
        attn = e / jnp.sum(e, axis=-1, keepdims=True)
        y = jnp.dot(attn.astype(jnp.bfloat16), g_p.astype(jnp.bfloat16),
                    preferred_element_type=jnp.float32)              # (hw, inter)
        wy = jnp.dot(y.astype(jnp.bfloat16), ww_ref[...],
                     preferred_element_type=jnp.float32) + bw_ref[...]
        wy_ref[0] = wy
        # per-batch partial BN statistics (parallel-safe; reduced in plain JAX)
        sum_ref[0] = jnp.sum(wy, axis=0, keepdims=True)
        sq_ref[0] = jnp.sum(wy * wy, axis=0, keepdims=True)

    return pl.pallas_call(
        kernel,
        out_shape=(
            jax.ShapeDtypeStruct((n, hw, c), jnp.float32),
            jax.ShapeDtypeStruct((n, 1, c), jnp.float32),
            jax.ShapeDtypeStruct((n, 1, c), jnp.float32),
        ),
        grid_spec=pltpu.PrefetchScalarGridSpec(
            num_scalar_prefetch=0,
            grid=(n,),
            in_specs=[
                pl.BlockSpec((1, hw, c), lambda i: (i, 0, 0)),
                pl.BlockSpec(nl["wt"].shape, lambda i: (0, 0)),
                pl.BlockSpec(nl["bt"].shape, lambda i: (0, 0)),
                pl.BlockSpec(nl["wp"].shape, lambda i: (0, 0)),
                pl.BlockSpec(nl["bp"].shape, lambda i: (0, 0)),
                pl.BlockSpec(nl["wg"].shape, lambda i: (0, 0)),
                pl.BlockSpec(nl["bg"].shape, lambda i: (0, 0)),
                pl.BlockSpec(qsel.shape, lambda i: (0, 0, 0)),
                pl.BlockSpec(nl["ww"].shape, lambda i: (0, 0)),
                pl.BlockSpec(nl["bw"].shape, lambda i: (0, 0)),
            ],
            out_specs=[
                pl.BlockSpec((1, hw, c), lambda i: (i, 0, 0)),
                pl.BlockSpec((1, 1, c), lambda i: (i, 0, 0)),
                pl.BlockSpec((1, 1, c), lambda i: (i, 0, 0)),
            ],
        ),
        compiler_params=_COMPILER_PARAMS,
    )(u_flat, nl["wt"], nl["bt"], nl["wp"], nl["bp"], nl["wg"], nl["bg"],
      qsel, nl["ww"], nl["bw"])


# ---------------------------------------------------------------------------
# Kernel 4: outCombine conv1 (3x3, 1024->256) on concat([tr1..tr4, BN(W_y)+u]),
#           with the NonLocal BN-apply + residual fused in, + per-batch BN stats.
# ---------------------------------------------------------------------------
def _agg_conv_call(t1, t2, t3, t4, wy, u, nl_scale, nl_shift, shift, conv_w, conv_b):
    n, hw, c5 = wy.shape
    o = conv_w.shape[2]
    c_sizes = (t1.shape[2], t2.shape[2], t3.shape[2], t4.shape[2], c5)
    offs = [0]
    for cs in c_sizes:
        offs.append(offs[-1] + cs)

    def kernel(t1_ref, t2_ref, t3_ref, t4_ref, wy_ref, u_ref, sc_ref, sh_ref,
               s_ref, w_ref, b_ref, y_ref, sum_ref, sq_ref, acc_ref):
        # NonLocal tail fused here: tr5 = BN(W_y) + u  (scale/shift precomputed)
        tr5 = wy_ref[0] * sc_ref[...] + sh_ref[...] + u_ref[0]
        groups = (t1_ref[0], t2_ref[0], t3_ref[0], t4_ref[0], tr5)
        acc_ref[...] = jnp.zeros_like(acc_ref)
        for k in range(9):
            # channel mixing per concat group first, spatial shift second:
            #   (S_k @ cat) @ W_k == S_k @ (cat @ W_k)
            zk = jnp.zeros((hw, o), jnp.float32)
            for gi in range(5):
                wk = w_ref[k, offs[gi]:offs[gi + 1], :]
                zk = zk + jnp.dot(groups[gi].astype(jnp.bfloat16), wk,
                                  preferred_element_type=jnp.float32)
            acc_ref[...] += jnp.dot(s_ref[k], zk, preferred_element_type=jnp.float32)
        yc = acc_ref[...] + b_ref[...]
        y_ref[0] = yc
        sum_ref[0] = jnp.sum(yc, axis=0, keepdims=True)
        sq_ref[0] = jnp.sum(yc * yc, axis=0, keepdims=True)

    return pl.pallas_call(
        kernel,
        out_shape=(
            jax.ShapeDtypeStruct((n, hw, o), jnp.float32),
            jax.ShapeDtypeStruct((n, 1, o), jnp.float32),
            jax.ShapeDtypeStruct((n, 1, o), jnp.float32),
        ),
        grid_spec=pltpu.PrefetchScalarGridSpec(
            num_scalar_prefetch=0,
            grid=(n,),
            in_specs=[
                pl.BlockSpec((1, hw, t1.shape[2]), lambda i: (i, 0, 0)),
                pl.BlockSpec((1, hw, t2.shape[2]), lambda i: (i, 0, 0)),
                pl.BlockSpec((1, hw, t3.shape[2]), lambda i: (i, 0, 0)),
                pl.BlockSpec((1, hw, t4.shape[2]), lambda i: (i, 0, 0)),
                pl.BlockSpec((1, hw, c5), lambda i: (i, 0, 0)),
                pl.BlockSpec((1, hw, c5), lambda i: (i, 0, 0)),
                pl.BlockSpec(nl_scale.shape, lambda i: (0, 0)),
                pl.BlockSpec(nl_shift.shape, lambda i: (0, 0)),
                pl.BlockSpec(shift.shape, lambda i: (0, 0, 0)),
                pl.BlockSpec(conv_w.shape, lambda i: (0, 0, 0)),
                pl.BlockSpec(conv_b.shape, lambda i: (0, 0)),
            ],
            out_specs=[
                pl.BlockSpec((1, hw, o), lambda i: (i, 0, 0)),
                pl.BlockSpec((1, 1, o), lambda i: (i, 0, 0)),
                pl.BlockSpec((1, 1, o), lambda i: (i, 0, 0)),
            ],
            scratch_shapes=[pltpu.VMEM((hw, o), jnp.float32)],
        ),
        compiler_params=_COMPILER_PARAMS,
    )(t1, t2, t3, t4, wy, u, nl_scale, nl_shift, shift, conv_w, conv_b)


# ---------------------------------------------------------------------------
# Kernel 5: outCombine tail -- BN-apply + ReLU (+ Dropout2d identity) + conv1x1.
# ---------------------------------------------------------------------------
def _final_call(y1, scale, shift, w2, b2):
    n, hw, c = y1.shape
    o = w2.shape[1]

    def kernel(y_ref, sc_ref, sh_ref, w_ref, b_ref, o_ref):
        h = jnp.maximum(y_ref[0] * sc_ref[...] + sh_ref[...], 0.0)
        # TODO(synk): Dropout2d(0.1) is a training-mode stochastic channel drop;
        #             applied here as identity.
        o_ref[0] = jnp.dot(h.astype(jnp.bfloat16), w_ref[...],
                           preferred_element_type=jnp.float32) + b_ref[...]

    return pl.pallas_call(
        kernel,
        out_shape=jax.ShapeDtypeStruct((n, hw, o), jnp.float32),
        grid_spec=pltpu.PrefetchScalarGridSpec(
            num_scalar_prefetch=0,
            grid=(n,),
            in_specs=[
                pl.BlockSpec((1, hw, c), lambda i: (i, 0, 0)),
                pl.BlockSpec(scale.shape, lambda i: (0, 0)),
                pl.BlockSpec(shift.shape, lambda i: (0, 0)),
                pl.BlockSpec(w2.shape, lambda i: (0, 0)),
                pl.BlockSpec(b2.shape, lambda i: (0, 0)),
            ],
            out_specs=pl.BlockSpec((1, hw, o), lambda i: (i, 0, 0)),
        ),
        compiler_params=_COMPILER_PARAMS,
    )(y1, scale, shift, w2, b2)


# ---------------------------------------------------------------------------
# TRFR forward.
# ---------------------------------------------------------------------------
def trfr_forward(rs, params):
    r5 = rs[4]
    n = r5.shape[0]
    h5, w5 = r5.shape[2], r5.shape[3]
    ps = 7                                   # AdaptiveAvgPool2d(7) in TRFR_Agg
    hw5 = h5 * w5

    def flat(x):
        b, c, h, w = x.shape
        return jnp.transpose(x, (0, 2, 3, 1)).reshape(b, h * w, c).astype(jnp.float32)

    # spatial operator matrices (tiny, per-shape constants)
    s7 = _shift_mats_3x3(ps, ps)                                     # np (9, 49, 49)
    s5 = jnp.asarray(_shift_mats_3x3(h5, w5))                        # (9, hw5, hw5)
    up = jnp.asarray(np.kron(_bilinear_mat_align_true(ps, h5),
                             _bilinear_mat_align_true(ps, w5)))      # (hw5, 49)
    qsel = jnp.asarray(_maxpool2x2_select_mats(h5, w5))              # (4, hw5/4, hw5)

    # levels 1..4: SE + scale + pool(7) + conv3x3 + ReLU + bilinear-up (one kernel each)
    trs = []
    for i in range(4):
        x = rs[i]
        pmat = _adaptive_avg_pool_mat(x.shape[2], x.shape[3], ps, ps)
        pk = jnp.asarray(np.einsum("kpq,qr->kpr", s7, pmat))         # (9, 49, Hi*Wi)
        lp = params["levels"][i]
        trs.append(_level_call(flat(x), lp["se_w1"], lp["se_w2"], pk,
                               lp["conv_w"], lp["conv_b"], up))

    # level 5: SE + scale + conv3x3 + ReLU, then NonLocalBlock
    c5p = params["c5"]
    u = _c5_conv_call(flat(r5), c5p["se_w1"], c5p["se_w2"], s5,
                      c5p["conv_w"], c5p["conv_b"])

    nl = params["nl"]
    wy, nsum, nsq = _nonlocal_call(u, nl, qsel)
    cnt = jnp.float32(n * hw5)
    nl_mean = jnp.sum(nsum, axis=0) / cnt                            # (1, 512)
    nl_var = jnp.sum(nsq, axis=0) / cnt - nl_mean * nl_mean          # biased (BN train)
    nl_scale = nl["bn_gamma"].reshape(1, -1) * jax.lax.rsqrt(nl_var + _EPS)
    nl_shift = nl["bn_beta"].reshape(1, -1) - nl_mean * nl_scale

    # outCombine conv1 (3x3, 1024->256) on concat([tr1..tr4, BN(W_y)+u])
    agg = params["agg"]
    y1, csum, csq = _agg_conv_call(trs[0], trs[1], trs[2], trs[3], wy, u,
                                   nl_scale, nl_shift, s5,
                                   agg["conv1_w"], agg["conv1_b"])
    m1 = jnp.sum(csum, axis=0) / cnt
    v1 = jnp.sum(csq, axis=0) / cnt - m1 * m1
    sc1 = agg["bn1_gamma"].reshape(1, -1) * jax.lax.rsqrt(v1 + _EPS)
    sh1 = agg["bn1_beta"].reshape(1, -1) - m1 * sc1

    out = _final_call(y1, sc1, sh1, agg["conv2_w"], agg["conv2_b"])  # (n, hw5, 512)
    out = out.reshape(n, h5, w5, -1)
    return jnp.transpose(out, (0, 3, 1, 2))                          # back to NCHW


# ---------------------------------------------------------------------------
# Parameter init (random; NonLocal BN gamma/beta are constant-0 like PyTorch).
# ---------------------------------------------------------------------------
def init_params(key):
    in_ch = [64, 64, 128, 256, 512]
    ks = iter(jax.random.split(key, 64))

    def nrm(shape, scale=0.05):
        return scale * jax.random.normal(next(ks), shape, jnp.float32)

    levels = []
    for c in in_ch[:4]:
        r = max(c // 16, 1)
        levels.append(dict(
            se_w1=nrm((c, r)), se_w2=nrm((r, c)),
            conv_w=nrm((9, c, c)).astype(jnp.bfloat16), conv_b=nrm((1, c))))
    c5 = dict(se_w1=nrm((512, 32)), se_w2=nrm((32, 512)),
              conv_w=nrm((9, 512, 512)).astype(jnp.bfloat16), conv_b=nrm((1, 512)))
    nl = dict(wt=nrm((512, 256)).astype(jnp.bfloat16), bt=nrm((1, 256)),
              wp=nrm((512, 256)).astype(jnp.bfloat16), bp=nrm((1, 256)),
              wg=nrm((512, 256)).astype(jnp.bfloat16), bg=nrm((1, 256)),
              ww=nrm((256, 512)).astype(jnp.bfloat16), bw=nrm((1, 512)),
              bn_gamma=jnp.zeros((512,), jnp.float32),   # PyTorch: constant_(W[1].weight, 0)
              bn_beta=jnp.zeros((512,), jnp.float32))    # PyTorch: constant_(W[1].bias, 0)
    agg = dict(conv1_w=nrm((9, 1024, 256)).astype(jnp.bfloat16), conv1_b=nrm((1, 256)),
               bn1_gamma=jnp.ones((256,), jnp.float32),
               bn1_beta=jnp.zeros((256,), jnp.float32),
               conv2_w=nrm((256, 512)).astype(jnp.bfloat16), conv2_b=nrm((1, 512)))
    return dict(levels=levels, c5=c5, nl=nl, agg=agg)


if __name__ == "__main__":
    key = jax.random.PRNGKey(0)
    k = jax.random.split(key, 6)
    N = 2
    r1 = jax.random.normal(k[0], (N, 64, 28, 28), jnp.float32)
    r2 = jax.random.normal(k[1], (N, 64, 14, 14), jnp.float32)
    r3 = jax.random.normal(k[2], (N, 128, 14, 14), jnp.float32)
    r4 = jax.random.normal(k[3], (N, 256, 14, 14), jnp.float32)
    r5 = jax.random.normal(k[4], (N, 512, 14, 14), jnp.float32)
    params = init_params(k[5])

    out = trfr_forward((r1, r2, r3, r4, r5), params)
    out = jax.block_until_ready(out)

    assert out.shape == (N, 512, 14, 14), out.shape
    print("KERNEL_OK")
</pallas_src>

<mosaic_0001>
module attributes {stable_mosaic.version = 11 : i64} {
  func.func @kernel(%arg0: i32, %arg1: memref<1x784x64xf32, #tpu.memory_space<vmem>>, %arg2: memref<64x4xf32, #tpu.memory_space<vmem>>, %arg3: memref<4x64xf32, #tpu.memory_space<vmem>>, %arg4: memref<9x49x784xf32, #tpu.memory_space<vmem>>, %arg5: memref<9x64x64xbf16, #tpu.memory_space<vmem>>, %arg6: memref<1x64xf32, #tpu.memory_space<vmem>>, %arg7: memref<196x49xf32, #tpu.memory_space<vmem>>, %arg8: memref<1x196x64xf32, #tpu.memory_space<vmem>>) attributes {dimension_semantics = [#tpu.dimension_semantics<parallel>], iteration_bounds = array<i64: 2>, scalar_prefetch = 0 : i64, scratch_operands = 0 : i64, tpu.core_type = #tpu.core_type<tc>, window_params = [{transform_indices = @transform_0, window_bounds = array<i64: 1, 784, 64>}, {pipeline_mode = #tpu.pipeline_mode<synchronous>, transform_indices = @transform_1, window_bounds = array<i64: 64, 4>}, {pipeline_mode = #tpu.pipeline_mode<synchronous>, transform_indices = @transform_2, window_bounds = array<i64: 4, 64>}, {pipeline_mode = #tpu.pipeline_mode<synchronous>, transform_indices = @transform_3, window_bounds = array<i64: 9, 49, 784>}, {pipeline_mode = #tpu.pipeline_mode<synchronous>, transform_indices = @transform_4, window_bounds = array<i64: 9, 64, 64>}, {pipeline_mode = #tpu.pipeline_mode<synchronous>, transform_indices = @transform_5, window_bounds = array<i64: 1, 64>}, {pipeline_mode = #tpu.pipeline_mode<synchronous>, transform_indices = @transform_6, window_bounds = array<i64: 196, 49>}, {transform_indices = @transform_7, window_bounds = array<i64: 1, 196, 64>}]} {
    %c0 = arith.constant 0 : index
    %c0_0 = arith.constant 0 : index
    %c0_1 = arith.constant 0 : index
    %0 = vector.load %arg1[%c0, %c0_0, %c0_1] : memref<1x784x64xf32, #tpu.memory_space<vmem>>, vector<1x784x64xf32>
    %1 = vector.shape_cast %0 : vector<1x784x64xf32> to vector<784x64xf32>
    %cst = arith.constant dense<0.000000e+00> : vector<64xf32>
    %2 = vector.multi_reduction <add>, %1, %cst [0] : vector<784x64xf32> to vector<64xf32>
    %3 = vector.shape_cast %2 : vector<64xf32> to vector<1x64xf32>
    %cst_2 = arith.constant 7.840000e+02 : f32
    %4 = vector.broadcast %cst_2 : f32 to vector<1x64xf32>
    %5 = arith.divf %3, %4 : vector<1x64xf32>
    %c0_3 = arith.constant 0 : index
    %c0_4 = arith.constant 0 : index
    %6 = vector.load %arg2[%c0_3, %c0_4] : memref<64x4xf32, #tpu.memory_space<vmem>>, vector<64x4xf32>
    %cst_5 = arith.constant dense<0.000000e+00> : vector<1x4xf32>
    %7 = tpu.matmul %5, %6, %cst_5 {dimension_numbers = #tpu.dot_dimension_numbers<[1], [0], [0], [1], [0, 0, 1, 1], [], []>} : vector<1x64xf32>, vector<64x4xf32>, vector<1x4xf32> -> vector<1x4xf32>
    %cst_6 = arith.constant 0.000000e+00 : f32
    %8 = vector.broadcast %cst_6 : f32 to vector<1x4xf32>
    %9 = arith.maximumf %7, %8 : vector<1x4xf32>
    %c0_7 = arith.constant 0 : index
    %c0_8 = arith.constant 0 : index
    %10 = vector.load %arg3[%c0_7, %c0_8] : memref<4x64xf32, #tpu.memory_space<vmem>>, vector<4x64xf32>
    %cst_9 = arith.constant dense<0.000000e+00> : vector<1x64xf32>
    %11 = tpu.matmul %9, %10, %cst_9 {dimension_numbers = #tpu.dot_dimension_numbers<[1], [0], [0], [1], [0, 0, 1, 1], [], []>} : vector<1x4xf32>, vector<4x64xf32>, vector<1x64xf32> -> vector<1x64xf32>
    %cst_10 = arith.constant 0.000000e+00 : f32
    %12 = vector.broadcast %cst_10 : f32 to vector<1x64xf32>
    %13 = arith.subf %12, %11 : vector<1x64xf32>
    %14 = math.exp %13 : vector<1x64xf32>
    %cst_11 = arith.constant 1.000000e+00 : f32
    %15 = vector.broadcast %cst_11 : f32 to vector<1x64xf32>
    %16 = arith.addf %15, %14 : vector<1x64xf32>
    %cst_12 = arith.constant 1.000000e+00 : f32
    %17 = vector.broadcast %cst_12 : f32 to vector<1x64xf32>
    %18 = arith.divf %17, %16 : vector<1x64xf32>
    %19 = vector.broadcast %18 : vector<1x64xf32> to vector<784x64xf32>
    %20 = arith.mulf %1, %19 : vector<784x64xf32>
    %cst_13 = arith.constant 0.000000e+00 : f32
    %21 = vector.broadcast %cst_13 : f32 to vector<49x64xf32>
    %c0_14 = arith.constant 0 : index
    %c0_15 = arith.constant 0 : index
    %c0_16 = arith.constant 0 : index
    %22 = vector.load %arg4[%c0_14, %c0_15, %c0_16] : memref<9x49x784xf32, #tpu.memory_space<vmem>>, vector<1x49x784xf32>
    %23 = vector.shape_cast %22 : vector<1x49x784xf32> to vector<49x784xf32>
    %cst_17 = arith.constant dense<0.000000e+00> : vector<49x64xf32>
    %24 = tpu.matmul %23, %20, %cst_17 {dimension_numbers = #tpu.dot_dimension_numbers<[1], [0], [0], [1], [0, 0, 1, 1], [], []>} : vector<49x784xf32>, vector<784x64xf32>, vector<49x64xf32> -> vector<49x64xf32>
    %25 = arith.truncf %24 : vector<49x64xf32> to vector<49x64xbf16>
    %c0_18 = arith.constant 0 : index
    %c0_19 = arith.constant 0 : index
    %c0_20 = arith.constant 0 : index
    %26 = vector.load %arg5[%c0_18, %c0_19, %c0_20] : memref<9x64x64xbf16, #tpu.memory_space<vmem>>, vector<1x64x64xbf16>
    %27 = vector.shape_cast %26 : vector<1x64x64xbf16> to vector<64x64xbf16>
    %cst_21 = arith.constant dense<0.000000e+00> : vector<49x64xf32>
    %28 = tpu.matmul %25, %27, %cst_21 {dimension_numbers = #tpu.dot_dimension_numbers<[1], [0], [0], [1], [0, 0, 1, 1], [], []>} : vector<49x64xbf16>, vector<64x64xbf16>, vector<49x64xf32> -> vector<49x64xf32>
    %29 = arith.addf %21, %28 : vector<49x64xf32>
    %c1 = arith.constant 1 : index
    %c0_22 = arith.constant 0 : index
    %c0_23 = arith.constant 0 : index
    %30 = vector.load %arg4[%c1, %c0_22, %c0_23] : memref<9x49x784xf32, #tpu.memory_space<vmem>>, vector<1x49x784xf32>
    %31 = vector.shape_cast %30 : vector<1x49x784xf32> to vector<49x784xf32>
    %cst_24 = arith.constant dense<0.000000e+00> : vector<49x64xf32>
    %32 = tpu.matmul %31, %20, %cst_24 {dimension_numbers = #tpu.dot_dimension_numbers<[1], [0], [0], [1], [0, 0, 1, 1], [], []>} : vector<49x784xf32>, vector<784x64xf32>, vector<49x64xf32> -> vector<49x64xf32>
    %33 = arith.truncf %32 : vector<49x64xf32> to vector<49x64xbf16>
    %c1_25 = arith.constant 1 : index
    %c0_26 = arith.constant 0 : index
    %c0_27 = arith.constant 0 : index
    %34 = vector.load %arg5[%c1_25, %c0_26, %c0_27] : memref<9x64x64xbf16, #tpu.memory_space<vmem>>, vector<1x64x64xbf16>
    %35 = vector.shape_cast %34 : vector<1x64x64xbf16> to vector<64x64xbf16>
    %cst_28 = arith.constant dense<0.000000e+00> : vector<49x64xf32>
    %36 = tpu.matmul %33, %35, %cst_28 {dimension_numbers = #tpu.dot_dimension_numbers<[1], [0], [0], [1], [0, 0, 1, 1], [], []>} : vector<49x64xbf16>, vector<64x64xbf16>, vector<49x64xf32> -> vector<49x64xf32>
    %37 = arith.addf %29, %36 : vector<49x64xf32>
    %c2 = arith.constant 2 : index
    %c0_29 = arith.constant 0 : index
    %c0_30 = arith.constant 0 : index
    %38 = vector.load %arg4[%c2, %c0_29, %c0_30] : memref<9x49x784xf32, #tpu.memory_space<vmem>>, vector<1x49x784xf32>
    %39 = vector.shape_cast %38 : vector<1x49x784xf32> to vector<49x784xf32>
    %cst_31 = arith.constant dense<0.000000e+00> : vector<49x64xf32>
    %40 = tpu.matmul %39, %20, %cst_31 {dimension_numbers = #tpu.dot_dimension_numbers<[1], [0], [0], [1], [0, 0, 1, 1], [], []>} : vector<49x784xf32>, vector<784x64xf32>, vector<49x64xf32> -> vector<49x64xf32>
    %41 = arith.truncf %40 : vector<49x64xf32> to vector<49x64xbf16>
    %c2_32 = arith.constant 2 : index
    %c0_33 = arith.constant 0 : index
    %c0_34 = arith.constant 0 : index
    %42 = vector.load %arg5[%c2_32, %c0_33, %c0_34] : memref<9x64x64xbf16, #tpu.memory_space<vmem>>, vector<1x64x64xbf16>
    %43 = vector.shape_cast %42 : vector<1x64x64xbf16> to vector<64x64xbf16>
    %cst_35 = arith.constant dense<0.000000e+00> : vector<49x64xf32>
    %44 = tpu.matmul %41, %43, %cst_35 {dimension_numbers = #tpu.dot_dimension_numbers<[1], [0], [0], [1], [0, 0, 1, 1], [], []>} : vector<49x64xbf16>, vector<64x64xbf16>, vector<49x64xf32> -> vector<49x64xf32>
    %45 = arith.addf %37, %44 : vector<49x64xf32>
    %c3 = arith.constant 3 : index
    %c0_36 = arith.constant 0 : index
    %c0_37 = arith.constant 0 : index
    %46 = vector.load %arg4[%c3, %c0_36, %c0_37] : memref<9x49x784xf32, #tpu.memory_space<vmem>>, vector<1x49x784xf32>
    %47 = vector.shape_cast %46 : vector<1x49x784xf32> to vector<49x784xf32>
    %cst_38 = arith.constant dense<0.000000e+00> : vector<49x64xf32>
    %48 = tpu.matmul %47, %20, %cst_38 {dimension_numbers = #tpu.dot_dimension_numbers<[1], [0], [0], [1], [0, 0, 1, 1], [], []>} : vector<49x784xf32>, vector<784x64xf32>, vector<49x64xf32> -> vector<49x64xf32>
    %49 = arith.truncf %48 : vector<49x64xf32> to vector<49x64xbf16>
    %c3_39 = arith.constant 3 : index
    %c0_40 = arith.constant 0 : index
    %c0_41 = arith.constant 0 : index
    %50 = vector.load %arg5[%c3_39, %c0_40, %c0_41] : memref<9x64x64xbf16, #tpu.memory_space<vmem>>, vector<1x64x64xbf16>
    %51 = vector.shape_cast %50 : vector<1x64x64xbf16> to vector<64x64xbf16>
    %cst_42 = arith.constant dense<0.000000e+00> : vector<49x64xf32>
    %52 = tpu.matmul %49, %51, %cst_42 {dimension_numbers = #tpu.dot_dimension_numbers<[1], [0], [0], [1], [0, 0, 1, 1], [], []>} : vector<49x64xbf16>, vector<64x64xbf16>, vector<49x64xf32> -> vector<49x64xf32>
    %53 = arith.addf %45, %52 : vector<49x64xf32>
    %c4 = arith.constant 4 : index
    %c0_43 = arith.constant 0 : index
    %c0_44 = arith.constant 0 : index
    %54 = vector.load %arg4[%c4, %c0_43, %c0_44] : memref<9x49x784xf32, #tpu.memory_space<vmem>>, vector<1x49x784xf32>
    %55 = vector.shape_cast %54 : vector<1x49x784xf32> to vector<49x784xf32>
    %cst_45 = arith.constant dense<0.000000e+00> : vector<49x64xf32>
    %56 = tpu.matmul %55, %20, %cst_45 {dimension_numbers = #tpu.dot_dimension_numbers<[1], [0], [0], [1], [0, 0, 1, 1], [], []>} : vector<49x784xf32>, vector<784x64xf32>, vector<49x64xf32> -> vector<49x64xf32>
    %57 = arith.truncf %56 : vector<49x64xf32> to vector<49x64xbf16>
    %c4_46 = arith.constant 4 : index
    %c0_47 = arith.constant 0 : index
    %c0_48 = arith.constant 0 : index
    %58 = vector.load %arg5[%c4_46, %c0_47, %c0_48] : memref<9x64x64xbf16, #tpu.memory_space<vmem>>, vector<1x64x64xbf16>
    %59 = vector.shape_cast %58 : vector<1x64x64xbf16> to vector<64x64xbf16>
    %cst_49 = arith.constant dense<0.000000e+00> : vector<49x64xf32>
    %60 = tpu.matmul %57, %59, %cst_49 {dimension_numbers = #tpu.dot_dimension_numbers<[1], [0], [0], [1], [0, 0, 1, 1], [], []>} : vector<49x64xbf16>, vector<64x64xbf16>, vector<49x64xf32> -> vector<49x64xf32>
    %61 = arith.addf %53, %60 : vector<49x64xf32>
    %c5 = arith.constant 5 : index
    %c0_50 = arith.constant 0 : index
    %c0_51 = arith.constant 0 : index
    %62 = vector.load %arg4[%c5, %c0_50, %c0_51] : memref<9x49x784xf32, #tpu.memory_space<vmem>>, vector<1x49x784xf32>
    %63 = vector.shape_cast %62 : vector<1x49x784xf32> to vector<49x784xf32>
    %cst_52 = arith.constant dense<0.000000e+00> : vector<49x64xf32>
    %64 = tpu.matmul %63, %20, %cst_52 {dimension_numbers = #tpu.dot_dimension_numbers<[1], [0], [0], [1], [0, 0, 1, 1], [], []>} : vector<49x784xf32>, vector<784x64xf32>, vector<49x64xf32> -> vector<49x64xf32>
    %65 = arith.truncf %64 : vector<49x64xf32> to vector<49x64xbf16>
    %c5_53 = arith.constant 5 : index
    %c0_54 = arith.constant 0 : index
    %c0_55 = arith.constant 0 : index
    %66 = vector.load %arg5[%c5_53, %c0_54, %c0_55] : memref<9x64x64xbf16, #tpu.memory_space<vmem>>, vector<1x64x64xbf16>
    %67 = vector.shape_cast %66 : vector<1x64x64xbf16> to vector<64x64xbf16>
    %cst_56 = arith.constant dense<0.000000e+00> : vector<49x64xf32>
    %68 = tpu.matmul %65, %67, %cst_56 {dimension_numbers = #tpu.dot_dimension_numbers<[1], [0], [0], [1], [0, 0, 1, 1], [], []>} : vector<49x64xbf16>, vector<64x64xbf16>, vector<49x64xf32> -> vector<49x64xf32>
    %69 = arith.addf %61, %68 : vector<49x64xf32>
    %c6 = arith.constant 6 : index
    %c0_57 = arith.constant 0 : index
    %c0_58 = arith.constant 0 : index
    %70 = vector.load %arg4[%c6, %c0_57, %c0_58] : memref<9x49x784xf32, #tpu.memory_space<vmem>>, vector<1x49x784xf32>
    %71 = vector.shape_cast %70 : vector<1x49x784xf32> to vector<49x784xf32>
    %cst_59 = arith.constant dense<0.000000e+00> : vector<49x64xf32>
    %72 = tpu.matmul %71, %20, %cst_59 {dimension_numbers = #tpu.dot_dimension_numbers<[1], [0], [0], [1], [0, 0, 1, 1], [], []>} : vector<49x784xf32>, vector<784x64xf32>, vector<49x64xf32> -> vector<49x64xf32>
    %73 = arith.truncf %72 : vector<49x64xf32> to vector<49x64xbf16>
    %c6_60 = arith.constant 6 : index
    %c0_61 = arith.constant 0 : index
    %c0_62 = arith.constant 0 : index
    %74 = vector.load %arg5[%c6_60, %c0_61, %c0_62] : memref<9x64x64xbf16, #tpu.memory_space<vmem>>, vector<1x64x64xbf16>
    %75 = vector.shape_cast %74 : vector<1x64x64xbf16> to vector<64x64xbf16>
    %cst_63 = arith.constant dense<0.000000e+00> : vector<49x64xf32>
    %76 = tpu.matmul %73, %75, %cst_63 {dimension_numbers = #tpu.dot_dimension_numbers<[1], [0], [0], [1], [0, 0, 1, 1], [], []>} : vector<49x64xbf16>, vector<64x64xbf16>, vector<49x64xf32> -> vector<49x64xf32>
    %77 = arith.addf %69, %76 : vector<49x64xf32>
    %c7 = arith.constant 7 : index
    %c0_64 = arith.constant 0 : index
    %c0_65 = arith.constant 0 : index
    %78 = vector.load %arg4[%c7, %c0_64, %c0_65] : memref<9x49x784xf32, #tpu.memory_space<vmem>>, vector<1x49x784xf32>
    %79 = vector.shape_cast %78 : vector<1x49x784xf32> to vector<49x784xf32>
    %cst_66 = arith.constant dense<0.000000e+00> : vector<49x64xf32>
    %80 = tpu.matmul %79, %20, %cst_66 {dimension_numbers = #tpu.dot_dimension_numbers<[1], [0], [0], [1], [0, 0, 1, 1], [], []>} : vector<49x784xf32>, vector<784x64xf32>, vector<49x64xf32> -> vector<49x64xf32>
    %81 = arith.truncf %80 : vector<49x64xf32> to vector<49x64xbf16>
    %c7_67 = arith.constant 7 : index
    %c0_68 = arith.constant 0 : index
    %c0_69 = arith.constant 0 : index
    %82 = vector.load %arg5[%c7_67, %c0_68, %c0_69] : memref<9x64x64xbf16, #tpu.memory_space<vmem>>, vector<1x64x64xbf16>
    %83 = vector.shape_cast %82 : vector<1x64x64xbf16> to vector<64x64xbf16>
    %cst_70 = arith.constant dense<0.000000e+00> : vector<49x64xf32>
    %84 = tpu.matmul %81, %83, %cst_70 {dimension_numbers = #tpu.dot_dimension_numbers<[1], [0], [0], [1], [0, 0, 1, 1], [], []>} : vector<49x64xbf16>, vector<64x64xbf16>, vector<49x64xf32> -> vector<49x64xf32>
    %85 = arith.addf %77, %84 : vector<49x64xf32>
    %c8 = arith.constant 8 : index
    %c0_71 = arith.constant 0 : index
    %c0_72 = arith.constant 0 : index
    %86 = vector.load %arg4[%c8, %c0_71, %c0_72] : memref<9x49x784xf32, #tpu.memory_space<vmem>>, vector<1x49x784xf32>
    %87 = vector.shape_cast %86 : vector<1x49x784xf32> to vector<49x784xf32>
    %cst_73 = arith.constant dense<0.000000e+00> : vector<49x64xf32>
    %88 = tpu.matmul %87, %20, %cst_73 {dimension_numbers = #tpu.dot_dimension_numbers<[1], [0], [0], [1], [0, 0, 1, 1], [], []>} : vector<49x784xf32>, vector<784x64xf32>, vector<49x64xf32> -> vector<49x64xf32>
    %89 = arith.truncf %88 : vector<49x64xf32> to vector<49x64xbf16>
    %c8_74 = arith.constant 8 : index
    %c0_75 = arith.constant 0 : index
    %c0_76 = arith.constant 0 : index
    %90 = vector.load %arg5[%c8_74, %c0_75, %c0_76] : memref<9x64x64xbf16, #tpu.memory_space<vmem>>, vector<1x64x64xbf16>
    %91 = vector.shape_cast %90 : vector<1x64x64xbf16> to vector<64x64xbf16>
    %cst_77 = arith.constant dense<0.000000e+00> : vector<49x64xf32>
    %92 = tpu.matmul %89, %91, %cst_77 {dimension_numbers = #tpu.dot_dimension_numbers<[1], [0], [0], [1], [0, 0, 1, 1], [], []>} : vector<49x64xbf16>, vector<64x64xbf16>, vector<49x64xf32> -> vector<49x64xf32>
    %93 = arith.addf %85, %92 : vector<49x64xf32>
    %c0_78 = arith.constant 0 : index
    %c0_79 = arith.constant 0 : index
    %94 = vector.load %arg6[%c0_78, %c0_79] : memref<1x64xf32, #tpu.memory_space<vmem>>, vector<1x64xf32>
    %95 = vector.broadcast %94 : vector<1x64xf32> to vector<49x64xf32>
    %96 = arith.addf %93, %95 : vector<49x64xf32>
    %cst_80 = arith.constant 0.000000e+00 : f32
    %97 = vector.broadcast %cst_80 : f32 to vector<49x64xf32>
    %98 = arith.maximumf %96, %97 : vector<49x64xf32>
    %c0_81 = arith.constant 0 : index
    %c0_82 = arith.constant 0 : index
    %99 = vector.load %arg7[%c0_81, %c0_82] : memref<196x49xf32, #tpu.memory_space<vmem>>, vector<196x49xf32>
    %cst_83 = arith.constant dense<0.000000e+00> : vector<196x64xf32>
    %100 = tpu.matmul %99, %98, %cst_83 {dimension_numbers = #tpu.dot_dimension_numbers<[1], [0], [0], [1], [0, 0, 1, 1], [], []>} : vector<196x49xf32>, vector<49x64xf32>, vector<196x64xf32> -> vector<196x64xf32>
    %c0_84 = arith.constant 0 : index
    %c0_85 = arith.constant 0 : index
    %c0_86 = arith.constant 0 : index
    %101 = vector.load %arg8[%c0_84, %c0_85, %c0_86] : memref<1x196x64xf32, #tpu.memory_space<vmem>>, vector<1x196x64xf32>
    %102 = vector.shape_cast %101 : vector<1x196x64xf32> to vector<196x64xf32>
    %103 = vector.shape_cast %100 : vector<196x64xf32> to vector<1x196x64xf32>
    tpu.vector_store %arg8[%c0_84, %c0_85, %c0_86], %103 {strides = array<i32>} : memref<1x196x64xf32, #tpu.memory_space<vmem>>, vector<1x196x64xf32>,
    return
  }
  func.func @transform_0(%arg0: i32) -> (i32, i32, i32) {
    %c0_i32 = arith.constant 0 : i32
    %c0_i32_0 = arith.constant 0 : i32
    %c0_i32_1 = arith.constant 0 : i32
    return %arg0, %c0_i32, %c0_i32_0 : i32, i32, i32
  }
  func.func @transform_1(%arg0: i32) -> (i32, i32) {
    %c0_i32 = arith.constant 0 : i32
    %c0_i32_0 = arith.constant 0 : i32
    %c0_i32_1 = arith.constant 0 : i32
    return %c0_i32, %c0_i32_0 : i32, i32
  }
  func.func @transform_2(%arg0: i32) -> (i32, i32) {
    %c0_i32 = arith.constant 0 : i32
    %c0_i32_0 = arith.constant 0 : i32
    %c0_i32_1 = arith.constant 0 : i32
    return %c0_i32, %c0_i32_0 : i32, i32
  }
  func.func @transform_3(%arg0: i32) -> (i32, i32, i32) {
    %c0_i32 = arith.constant 0 : i32
    %c0_i32_0 = arith.constant 0 : i32
    %c0_i32_1 = arith.constant 0 : i32
    %c0_i32_2 = arith.constant 0 : i32
    return %c0_i32, %c0_i32_0, %c0_i32_1 : i32, i32, i32
  }
  func.func @transform_4(%arg0: i32) -> (i32, i32, i32) {
    %c0_i32 = arith.constant 0 : i32
    %c0_i32_0 = arith.constant 0 : i32
    %c0_i32_1 = arith.constant 0 : i32
    %c0_i32_2 = arith.constant 0 : i32
    return %c0_i32, %c0_i32_0, %c0_i32_1 : i32, i32, i32
  }
  func.func @transform_5(%arg0: i32) -> (i32, i32) {
    %c0_i32 = arith.constant 0 : i32
    %c0_i32_0 = arith.constant 0 : i32
    %c0_i32_1 = arith.constant 0 : i32
    return %c0_i32, %c0_i32_0 : i32, i32
  }
  func.func @transform_6(%arg0: i32) -> (i32, i32) {
    %c0_i32 = arith.constant 0 : i32
    %c0_i32_0 = arith.constant 0 : i32
    %c0_i32_1 = arith.constant 0 : i32
    return %c0_i32, %c0_i32_0 : i32, i32
  }
  func.func @transform_7(%arg0: i32) -> (i32, i32, i32) {
    %c0_i32 = arith.constant 0 : i32
    %c0_i32_0 = arith.constant 0 : i32
    %c0_i32_1 = arith.constant 0 : i32
    return %arg0, %c0_i32, %c0_i32_0 : i32, i32, i32
  }
}

</mosaic_0001>

<bundles_post_ra>
// kernel: tpu_custom_call.1
= control target key start
LH: loop header
LB: loop body
LE: loop exit
PB: predicated region body
PF: predicated region fallthrough
CT: control target
= control target key end

     0   :  { %12 = vsyncpa [#allocation3], 0  ;;  %s12490_s0 = inlined_call_operand.vmem [shape: f32[2,784,64], index: 0, kind: input, shape index: {}]   ;;  %s12491_s1 = inlined_call_operand.vmem [shape: f32[64,4], index: 1, kind: input, shape index: {}]   ;;  %s12492_s2 = inlined_call_operand.hbm [shape: f32[4,64], index: 2, kind: input, shape index: {}]   ;;  %s12493_s3 = inlined_call_operand.hbm [shape: f32[9,49,784], index: 3, kind: input, shape index: {}]   ;;  %s12494_s4 = inlined_call_operand.hbm [shape: bf16[9,64,64], index: 4, kind: input, shape index: {}]   ;;  %s12495_s5 = inlined_call_operand.hbm [shape: f32[1,64], index: 5, kind: input, shape index: {}]   ;;  %s12496_s6 = inlined_call_operand.vmem [shape: f32[196,49], index: 6, kind: input, shape index: {}]   ;;  %s12497_s7 = inlined_call_operand.vmem [shape: f32[2,196,64], index: 7, kind: output, shape index: {}]  }
   0x1   :  { %13 = vsyncpa [#allocation5], 0 }
   0x2   :  { %14 = vsyncpa [#allocation8], 0  ;;  %s10180_s24 = smov 0  }
   0x3 LB: > { %s10129_s25 = smov [#allocation4]   ;;  %s10186_s27 = sadd.s32 4294967295, %s10127_s24   ;;  %s10127_s24 = sphi %s10180_s24, %s20_s24  }
   0x4   : > { %s229_s26 = sshll.u32 %s10129_s25, 4  ;;  %p6650_p0 = scmp.ge.s32.totalorder %s10127_s24, 1  ;;  %s10191_s26 = int_to_ptr.vmem [resolvable:$true] %s229_s26 }
   0x5   : > { %p203_p1 = scmp.lt.s32.totalorder %s10127_s24, 3  ;;  %p12498_p2 = scmp.eq.s32.totalorder %s10186_s27, 0 }
   0x6   : > { %s10130_s29 = smov [#allocation2]   ;;  %s10131_s9 = smov [#allocation6]  }
   0x7   : > { %p10193_p3 = pnand %p6650_p0, %p203_p1  ;;  %s219_s30 = sshll.u32 %s10130_s29, 4  ;;  %s10199_s30 = int_to_ptr.vmem [resolvable:$true] %s219_s30 }
   0x8   : > { %s242_s10 = sshll.u32 %s10131_s9, 4  ;;  %s9997_s13 = scalar_lea.hbm %s12493_s3, 56448  ;;  %s10207_s10 = int_to_ptr.vmem [resolvable:$true] %s242_s10 }
   0x9   : > { %s12637_s28 = scalar_select %p10193_p3, 1, 0 }
   0xa   : > { %p9917_p4 = pneg %p10193_p3  ;;  %p9998_p6 = scmp.ne.s32.totalorder %s12493_s3, %s9997_s13 }
   0xb   : > { %p10004_p10 = scmp.lt.u32.totalorder %s9997_s13, %s12493_s3 }
   0xc   : > { %p10203_p5 = pnand %p12498_p2, %p9917_p4 }
   0xe   : > { %p10217_p7 = pneg %p10203_p5 }
  0x10   : > { %p10000_p8 = pnand %p10217_p7, %p9998_p6 }
  0x12   : > { %p10001_p9 = pneg %p10000_p8 }
  0x14   : > { %p10006_p11 = pnand %p10004_p10, %p10001_p9 }
  0x16   : > { %10009 = shalt.err (!%p10006_p11)
}
  0x17   : > { %s10010_s19 = scalar_lea.vmem %s10191_s26, 56448  ;;  %p10018_p1 = scmp.lt.s32.totalorder %s10191_s26, %s10191_s26 }
  0x18   : > { %p10011_p12 = scmp.ne.s32.totalorder %s10191_s26, %s10010_s19  ;;  %p10019_p4 = scmp.lt.s32.totalorder %s10010_s19, %s10010_s19 }
  0x1a   : > { %p10013_p13 = pnand %p10011_p12, %p10217_p7  ;;  %p10020_p6 = por %p10019_p4, %p10018_p1 }
  0x1c   : > { %p10014_p0 = pneg %p10013_p13 }
  0x1e   : > { %p10021_p8 = pnand %p10020_p6, %p10014_p0 }
  0x20   : > { %10024 = shalt.err (!%p10021_p8)
}
  0x21   : > { %s10132_s20 = smov 896   ;;  %s10133_s21 = smov 56  }
  0x22   : > { %9923 = dma.hbm_to_vmem [thread:$0]  (!%p10203_p5), %s12493_s3, 56448, %s10191_s26, [#allocation5], %s10132_s20, %s10132_s20, %s10133_s21  }
  0x23   : > { %s10025_s9 = scalar_lea.hbm %s12492_s2, 64 }
  0x24   : > { %p10026_p9 = scmp.ne.s32.totalorder %s12492_s2, %s10025_s9  ;;  %p10032_p12 = scmp.lt.u32.totalorder %s10025_s9, %s12492_s2 }
  0x26   : > { %p10028_p10 = pnand %p10026_p9, %p10217_p7 }
  0x28   : > { %p10029_p11 = pneg %p10028_p10 }
  0x2a   : > { %p10034_p13 = pnand %p10032_p12, %p10029_p11 }
  0x2c   : > { %10037 = shalt.err (!%p10034_p13)
}
  0x2d   : > { %s10038_s26 = scalar_lea.vmem %s10199_s30, 64  ;;  %p10046_p6 = scmp.lt.s32.totalorder %s10199_s30, %s10199_s30 }
  0x2e   : > { %p10039_p0 = scmp.ne.s32.totalorder %s10199_s30, %s10038_s26  ;;  %p10047_p8 = scmp.lt.s32.totalorder %s10038_s26, %s10038_s26 }
  0x30   : > { %p10041_p1 = pnand %p10039_p0, %p10217_p7  ;;  %p10048_p9 = por %p10047_p8, %p10046_p6 }
  0x32   : > { %p10042_p4 = pneg %p10041_p1 }
  0x34   : > { %p10049_p10 = pnand %p10048_p9, %p10042_p4 }
  0x36   : > { %10052 = shalt.err (!%p10049_p10)
}
  0x37   : > { %9920 = dma.hbm_to_vmem [thread:$0]  (!%p10203_p5), %s12492_s2, 64, %s10199_s30, [#allocation3]  }
  0x38   : > { %s10053_s20 = scalar_lea.hbm %s12494_s4, 4608 }
  0x39   : > { %p10054_p11 = scmp.ne.s32.totalorder %s12494_s4, %s10053_s20  ;;  %p10060_p0 = scmp.lt.u32.totalorder %s10053_s20, %s12494_s4 }
  0x3b   : > { %p10056_p12 = pnand %p10054_p11, %p10217_p7 }
  0x3d   : > { %p10057_p13 = pneg %p10056_p12 }
  0x3f   : > { %p10062_p1 = pnand %p10060_p0, %p10057_p13 }
  0x41   : > { %10065 = shalt.err (!%p10062_p1)
}
  0x42   : > { %s10066_s30 = scalar_lea.vmem %s10207_s10, 4608  ;;  %p10074_p9 = scmp.lt.s32.totalorder %s10207_s10, %s10207_s10 }
  0x43   : > { %p10067_p4 = scmp.ne.s32.totalorder %s10207_s10, %s10066_s30  ;;  %p10075_p10 = scmp.lt.s32.totalorder %s10066_s30, %s10066_s30 }
  0x45   : > { %p10069_p6 = pnand %p10067_p4, %p10217_p7  ;;  %p10076_p11 = por %p10075_p10, %p10074_p9 }
  0x47   : > { %p10070_p8 = pneg %p10069_p6 }
  0x49   : > { %p10077_p12 = pnand %p10076_p11, %p10070_p8 }
  0x4b   : > { %10080 = shalt.err (!%p10077_p12)
}
  0x4c   : > { %s10134_s29 = smov 64   ;;  %s10135_s9 = smov 4  }
  0x4d   : > { %9926 = dma.hbm_to_vmem [thread:$0]  (!%p10203_p5), %s12494_s4, 4608, %s10207_s10, [#allocation5], %s10134_s29, %s10134_s29, %s10135_s9  }
  0x4e   : > { %s10136_s13 = smov [#allocation7]   ;;  %s10081_s17 = scalar_lea.hbm %s12495_s5, 16 }
  0x4f   : > { %s256_s14 = sshll.u32 %s10136_s13, 4  ;;  %p10082_p13 = scmp.ne.s32.totalorder %s12495_s5, %s10081_s17  ;;  %s257_s14 = int_to_ptr.vmem [resolvable:$true] %s256_s14 }
  0x50   : > { %p10088_p4 = scmp.lt.u32.totalorder %s10081_s17, %s12495_s5 }
  0x51   : > { %p10084_p0 = pnand %p10082_p13, %p10217_p7 }
  0x53   : > { %p10085_p1 = pneg %p10084_p0 }
  0x55   : > { %p10090_p6 = pnand %p10088_p4, %p10085_p1 }
  0x57   : > { %10093 = shalt.err (!%p10090_p6)
}
  0x58   : > { %s10094_s10 = scalar_lea.vmem %s257_s14, 16  ;;  %s10101_s22 = scalar_lea.vmem %s257_s14, 32 }
  0x59   : > { %p10095_p8 = scmp.ne.s32.totalorder %s257_s14, %s10094_s10  ;;  %p10102_p11 = scmp.lt.s32.totalorder %s257_s14, %s257_s14 }
  0x5a   : > { %p10103_p12 = scmp.lt.s32.totalorder %s10101_s22, %s10094_s10 }
  0x5b   : > { %p10097_p9 = pnand %p10095_p8, %p10217_p7 }
  0x5c   : > { %p10104_p2 = por %p10103_p12, %p10102_p11 }
  0x5d   : > { %p10098_p10 = pneg %p10097_p9 }
  0x5f   : > { %p10105_p3 = pnand %p10104_p2, %p10098_p10 }
  0x61   : > { %10108 = shalt.err (!%p10105_p3)
}
  0x62   : > { %9929 = dma.hbm_to_vmem [thread:$0]  (!%p10203_p5), %s12495_s5, 16, %s257_s14, [#allocation8]  }
  0x63   : > { %p12640_p13 = scmp.ne.s32.totalorder %s12637_s28, 0 }
  0x65   : > { %280 = sbr.rel (%p12640_p13) target bundleno = 3699 (0xe73), region = 48 }
  0x6c   : > { %p12641_p0 = scmp.eq.s32.totalorder %s10186_s27, 0 }
  0x6e   : > { %10114 = dma.done.wait (%p12641_p0), [#allocation3], 64   ;;  %p12642_p7 = pmov %p12641_p0 }
  0x6f   : > { %p12643_p1 = pmov %p12641_p0 }
  0x70   : > { %10116 = vsyncadd (%p12642_p7), [#allocation3], 4294967232 }
  0x71   : > { %10118 = dma.done.wait (%p12643_p1), [#allocation5], 61056   ;;  %p12644_p2 = pmov %p12641_p0 }
  0x72   : > { %p12645_p3 = pmov %p12641_p0 }
  0x73   : > { %10120 = vsyncadd (%p12644_p2), [#allocation5], 4294906240 }
  0x74   : > { %10122 = dma.done.wait (%p12645_p3), [#allocation8], 16   ;;  %p12646_p5 = pmov %p12641_p0 }
  0x75   : > { %p324_p4 = scmp.lt.s32.totalorder %s10186_s27, 1  ;;  %v12500_v0 = vmov 0.0|0.0   ;;  %vm10138_vm0 = vmmov 0   ;;  %v12502_v1 = vmov 0.0   ;;  %v637_v2 = vld [vmem:[%s12491_s1] sm:$0xff]  ;;  %v638_v3 = vld [vmem:[%s12491_s1 + $0x8] sm:$0xff] }
  0x76   : > { %10124 = vsyncadd (%p12646_p5), [#allocation8], 4294967280  ;;  %8939 = vmatprep.subr.bf16.mxu0 %v12500_v0  ;;  %8473 = vmatprep.mubr.msk.f32.mxu0 %vm10138_vm0, %v12502_v1  ;;  %v639_v4 = vld [vmem:[%s12491_s1 + $0x10] sm:$0xff]  ;;  %vm433_vm1 = vcmask 523264   ;;  %v8940_v5 = vpack.c.bf16 %v638_v3, %v637_v2  ;;  %v640_v6 = vld [vmem:[%s12491_s1 + $0x18] sm:$0xff]  ;;  %vm724_vm2 = vcmask 1043456  }
  0x77   : > { %s12864_s27 = smov (!%p324_p4, %s10186_s27), 1  ;;  %8476 = vmatprep.subr.mxu1 %v12502_v1  ;;  %8478 = vmatprep.mubr.msk.f32.mxu1 %vm10138_vm0, %v12502_v1  ;;  %v8943_v8 = vpack.c.bf16 %v640_v6, %v639_v4  ;;  %v641_v13 = vld [vmem:[%s12491_s1 + $0x20] sm:$0xff]  ;;  %v642_v14 = vld [vmem:[%s12491_s1 + $0x28] sm:$0xff]  ;;  %v643_v23 = vld [vmem:[%s12491_s1 + $0x30] sm:$0xff]  ;;  %vm720_vm3 = vcmask 31744   ;;  %vm955_vm4 = vcmask 130048  }
  0x78   : > { %s9899_s28 = smul.u32 784, %s12864_s27  ;;  %8941 = vmatpush3.bf16.msra.mxu0 %v8940_v5  ;;  %v8946_v20 = vpack.c.bf16 %v642_v14, %v641_v13  ;;  %v644_v24 = vld [vmem:[%s12491_s1 + $0x38] sm:$0xff]  ;;  %vm6332_vm5 = vcmask 1040384   ;;  %vm6256_vm6 = vcmask 400384   ;;  %vm6550_vm7 = vcmask 519168  }
  0x79   : > { %8942 = vmatprep.subr.bf16.mxu0 %v12500_v0  ;;  %v8949_v29 = vpack.c.bf16 %v644_v24, %v643_v23  ;;  %s9900_s12 = smul.u32 200, %s12864_s27 }
  0x7a   : > { %s10330_s30 = scalar_lea.vmem %s12490_s0, %s9899_s28 }
  0x7b   : > { %v10345_v7 = vld [vmem:[%s10330_s30] sm:$0xff]  ;;  %v10348_v9 = vld [vmem:[%s10330_s30 + $0x8] sm:$0xff]  ;;  %v10351_v10 = vld [vmem:[%s10330_s30 + $0x10] sm:$0xff]  ;;  %s12436_s26 = scalar_lea.vmem %s12497_s7, %s9900_s12 }
  0x7c   : > { %v10354_v11 = vld [vmem:[%s10330_s30 + $0x18] sm:$0xff]  ;;  %v434_v12 = vsel %vm433_vm1, %v10345_v7, 0.0  ;;  %v435_v15 = vsel %vm433_vm1, %v10348_v9, 0.0  ;;  %v437_v16 = vsel %vm433_vm1, %v10351_v10, 0.0  ;;  %v10370_v17 = vld [vmem:[%s10330_s30 + $0x20] sm:$0xff]  ;;  %8944 = vmatpush3.bf16.msra.mxu0 %v8943_v8  ;;  %v10375_v21 = vld [vmem:[%s10330_s30 + $0x28] sm:$0xff] }
  0x7d   : > { %v436_v18 = vadd.f32 %v435_v15, %v434_v12  ;;  %v439_v19 = vsel %vm433_vm1, %v10354_v11, 0.0  ;;  %8945 = vmatprep.subr.bf16.mxu0 %v12500_v0  ;;  %v441_v25 = vsel %vm433_vm1, %v10370_v17, 0.0  ;;  %v10387_v26 = vld [vmem:[%s10330_s30 + $0x30] sm:$0xff]  ;;  %v443_v28 = vsel %vm433_vm1, %v10375_v21, 0.0  ;;  %v10392_v30 = vld [vmem:[%s10330_s30 + $0x38] sm:$0xff]  ;;  %v10398_v33 = vld [vmem:[%s10330_s30 + $0x40] sm:$0xff] }
  0x7e   : > { %v445_v32 = vsel %vm433_vm1, %v10387_v26, 0.0  ;;  %v447_v35 = vsel %vm433_vm1, %v10392_v30, 0.0  ;;  %v10403_v36 = vld [vmem:[%s10330_s30 + $0x48] sm:$0xff]  ;;  %v449_v38 = vsel %vm433_vm1, %v10398_v33, 0.0  ;;  %v10409_v39 = vld [vmem:[%s10330_s30 + $0x50] sm:$0xff]  ;;  %v10414_v42 = vld [vmem:[%s10330_s30 + $0x58] sm:$0xff] }
  0x7f   : > { %v438_v22 = vadd.f32 %v437_v16, %v436_v18  ;;  %12647 = vst [vmem:[#allocation12_spill] sm:$0xff] %v10409_v39  ;;  %v451_v41 = vsel %vm433_vm1, %v10403_v36, 0.0  ;;  %12648 = vst [vmem:[#allocation13_spill] sm:$0xff] %v10414_v42  ;;  %v453_v44 = vsel %vm433_vm1, %v10409_v39, 0.0  ;;  %v10419_v45 = vld [vmem:[%s10330_s30 + $0x60] sm:$0xff]  ;;  %v455_v47 = vsel %vm433_vm1, %v10414_v42, 0.0 }
  0x80   : > { %8947 = vmatpush3.bf16.msra.mxu0 %v8946_v20  ;;  %12649 = vst [vmem:[#allocation14_spill] sm:$0xff] %v10419_v45  ;;  %v10424_v48 = vld [vmem:[%s10330_s30 + $0x68] sm:$0xff]  ;;  %v457_v50 = vsel %vm433_vm1, %v10419_v45, 0.0  ;;  %v10429_v51 = vld [vmem:[%s10330_s30 + $0x70] sm:$0xff]  ;;  %v10434_v54 = vld [vmem:[%s10330_s30 + $0x78] sm:$0xff] }
  0x81   : > { %v440_v27 = vadd.f32 %v439_v19, %v438_v22  ;;  %8948 = vmatprep.subr.bf16.mxu0 %v12500_v0  ;;  %12650 = vst [vmem:[#allocation15_spill] sm:$0xff] %v10424_v48  ;;  %12651 = vst [vmem:[#allocation16_spill] sm:$0xff] %v10429_v51  ;;  %v459_v53 = vsel %vm433_vm1, %v10424_v48, 0.0  ;;  %v461_v56 = vsel %vm433_vm1, %v10429_v51, 0.0  ;;  %v10439_v57 = vld [vmem:[%s10330_s30 + $0x80] sm:$0xff]  ;;  %v463_v59 = vsel %vm433_vm1, %v10434_v54, 0.0 }
  0x82   : > { %12652 = vst [vmem:[#allocation17_spill] sm:$0xff] %v10434_v54  ;;  %v10444_v60 = vld [vmem:[%s10330_s30 + $0x88] sm:$0xff]  ;;  %v10447_v62 = vld [vmem:[%s10330_s30 + $0x90] sm:$0xff]  ;;  %v465_v63 = vsel %vm433_vm1, %v10439_v57, 0.0  ;;  %v10452_v3 = vld [vmem:[%s10330_s30 + $0x98] sm:$0xff] }
  0x83   : > { %v442_v31 = vadd.f32 %v441_v25, %v440_v27  ;;  %v467_v4 = vsel %vm433_vm1, %v10444_v60, 0.0  ;;  %v10457_v5 = vld [vmem:[%s10330_s30 + $0xa0] sm:$0xff]  ;;  %v469_v8 = vsel %vm433_vm1, %v10447_v62, 0.0  ;;  %v10462_v12 = vld [vmem:[%s10330_s30 + $0xa8] sm:$0xff]  ;;  %v471_v14 = vsel %vm433_vm1, %v10452_v3, 0.0  ;;  %v10467_v15 = vld [vmem:[%s10330_s30 + $0xb0] sm:$0xff] }
  0x84   : > { %8950 = vmatpush3.bf16.msra.mxu0 %v8949_v29  ;;  %v473_v18 = vsel %vm433_vm1, %v10457_v5, 0.0  ;;  %v10472_v19 = vld [vmem:[%s10330_s30 + $0xb8] sm:$0xff]  ;;  %v475_v22 = vsel %vm433_vm1, %v10462_v12, 0.0  ;;  %v10477_v23 = vld [vmem:[%s10330_s30 + $0xc0] sm:$0xff]  ;;  %v477_v25 = vsel %vm433_vm1, %v10467_v15, 0.0  ;;  %v10482_v27 = vld [vmem:[%s10330_s30 + $0xc8] sm:$0xff] }
  0x85   : > { %v444_v34 = vadd.f32 %v443_v28, %v442_v31  ;;  %9047 = vmatprep.subr.bf16.mxu0 %v12500_v0  ;;  %v479_v29 = vsel %vm433_vm1, %v10472_v19, 0.0  ;;  %v10487_v31 = vld [vmem:[%s10330_s30 + $0xd0] sm:$0xff]  ;;  %v10624_v0 = vld [vmem:[%s10330_s30 + $0x1a8] sm:$0xff]  ;;  %v10674_v48 = vld [vmem:[%s10330_s30 + $0x1f8] sm:$0xff] }
  0x86   : > { %v10629_v1 = vld [vmem:[%s10330_s30 + $0x1b0] sm:$0xff]  ;;  %v10644_v54 = vld [vmem:[%s10330_s30 + $0x1c8] sm:$0xff]  ;;  %12667 = vst [vmem:[#allocation32_spill] sm:$0xff] %v10674_v48  ;;  %v10679_v45 = vld [vmem:[%s10330_s30 + $0x200] sm:$0xff] }
  0x87   : > { %v446_v37 = vadd.f32 %v445_v32, %v444_v34  ;;  %v481_v34 = vsel %vm433_vm1, %v10477_v23, 0.0  ;;  %v10649_v51 = vld [vmem:[%s10330_s30 + $0x1d0] sm:$0xff]  ;;  %12668 = vst [vmem:[#allocation33_spill] sm:$0xff] %v10679_v45 }
  0x89   : > { %v448_v40 = vadd.f32 %v447_v35, %v446_v37  ;;  %v10492_v35 = vld [vmem:[%s10330_s30 + $0xd8] sm:$0xff] }
  0x8b   : > { %v450_v43 = vadd.f32 %v449_v38, %v448_v40  ;;  %v483_v38 = vsel %vm433_vm1, %v10482_v27, 0.0  ;;  %v10497_v40 = vld [vmem:[%s10330_s30 + $0xe0] sm:$0xff] }
  0x8c   : > { %12653 = vst [vmem:[#allocation18_spill] sm:$0xff] %v10497_v40 }
  0x8d   : > { %v452_v46 = vadd.f32 %v451_v41, %v450_v43  ;;  %v485_v43 = vsel %vm433_vm1, %v10487_v31, 0.0 }
  0x8f   : > { %v454_v49 = vadd.f32 %v453_v44, %v452_v46  ;;  %v10502_v44 = vld [vmem:[%s10330_s30 + $0xe8] sm:$0xff] }
  0x90   : > { %12654 = vst [vmem:[#allocation19_spill] sm:$0xff] %v10502_v44 }
  0x91   : > { %v456_v52 = vadd.f32 %v455_v47, %v454_v49  ;;  %v487_v47 = vsel %vm433_vm1, %v10492_v35, 0.0  ;;  %v10507_v49 = vld [vmem:[%s10330_s30 + $0xf0] sm:$0xff] }
  0x92   : > { %12655 = vst [vmem:[#allocation20_spill] sm:$0xff] %v10507_v49 }
  0x93   : > { %v458_v55 = vadd.f32 %v457_v50, %v456_v52  ;;  %v489_v52 = vsel %vm433_vm1, %v10497_v40, 0.0 }
  0x95   : > { %v460_v58 = vadd.f32 %v459_v53, %v458_v55  ;;  %v10512_v53 = vld [vmem:[%s10330_s30 + $0xf8] sm:$0xff] }
  0x96   : > { %12656 = vst [vmem:[#allocation21_spill] sm:$0xff] %v10512_v53 }
  0x97   : > { %v462_v61 = vadd.f32 %v461_v56, %v460_v58  ;;  %v491_v56 = vsel %vm433_vm1, %v10502_v44, 0.0 }
  0x99   : > { %v464_v2 = vadd.f32 %v463_v59, %v462_v61  ;;  %v493_v59 = vsel %vm433_vm1, %v10507_v49, 0.0  ;;  %v10519_v61 = vld [vmem:[%s10330_s30 + $0x100] sm:$0xff]  ;;  %v10669_v49 = vld [vmem:[%s10330_s30 + $0x1f0] sm:$0xff] }
  0x9a   : > { %12666 = vst [vmem:[#allocation31_spill] sm:$0xff] %v10669_v49 }
  0x9b   : > { %v466_v6 = vadd.f32 %v465_v63, %v464_v2  ;;  %v495_v2 = vsel %vm433_vm1, %v10512_v53, 0.0  ;;  %v10664_v53 = vld [vmem:[%s10330_s30 + $0x1e8] sm:$0xff] }
  0x9c   : > { %12665 = vst [vmem:[#allocation30_spill] sm:$0xff] %v10664_v53 }
  0x9d   : > { %v468_v13 = vadd.f32 %v467_v4, %v466_v6  ;;  %v10524_v4 = vld [vmem:[%s10330_s30 + $0x108] sm:$0xff] }
  0x9f   : > { %v470_v16 = vadd.f32 %v469_v8, %v468_v13  ;;  %v497_v8 = vsel %vm433_vm1, %v10519_v61, 0.0  ;;  %v10529_v13 = vld [vmem:[%s10330_s30 + $0x110] sm:$0xff] }
  0xa1   : > { %v472_v20 = vadd.f32 %v471_v14, %v470_v16  ;;  %v499_v16 = vsel %vm433_vm1, %v10524_v4, 0.0 }
  0xa3   : > { %v474_v24 = vadd.f32 %v473_v18, %v472_v20  ;;  %v10534_v18 = vld [vmem:[%s10330_s30 + $0x118] sm:$0xff] }
  0xa5   : > { %v476_v28 = vadd.f32 %v475_v22, %v474_v24  ;;  %v501_v22 = vsel %vm433_vm1, %v10529_v13, 0.0  ;;  %v10539_v24 = vld [vmem:[%s10330_s30 + $0x120] sm:$0xff] }
  0xa7   : > { %v478_v32 = vadd.f32 %v477_v25, %v476_v28  ;;  %v503_v28 = vsel %vm433_vm1, %v10534_v18, 0.0 }
  0xa9   : > { %v480_v37 = vadd.f32 %v479_v29, %v478_v32  ;;  %v10544_v29 = vld [vmem:[%s10330_s30 + $0x128] sm:$0xff] }
  0xab   : > { %v482_v41 = vadd.f32 %v481_v34, %v480_v37  ;;  %v505_v34 = vsel %vm433_vm1, %v10539_v24, 0.0  ;;  %v10549_v37 = vld [vmem:[%s10330_s30 + $0x130] sm:$0xff] }
  0xad   : > { %v484_v46 = vadd.f32 %v483_v38, %v482_v41  ;;  %v507_v41 = vsel %vm433_vm1, %v10544_v29, 0.0 }
  0xaf   : > { %v486_v50 = vadd.f32 %v485_v43, %v484_v46  ;;  %v10554_v43 = vld [vmem:[%s10330_s30 + $0x138] sm:$0xff] }
  0xb1   : > { %v488_v55 = vadd.f32 %v487_v47, %v486_v50  ;;  %v509_v47 = vsel %vm433_vm1, %v10549_v37, 0.0  ;;  %v10559_v50 = vld [vmem:[%s10330_s30 + $0x140] sm:$0xff] }
  0xb3   : > { %v490_v58 = vadd.f32 %v489_v52, %v488_v55  ;;  %v511_v55 = vsel %vm433_vm1, %v10554_v43, 0.0 }
  0xb5   : > { %v492_v63 = vadd.f32 %v491_v56, %v490_v58  ;;  %v10564_v56 = vld [vmem:[%s10330_s30 + $0x148] sm:$0xff] }
  0xb7   : > { %v494_v6 = vadd.f32 %v493_v59, %v492_v63  ;;  %v513_v59 = vsel %vm433_vm1, %v10559_v50, 0.0  ;;  %v10569_v63 = vld [vmem:[%s10330_s30 + $0x150] sm:$0xff] }
  0xb8   : > { %12657 = vst [vmem:[#allocation22_spill] sm:$0xff] %v10569_v63 }
  0xb9   : > { %v496_v14 = vadd.f32 %v495_v2, %v494_v6  ;;  %v515_v6 = vsel %vm433_vm1, %v10564_v56, 0.0 }
  0xbb   : > { %v498_v20 = vadd.f32 %v497_v8, %v496_v14  ;;  %v10574_v8 = vld [vmem:[%s10330_s30 + $0x158] sm:$0xff] }
  0xbc   : > { %12658 = vst [vmem:[#allocation23_spill] sm:$0xff] %v10574_v8 }
  0xbd   : > { %v500_v25 = vadd.f32 %v499_v16, %v498_v20  ;;  %v517_v16 = vsel %vm433_vm1, %v10569_v63, 0.0  ;;  %v10579_v20 = vld [vmem:[%s10330_s30 + $0x160] sm:$0xff] }
  0xbe   : > { %12659 = vst [vmem:[#allocation24_spill] sm:$0xff] %v10579_v20 }
  0xbf   : > { %v502_v32 = vadd.f32 %v501_v22, %v500_v25  ;;  %v519_v25 = vsel %vm433_vm1, %v10574_v8, 0.0 }
  0xc1   : > { %v504_v38 = vadd.f32 %v503_v28, %v502_v32  ;;  %v10584_v28 = vld [vmem:[%s10330_s30 + $0x168] sm:$0xff] }
  0xc2   : > { %12660 = vst [vmem:[#allocation25_spill] sm:$0xff] %v10584_v28 }
  0xc3   : > { %v506_v46 = vadd.f32 %v505_v34, %v504_v38  ;;  %v521_v34 = vsel %vm433_vm1, %v10579_v20, 0.0  ;;  %v10589_v38 = vld [vmem:[%s10330_s30 + $0x170] sm:$0xff]  ;;  %v10659_v20 = vld [vmem:[%s10330_s30 + $0x1e0] sm:$0xff] }
  0xc4   : > { %12661 = vst [vmem:[#allocation26_spill] sm:$0xff] %v10589_v38  ;;  %12664 = vst [vmem:[#allocation29_spill] sm:$0xff] %v10659_v20 }
  0xc5   : > { %v508_v52 = vadd.f32 %v507_v41, %v506_v46  ;;  %v523_v46 = vsel %vm433_vm1, %v10584_v28, 0.0  ;;  %v10654_v28 = vld [vmem:[%s10330_s30 + $0x1d8] sm:$0xff] }
  0xc6   : > { %12663 = vst [vmem:[#allocation28_spill] sm:$0xff] %v10654_v28 }
  0xc7   : > { %v510_v58 = vadd.f32 %v509_v47, %v508_v52  ;;  %v10594_v47 = vld [vmem:[%s10330_s30 + $0x178] sm:$0xff] }
  0xc8   : > { %12662 = vst [vmem:[#allocation27_spill] sm:$0xff] %v10594_v47 }
  0xc9   : > { %v512_v2 = vadd.f32 %v511_v55, %v510_v58  ;;  %v525_v55 = vsel %vm433_vm1, %v10589_v38, 0.0  ;;  %v10599_v58 = vld [vmem:[%s10330_s30 + $0x180] sm:$0xff] }
  0xca   : > { %v10639_v38 = vld [vmem:[%s10330_s30 + $0x1c0] sm:$0xff] }
  0xcb   : > { %v514_v14 = vadd.f32 %v513_v59, %v512_v2  ;;  %v527_v2 = vsel %vm433_vm1, %v10594_v47, 0.0  ;;  %v10634_v47 = vld [vmem:[%s10330_s30 + $0x1b8] sm:$0xff] }
  0xcd   : > { %v516_v22 = vadd.f32 %v515_v6, %v514_v14  ;;  %v10604_v6 = vld [vmem:[%s10330_s30 + $0x188] sm:$0xff] }
  0xcf   : > { %v518_v32 = vadd.f32 %v517_v16, %v516_v22  ;;  %v529_v16 = vsel %vm433_vm1, %v10599_v58, 0.0  ;;  %v10609_v22 = vld [vmem:[%s10330_s30 + $0x190] sm:$0xff] }
  0xd1   : > { %v520_v41 = vadd.f32 %v519_v25, %v518_v32  ;;  %v531_v32 = vsel %vm433_vm1, %v10604_v6, 0.0 }
  0xd3   : > { %v522_v52 = vadd.f32 %v521_v34, %v520_v41  ;;  %v10614_v34 = vld [vmem:[%s10330_s30 + $0x198] sm:$0xff] }
  0xd5   : > { %v524_v59 = vadd.f32 %v523_v46, %v522_v52  ;;  %v533_v46 = vsel %vm433_vm1, %v10609_v22, 0.0  ;;  %v10619_v52 = vld [vmem:[%s10330_s30 + $0x1a0] sm:$0xff] }
  0xd7   : > { %v526_v14 = vadd.f32 %v525_v55, %v524_v59  ;;  %v535_v59 = vsel %vm433_vm1, %v10614_v34, 0.0 }
  0xd9   : > { %v528_v25 = vadd.f32 %v527_v2, %v526_v14  ;;  %v537_v14 = vsel %vm433_vm1, %v10619_v52, 0.0 }
  0xdb   : > { %v530_v41 = vadd.f32 %v529_v16, %v528_v25  ;;  %v539_v25 = vsel %vm433_vm1, %v10624_v0, 0.0 }
  0xdd   : > { %v532_v55 = vadd.f32 %v531_v32, %v530_v41  ;;  %v541_v41 = vsel %vm433_vm1, %v10629_v1, 0.0 }
  0xdf   : > { %v534_v2 = vadd.f32 %v533_v46, %v532_v55  ;;  %v543_v55 = vsel %vm433_vm1, %v10634_v47, 0.0 }
  0xe1   : > { %v536_v16 = vadd.f32 %v535_v59, %v534_v2  ;;  %v545_v2 = vsel %vm433_vm1, %v10639_v38, 0.0 }
  0xe3   : > { %v538_v32 = vadd.f32 %v537_v14, %v536_v16  ;;  %v547_v16 = vsel %vm433_vm1, %v10644_v54, 0.0 }
  0xe5   : > { %v540_v46 = vadd.f32 %v539_v25, %v538_v32  ;;  %v549_v32 = vsel %vm433_vm1, %v10649_v51, 0.0 }
  0xe7   : > { %v542_v59 = vadd.f32 %v541_v41, %v540_v46  ;;  %v551_v46 = vsel %vm433_vm1, %v10654_v28, 0.0 }
  0xe9   : > { %v544_v14 = vadd.f32 %v543_v55, %v542_v59  ;;  %v553_v59 = vsel %vm433_vm1, %v10659_v20, 0.0  ;;  %v10684_v20 = vld [vmem:[%s10330_s30 + $0x208] sm:$0xff] }
  0xea   : > { %12669 = vst [vmem:[#allocation34_spill] sm:$0xff] %v10684_v20 }
  0xeb   : > { %v546_v25 = vadd.f32 %v545_v2, %v544_v14  ;;  %v555_v14 = vsel %vm433_vm1, %v10664_v53, 0.0  ;;  %v10689_v53 = vld [vmem:[%s10330_s30 + $0x210] sm:$0xff] }
  0xec   : > { %12670 = vst [vmem:[#allocation35_spill] sm:$0xff] %v10689_v53 }
  0xed   : > { %v548_v41 = vadd.f32 %v547_v16, %v546_v25  ;;  %v557_v25 = vsel %vm433_vm1, %v10669_v49, 0.0  ;;  %v10694_v49 = vld [vmem:[%s10330_s30 + $0x218] sm:$0xff] }
  0xee   : > { %12671 = vst [vmem:[#allocation36_spill] sm:$0xff] %v10694_v49 }
  0xef   : > { %v550_v55 = vadd.f32 %v549_v32, %v548_v41  ;;  %v559_v41 = vsel %vm433_vm1, %v10674_v48, 0.0  ;;  %v10699_v48 = vld [vmem:[%s10330_s30 + $0x220] sm:$0xff] }
  0xf0   : > { %12672 = vst [vmem:[#allocation37_spill] sm:$0xff] %v10699_v48 }
  0xf1   : > { %v552_v2 = vadd.f32 %v551_v46, %v550_v55  ;;  %v561_v55 = vsel %vm433_vm1, %v10679_v45, 0.0  ;;  %v10704_v45 = vld [vmem:[%s10330_s30 + $0x228] sm:$0xff] }
  0xf2   : > { %12673 = vst [vmem:[#allocation38_spill] sm:$0xff] %v10704_v45 }
  0xf3   : > { %v554_v16 = vadd.f32 %v553_v59, %v552_v2  ;;  %v563_v2 = vsel %vm433_vm1, %v10684_v20, 0.0  ;;  %v10709_v20 = vld [vmem:[%s10330_s30 + $0x230] sm:$0xff] }
  0xf4   : > { %12674 = vst [vmem:[#allocation39_spill] sm:$0xff] %v10709_v20 }
  0xf5   : > { %v556_v32 = vadd.f32 %v555_v14, %v554_v16  ;;  %v565_v16 = vsel %vm433_vm1, %v10689_v53, 0.0  ;;  %v10714_v53 = vld [vmem:[%s10330_s30 + $0x238] sm:$0xff] }
  0xf6   : > { %12675 = vst [vmem:[#allocation40_spill] sm:$0xff] %v10714_v53 }
  0xf7   : > { %v558_v46 = vadd.f32 %v557_v25, %v556_v32  ;;  %v567_v32 = vsel %vm433_vm1, %v10694_v49, 0.0  ;;  %v10719_v49 = vld [vmem:[%s10330_s30 + $0x240] sm:$0xff] }
  0xf8   : > { %12676 = vst [vmem:[#allocation41_spill] sm:$0xff] %v10719_v49 }
  0xf9   : > { %v560_v59 = vadd.f32 %v559_v41, %v558_v46  ;;  %v569_v46 = vsel %vm433_vm1, %v10699_v48, 0.0  ;;  %v10724_v48 = vld [vmem:[%s10330_s30 + $0x248] sm:$0xff] }
  0xfa   : > { %12677 = vst [vmem:[#allocation42_spill] sm:$0xff] %v10724_v48 }
  0xfb   : > { %v562_v14 = vadd.f32 %v561_v55, %v560_v59  ;;  %v571_v59 = vsel %vm433_vm1, %v10704_v45, 0.0  ;;  %v10729_v45 = vld [vmem:[%s10330_s30 + $0x250] sm:$0xff] }
  0xfc   : > { %12678 = vst [vmem:[#allocation43_spill] sm:$0xff] %v10729_v45 }
  0xfd   : > { %v564_v25 = vadd.f32 %v563_v2, %v562_v14  ;;  %v573_v14 = vsel %vm433_vm1, %v10709_v20, 0.0  ;;  %v10734_v20 = vld [vmem:[%s10330_s30 + $0x258] sm:$0xff] }
  0xfe   : > { %12679 = vst [vmem:[#allocation44_spill] sm:$0xff] %v10734_v20 }
  0xff   : > { %v566_v41 = vadd.f32 %v565_v16, %v564_v25  ;;  %v575_v25 = vsel %vm433_vm1, %v10714_v53, 0.0  ;;  %v10739_v53 = vld [vmem:[%s10330_s30 + $0x260] sm:$0xff] }
 0x100   : > { %12680 = vst [vmem:[#allocation45_spill] sm:$0xff] %v10739_v53 }
 0x101   : > { %v568_v55 = vadd.f32 %v567_v32, %v566_v41  ;;  %v577_v41 = vsel %vm433_vm1, %v10719_v49, 0.0  ;;  %v10744_v49 = vld [vmem:[%s10330_s30 + $0x268] sm:$0xff] }
 0x102   : > { %12681 = vst [vmem:[#allocation46_spill] sm:$0xff] %v10744_v49 }
 0x103   : > { %v570_v2 = vadd.f32 %v569_v46, %v568_v55  ;;  %v579_v55 = vsel %vm433_vm1, %v10724_v48, 0.0  ;;  %v10749_v48 = vld [vmem:[%s10330_s30 + $0x270] sm:$0xff] }
 0x104   : > { %12682 = vst [vmem:[#allocation47_spill] sm:$0xff] %v10749_v48 }
 0x105   : > { %v572_v16 = vadd.f32 %v571_v59, %v570_v2  ;;  %v581_v2 = vsel %vm433_vm1, %v10729_v45, 0.0  ;;  %v10754_v45 = vld [vmem:[%s10330_s30 + $0x278] sm:$0xff] }
 0x106   : > { %12683 = vst [vmem:[#allocation48_spill] sm:$0xff] %v10754_v45 }
 0x107   : > { %v574_v32 = vadd.f32 %v573_v14, %v572_v16  ;;  %v583_v16 = vsel %vm433_vm1, %v10734_v20, 0.0  ;;  %v10759_v20 = vld [vmem:[%s10330_s30 + $0x280] sm:$0xff] }
 0x108   : > { %12684 = vst [vmem:[#allocation49_spill] sm:$0xff] %v10759_v20 }
 0x109   : > { %v576_v46 = vadd.f32 %v575_v25, %v574_v32  ;;  %v585_v32 = vsel %vm433_vm1, %v10739_v53, 0.0  ;;  %v10764_v53 = vld [vmem:[%s10330_s30 + $0x288] sm:$0xff] }
 0x10a   : > { %12685 = vst [vmem:[#allocation50_spill] sm:$0xff] %v10764_v53 }
 0x10b   : > { %v578_v59 = vadd.f32 %v577_v41, %v576_v46  ;;  %v587_v46 = vsel %vm433_vm1, %v10744_v49, 0.0  ;;  %v10769_v49 = vld [vmem:[%s10330_s30 + $0x290] sm:$0xff] }
 0x10c   : > { %12686 = vst [vmem:[#allocation51_spill] sm:$0xff] %v10769_v49 }
 0x10d   : > { %v580_v14 = vadd.f32 %v579_v55, %v578_v59  ;;  %v589_v59 = vsel %vm433_vm1, %v10749_v48, 0.0  ;;  %v10774_v48 = vld [vmem:[%s10330_s30 + $0x298] sm:$0xff] }
 0x10e   : > { %12687 = vst [vmem:[#allocation52_spill] sm:$0xff] %v10774_v48 }
 0x10f   : > { %v582_v25 = vadd.f32 %v581_v2, %v580_v14  ;;  %v591_v14 = vsel %vm433_vm1, %v10754_v45, 0.0  ;;  %v10779_v45 = vld [vmem:[%s10330_s30 + $0x2a0] sm:$0xff] }
 0x110   : > { %12688 = vst [vmem:[#allocation53_spill] sm:$0xff] %v10779_v45 }
 0x111   : > { %v584_v41 = vadd.f32 %v583_v16, %v582_v25  ;;  %v593_v25 = vsel %vm433_vm1, %v10759_v20, 0.0  ;;  %v10784_v20 = vld [vmem:[%s10330_s30 + $0x2a8] sm:$0xff] }
 0x112   : > { %12689 = vst [vmem:[#allocation54_spill] sm:$0xff] %v10784_v20 }
 0x113   : > { %v586_v55 = vadd.f32 %v585_v32, %v584_v41  ;;  %v595_v41 = vsel %vm433_vm1, %v10764_v53, 0.0  ;;  %v10789_v53 = vld [vmem:[%s10330_s30 + $0x2b0] sm:$0xff] }
 0x114   : > { %12690 = vst [vmem:[#allocation55_spill] sm:$0xff] %v10789_v53 }
 0x115   : > { %v588_v2 = vadd.f32 %v587_v46, %v586_v55  ;;  %v597_v55 = vsel %vm433_vm1, %v10769_v49, 0.0  ;;  %v10794_v49 = vld [vmem:[%s10330_s30 + $0x2b8] sm:$0xff] }
 0x116   : > { %12691 = vst [vmem:[#allocation56_spill] sm:$0xff] %v10794_v49 }
 0x117   : > { %v590_v16 = vadd.f32 %v589_v59, %v588_v2  ;;  %v599_v2 = vsel %vm433_vm1, %v10774_v48, 0.0  ;;  %v10799_v48 = vld [vmem:[%s10330_s30 + $0x2c0] sm:$0xff] }
 0x118   : > { %12692 = vst [vmem:[#allocation57_spill] sm:$0xff] %v10799_v48 }
 0x119   : > { %v592_v32 = vadd.f32 %v591_v14, %v590_v16  ;;  %v601_v16 = vsel %vm433_vm1, %v10779_v45, 0.0  ;;  %v10804_v45 = vld [vmem:[%s10330_s30 + $0x2c8] sm:$0xff] }
 0x11a   : > { %12693 = vst [vmem:[#allocation58_spill] sm:$0xff] %v10804_v45 }
 0x11b   : > { %v594_v46 = vadd.f32 %v593_v25, %v592_v32  ;;  %v603_v32 = vsel %vm433_vm1, %v10784_v20, 0.0  ;;  %v10809_v20 = vld [vmem:[%s10330_s30 + $0x2d0] sm:$0xff] }
 0x11c   : > { %12694 = vst [vmem:[#allocation59_spill] sm:$0xff] %v10809_v20 }
 0x11d   : > { %v596_v59 = vadd.f32 %v595_v41, %v594_v46  ;;  %v605_v46 = vsel %vm433_vm1, %v10789_v53, 0.0  ;;  %v10814_v53 = vld [vmem:[%s10330_s30 + $0x2d8] sm:$0xff] }
 0x11e   : > { %12695 = vst [vmem:[#allocation60_spill] sm:$0xff] %v10814_v53 }
 0x11f   : > { %v598_v14 = vadd.f32 %v597_v55, %v596_v59  ;;  %v607_v59 = vsel %vm433_vm1, %v10794_v49, 0.0  ;;  %v10819_v49 = vld [vmem:[%s10330_s30 + $0x2e0] sm:$0xff] }
 0x120   : > { %12696 = vst [vmem:[#allocation61_spill] sm:$0xff] %v10819_v49 }
 0x121   : > { %v600_v25 = vadd.f32 %v599_v2, %v598_v14  ;;  %v609_v14 = vsel %vm433_vm1, %v10799_v48, 0.0  ;;  %v10824_v48 = vld [vmem:[%s10330_s30 + $0x2e8] sm:$0xff] }
 0x122   : > { %12697 = vst [vmem:[#allocation62_spill] sm:$0xff] %v10824_v48 }
 0x123   : > { %v602_v41 = vadd.f32 %v601_v16, %v600_v25  ;;  %v611_v25 = vsel %vm433_vm1, %v10804_v45, 0.0  ;;  %v10829_v45 = vld [vmem:[%s10330_s30 + $0x2f0] sm:$0xff] }
 0x124   : > { %12698 = vst [vmem:[#allocation63_spill] sm:$0xff] %v10829_v45 }
 0x125   : > { %v604_v55 = vadd.f32 %v603_v32, %v602_v41  ;;  %v613_v41 = vsel %vm433_vm1, %v10809_v20, 0.0 }
 0x127   : > { %v606_v2 = vadd.f32 %v605_v46, %v604_v55  ;;  %v615_v55 = vsel %vm433_vm1, %v10814_v53, 0.0 }
 0x129   : > { %v608_v16 = vadd.f32 %v607_v59, %v606_v2  ;;  %v617_v2 = vsel %vm433_vm1, %v10819_v49, 0.0 }
 0x12b   : > { %v610_v32 = vadd.f32 %v609_v14, %v608_v16  ;;  %v619_v14 = vsel %vm433_vm1, %v10824_v48, 0.0  ;;  %v10834_v16 = vld [vmem:[%s10330_s30 + $0x2f8] sm:$0xff] }
 0x12d   : > { %v612_v46 = vadd.f32 %v611_v25, %v610_v32  ;;  %v621_v25 = vsel %vm433_vm1, %v10829_v45, 0.0  ;;  %v431_v32 = vld [vmem:[%s10330_s30 + $0x300] sm:$0xff] }
 0x12e   : > { %v625_v49 = vsel %vm433_vm1, %v431_v32, 0.0 }
 0x12f   : > { %v614_v59 = vadd.f32 %v613_v41, %v612_v46  ;;  %v623_v41 = vsel %vm433_vm1, %v10834_v16, 0.0  ;;  %v432_v46 = vld [vmem:[%s10330_s30 + $0x308] sm:$0xff] }
 0x131   : > { %v616_v8 = vadd.f32 %v615_v55, %v614_v59  ;;  %v627_v55 = vsel %vm433_vm1, %v432_v46, 0.0 }
 0x133   : > { %v618_v20 = vadd.f32 %v617_v2, %v616_v8 }
 0x135   : > { %v620_v53 = vadd.f32 %v619_v14, %v618_v20  ;;  %v12699_v20 = vmov 0.0  }
 0x137   : > { %v622_v63 = vadd.f32 %v621_v25, %v620_v53  ;;  %v719_v53 = vld [vmem:[#allocation2] sm:$0xf]  ;;  %v804_v25 = vlaneseq }
 0x138   : > { %8477 = vmatpush3.msk.msra.mxu1 %vm724_vm2, %v719_v53 }
 0x139   : > { %v624_v44 = vadd.f32 %v623_v41, %v622_v63  ;;  %v805_v41 = vshrl.u32 %v804_v25, 7 }
 0x13b   : > { %v626_v59 = vadd.f32 %v625_v49, %v624_v44  ;;  %v907_v49 = vld [vmem:[#allocation4 + $0x8] sm:$0xff] }
 0x13d   : > { %v628_v48 = vadd.f32 %v627_v55, %v626_v59  ;;  %v806_v55 = vsub.s32 0, %v805_v41 }
 0x13f   : > { %v629_v40 = vrot.slane %v628_v48, 4 }
 0x141   : > { %v630_v42 = vadd.f32 %v629_v40, %v628_v48 }
 0x143   : > { %v631_v8 = vrot.slane %v630_v42, 2 }
 0x145   : > { %v632_v2 = vadd.f32 %v631_v8, %v630_v42 }
 0x147   : > { %v633_v39 = vrot.slane %v632_v2, 1 }
 0x149   : > { %v634_v45 = vadd.f32 %v633_v39, %v632_v2 }
 0x14b   : > { %v636_v28 = vmul.f32 0.0012755102, %v634_v45 }
 0x14d   : > { %8474 = vmatmul.mubr.msk.f32.vlgmr.msra.gmra.mrb[0].mxu0 %vm433_vm1, %v636_v28 }
 0x14e   : > { %8485 = vmatprep.mubr.msk.f32.mxu0 %vm10138_vm0, %v12699_v20 }
 0x220   : > { %v714_v63 = vpop.f32.mrb[0].mxu0 }
 0x221   : > { %v718_v14 = vmax.f32 %v714_v63, 0.0  ;;  %v8475_v44 = vpop.f32.mrb[1].mxu0 }
 0x223   : > { %8479 = vmatmul.mubr.msk.f32.vlgmr.msra.gmra.mrb[0].mxu1 %vm720_vm3, %v718_v14 }
 0x224   : > { %1041 = vmatprep.mubr.f32.mxu1 %v907_v49 }
 0x2f6   : > { %v794_v48 = vpop.f32.mrb[0].mxu1 }
 0x2f7   : > { %v798_v42 = vsub.f32 0.0, %v794_v48  ;;  %v8480_v40 = vpop.f32.mrb[1].mxu1 }
 0x2f9   : > { %v799_v39 = vmul.f32 1.442695, %v798_v42 }
 0x2fb   : > { %9993 = vpow2.f32 %v799_v39 }
 0x305   : > { %v9994_v45 = vpop.eup %9993 }
 0x306   : > { %v801_v28 = vadd.f32 1.0, %v9994_v45 }
 0x308   : > { %9995 = vrcp.f32 %v801_v28 }
 0x312   : > { %v9996_v59 = vpop.eup %9995 }
 0x313   : > { %v10847_v8 = vrot.slane %v9996_v59, %v806_v55  ;;  %v919_v55 = vld [vmem:[#allocation4 + $0x68] sm:$0xff] }
 0x315   : > { %v904_v2 = vmul.f32 %v10847_v8, %v431_v32  ;;  %v905_v53 = vmul.f32 %v10847_v8, %v432_v46  ;;  %v824_v14 = vmul.f32 %v10847_v8, %v10439_v57  ;;  %v825_v44 = vmul.f32 %v10847_v8, %v10444_v60 }
 0x316   : > { %v808_v49 = vmul.f32 %v10847_v8, %v10345_v7  ;;  %v809_v48 = vmul.f32 %v10847_v8, %v10348_v9  ;;  %v856_v32 = vmul.f32 %v10847_v8, %v10599_v58  ;;  %v857_v46 = vmul.f32 %v10847_v8, %v10604_v6  ;;  %v912_v58 = vld [vmem:[#allocation4 + $0x30] sm:$0xff] }
 0x317   : > { %v10851_v63 = vpack.c.bf16 %v905_v53, %v904_v2  ;;  %v10865_v42 = vpack.c.bf16 %v825_v44, %v824_v14  ;;  %v826_v57 = vmul.f32 %v10847_v8, %v10447_v62  ;;  %v827_v60 = vmul.f32 %v10847_v8, %v10452_v3  ;;  %v926_v44 = vld [vmem:[#allocation4 + $0xa0] sm:$0xff] }
 0x318   : > { %v840_v7 = vmul.f32 %v10847_v8, %v10519_v61  ;;  %v10874_v9 = vpack.c.bf16 %v809_v48, %v808_v49  ;;  %v10876_v40 = vpack.c.bf16 %v857_v46, %v856_v32  ;;  %v841_v6 = vmul.f32 %v10847_v8, %v10524_v4  ;;  %v933_v46 = vld [vmem:[#allocation4 + $0xd8] sm:$0xff] }
 0x319   : > { %12700 = vst [vmem:[#allocation64_spill] sm:$0xff] %v10851_v63  ;;  %9049 = vmatpush3.bf16.msra.mxu0 %v10851_v63  ;;  %v810_v39 = vmul.f32 %v10847_v8, %v10351_v10  ;;  %8952 = vmatprep.subr.bf16.mxu1 %v10865_v42  ;;  %v10883_v62 = vpack.c.bf16 %v827_v60, %v826_v57 }
 0x31a   : > { %12701 = vst [vmem:[#allocation65_spill] sm:$0xff] %v10876_v40  ;;  %v811_v3 = vmul.f32 %v10847_v8, %v10354_v11  ;;  %v858_v61 = vmul.f32 %v10847_v8, %v10609_v22  ;;  %v859_v45 = vmul.f32 %v10847_v8, %v10614_v34  ;;  %8954 = vmatpush3.bf16.msra.mxu1 %v10874_v9 }
 0x31b   : > { %9083 = vmatprep.subr.bf16.mxu0 %v10876_v40  ;;  %v10893_v4 = vpack.c.bf16 %v841_v6, %v840_v7  ;;  %v828_v10 = vmul.f32 %v10847_v8, %v10457_v5  ;;  %v829_v28 = vmul.f32 %v10847_v8, %v10462_v12  ;;  %8956 = vmatprep.subr.bf16.mxu1 %v10883_v62 }
 0x31c   : > { %8486 = vmatmul.mubr.msk.f32.vlgmr.msra.gmra.mrb[2].mxu0 %vm955_vm4, %v912_v58  ;;  %v10901_v11 = vpack.c.bf16 %v811_v3, %v810_v39  ;;  %v10903_v22 = vpack.c.bf16 %v859_v45, %v858_v61  ;;  %v842_v34 = vmul.f32 %v10847_v8, %v10529_v13  ;;  %v843_v5 = vmul.f32 %v10847_v8, %v10534_v18  ;;  %v940_v61 = vld [vmem:[#allocation4 + $0x110] sm:$0xff] }
 0x31d   : > { %9085 = vmatpush3.bf16.msra.mxu0 %v10893_v4  ;;  %v10908_v25 = vpack.c.bf16 %v829_v28, %v828_v10  ;;  %v812_v12 = vmul.f32 %v10847_v8, %v10370_v17  ;;  %v813_v41 = vmul.f32 %v10847_v8, %v10375_v21  ;;  %v860_v59 = vmul.f32 %v10847_v8, %v10619_v52  ;;  %v12709_v10 = vld [vmem:[#allocation18_spill] sm:$0xff]  ;;  %v12710_v28 = vld [vmem:[#allocation19_spill] sm:$0xff] }
 0x31e   : > { %9087 = vmatprep.subr.bf16.mxu0 %v10903_v22  ;;  %v861_v13 = vmul.f32 %v10847_v8, %v10624_v0  ;;  %v830_v2 = vmul.f32 %v10847_v8, %v10467_v15  ;;  %v831_v18 = vmul.f32 %v10847_v8, %v10472_v19  ;;  %8958 = vmatpush3.bf16.msra.mxu1 %v10901_v11 }
 0x31f   : > { %v10926_v17 = vpack.c.bf16 %v843_v5, %v842_v34  ;;  %8488 = vmatprep.mubr.msk.f32.mxu0 %vm10138_vm0, %v12699_v20  ;;  %v844_v21 = vmul.f32 %v10847_v8, %v10539_v24  ;;  %8960 = vmatprep.subr.bf16.mxu1 %v10908_v25  ;;  %v10933_v52 = vpack.c.bf16 %v813_v41, %v812_v12  ;;  %v12712_v12 = vld [vmem:[#allocation22_spill] sm:$0xff] }
 0x320   : > { %v10935_v0 = vpack.c.bf16 %v861_v13, %v860_v59  ;;  %8489 = vmatmul.mubr.msk.f32.gmra.mrb[4].mxu0 %vm955_vm4, %v919_v55  ;;  %v845_v15 = vmul.f32 %v10847_v8, %v10544_v29  ;;  %v814_v19 = vmul.f32 %v10847_v8, %v10387_v26  ;;  %v815_v53 = vmul.f32 %v10847_v8, %v10392_v30  ;;  %v12713_v55 = vld [vmem:[#allocation23_spill] sm:$0xff] }
 0x321   : > { %12702 = vst [vmem:[#allocation66_spill] sm:$0xff] %v10926_v17  ;;  %9089 = vmatpush3.bf16.msra.mxu0 %v10926_v17  ;;  %v862_v24 = vmul.f32 %v10847_v8, %v10629_v1  ;;  %v863_v14 = vmul.f32 %v10847_v8, %v10634_v47  ;;  %v10950_v49 = vpack.c.bf16 %v831_v18, %v830_v2  ;;  %v12715_v2 = vld [vmem:[#allocation29_spill] sm:$0xff] }
 0x322   : > { %12703 = vst [vmem:[#allocation67_spill] sm:$0xff] %v10935_v0  ;;  %9091 = vmatprep.subr.bf16.mxu0 %v10935_v0  ;;  %v832_v29 = vmul.f32 %v10847_v8, %v10477_v23  ;;  %v833_v26 = vmul.f32 %v10847_v8, %v10482_v27  ;;  %8491 = vmatprep.mubr.msk.f32.mxu0 %vm10138_vm0, %v12699_v20 }
 0x323   : > { %8962 = vmatpush3.bf16.msra.mxu1 %v10933_v52  ;;  %v10959_v1 = vpack.c.bf16 %v845_v15, %v844_v21  ;;  %v846_v30 = vmul.f32 %v10847_v8, %v10549_v37  ;;  %v847_v47 = vmul.f32 %v10847_v8, %v10554_v43  ;;  %v10966_v48 = vpack.c.bf16 %v815_v53, %v814_v19  ;;  %v12716_v21 = vld [vmem:[#allocation30_spill] sm:$0xff] }
 0x324   : > { %8964 = vmatprep.subr.bf16.mxu1 %v10950_v49  ;;  %v10968_v23 = vpack.c.bf16 %v863_v14, %v862_v24  ;;  %8492 = vmatmul.mubr.msk.f32.gmra.mrb[6].mxu0 %vm955_vm4, %v926_v44  ;;  %v816_v27 = vmul.f32 %v10847_v8, %v10398_v33  ;;  %v817_v32 = vmul.f32 %v10847_v8, %v10403_v36  ;;  %v12717_v53 = vld [vmem:[#allocation14_spill] sm:$0xff]  ;;  %v12718_v14 = vld [vmem:[#allocation15_spill] sm:$0xff] }
 0x325   : > { %9093 = vmatpush3.bf16.msra.mxu0 %v10959_v1  ;;  %v864_v37 = vmul.f32 %v10847_v8, %v10639_v38  ;;  %v865_v43 = vmul.f32 %v10847_v8, %v10644_v54  ;;  %v10981_v57 = vpack.c.bf16 %v833_v26, %v832_v29  ;;  %v834_v60 = vmul.f32 %v10847_v8, %v10487_v31  ;;  %v947_v29 = vld [vmem:[#allocation4 + $0x148] sm:$0xff] }
 0x326   : > { %12704 = vst [vmem:[#allocation68_spill] sm:$0xff] %v10968_v23  ;;  %9095 = vmatprep.subr.bf16.mxu0 %v10968_v23  ;;  %v835_v33 = vmul.f32 %v10847_v8, %v10492_v35  ;;  %8494 = vmatprep.mubr.msk.f32.mxu0 %vm10138_vm0, %v12699_v20  ;;  %v10990_v36 = vpack.c.bf16 %v847_v47, %v846_v30  ;;  %v12706_v35 = vld [vmem:[#allocation28_spill] sm:$0xff] }
 0x327   : > { %8966 = vmatpush3.bf16.msra.mxu1 %v10966_v48  ;;  %v848_v54 = vmul.f32 %v10847_v8, %v10559_v50  ;;  %v849_v38 = vmul.f32 %v10847_v8, %v10564_v56  ;;  %v10997_v7 = vpack.c.bf16 %v865_v43, %v864_v37  ;;  %v866_v31 = vmul.f32 %v10847_v8, %v10649_v51  ;;  %v12707_v50 = vld [vmem:[#allocation12_spill] sm:$0xff]  ;;  %v12708_v56 = vld [vmem:[#allocation13_spill] sm:$0xff] }
 0x328   : > { %8968 = vmatprep.subr.bf16.mxu1 %v10981_v57  ;;  %8495 = vmatmul.mubr.msk.f32.gmra.mrb[8].mxu0 %vm955_vm4, %v933_v46  ;;  %v867_v58 = vmul.f32 %v10847_v8, %v12706_v35  ;;  %v11005_v6 = vpack.c.bf16 %v817_v32, %v816_v27  ;;  %v818_v39 = vmul.f32 %v10847_v8, %v12707_v50  ;;  %v12719_v30 = vld [vmem:[#allocation20_spill] sm:$0xff]  ;;  %v12720_v27 = vld [vmem:[#allocation21_spill] sm:$0xff] }
 0x329   : > { %12705 = vst [vmem:[#allocation69_spill] sm:$0xff] %v10997_v7  ;;  %9097 = vmatpush3.bf16.msra.mxu0 %v10990_v36  ;;  %v819_v3 = vmul.f32 %v10847_v8, %v12708_v56  ;;  %v11012_v45 = vpack.c.bf16 %v835_v33, %v834_v60  ;;  %v836_v51 = vmul.f32 %v10847_v8, %v12709_v10  ;;  %v12722_v43 = vld [vmem:[#allocation24_spill] sm:$0xff]  ;;  %v12723_v60 = vld [vmem:[#allocation25_spill] sm:$0xff]  ;;  %v954_v10 = vld [vmem:[#allocation4 + $0x180] sm:$0x1] }
 0x32a   : > { %9099 = vmatprep.subr.bf16.mxu0 %v10997_v7  ;;  %v837_v34 = vmul.f32 %v10847_v8, %v12710_v28  ;;  %8497 = vmatprep.mubr.msk.f32.mxu0 %vm10138_vm0, %v12699_v20  ;;  %v11021_v5 = vpack.c.bf16 %v849_v38, %v848_v54  ;;  %v850_v41 = vmul.f32 %v10847_v8, %v12712_v12  ;;  %v12725_v38 = vld [vmem:[#allocation31_spill] sm:$0xff]  ;;  %v12726_v35 = vld [vmem:[#allocation32_spill] sm:$0xff]  ;;  %v12730_v12 = vld [vmem:[#allocation26_spill] sm:$0xff] }
 0x32b   : > { %8970 = vmatpush3.bf16.msra.mxu1 %v11005_v6  ;;  %v851_v59 = vmul.f32 %v10847_v8, %v12713_v55  ;;  %v11028_v13 = vpack.c.bf16 %v867_v58, %v866_v31  ;;  %v868_v18 = vmul.f32 %v10847_v8, %v12715_v2  ;;  %v869_v15 = vmul.f32 %v10847_v8, %v12716_v21  ;;  %v1393_v28 = vld [vmem:[#allocation4 + $0x1a0] sm:$0xff]  ;;  %v12732_v2 = vld [vmem:[#allocation49_spill] sm:$0xff] }
 0x32c   : > { %12711 = vst [vmem:[#allocation28_spill] sm:$0xff] %v11021_v5  ;;  %8972 = vmatprep.subr.bf16.mxu1 %v11012_v45  ;;  %8498 = vmatmul.mubr.msk.f32.gmra.mrb[10].mxu0 %vm955_vm4, %v940_v61  ;;  %v11036_v19 = vpack.c.bf16 %v819_v3, %v818_v39  ;;  %v820_v24 = vmul.f32 %v10847_v8, %v12717_v53  ;;  %v12727_v39 = vld [vmem:[#allocation16_spill] sm:$0xff]  ;;  %v12728_v3 = vld [vmem:[#allocation17_spill] sm:$0xff]  ;;  %v12731_v55 = vld [vmem:[#allocation27_spill] sm:$0xff] }
 0x32d   : > { %12714 = vst [vmem:[#allocation12_spill] sm:$0xff] %v11028_v13  ;;  %9101 = vmatpush3.bf16.msra.mxu0 %v11021_v5  ;;  %v821_v44 = vmul.f32 %v10847_v8, %v12718_v14  ;;  %8500 = vmatprep.mubr.msk.f32.mxu0 %vm10138_vm0, %v12699_v20  ;;  %v11045_v26 = vpack.c.bf16 %v837_v34, %v836_v51  ;;  %v12733_v21 = vld [vmem:[#allocation50_spill] sm:$0xff] }
 0x32e   : > { %9103 = vmatprep.subr.bf16.mxu0 %v11028_v13  ;;  %v838_v47 = vmul.f32 %v10847_v8, %v12719_v30  ;;  %v839_v32 = vmul.f32 %v10847_v8, %v12720_v27  ;;  %v11052_v37 = vpack.c.bf16 %v851_v59, %v850_v41  ;;  %v852_v46 = vmul.f32 %v10847_v8, %v12722_v43  ;;  %v906_v14 = vld [vmem:[#allocation4] sm:$0xff] }
 0x32f   : > { %8974 = vmatpush3.bf16.msra.mxu1 %v11036_v19  ;;  %v853_v33 = vmul.f32 %v10847_v8, %v12723_v60  ;;  %v11059_v54 = vpack.c.bf16 %v869_v15, %v868_v18  ;;  %v870_v31 = vmul.f32 %v10847_v8, %v12725_v38  ;;  %v871_v58 = vmul.f32 %v10847_v8, %v12726_v35  ;;  %v914_v38 = vld [vmem:[#allocation4 + $0x40] sm:$0xff]  ;;  %v1400_v35 = vld [vmem:[#allocation4 + $0x1d8] sm:$0xff] }
 0x330   : > { %12721 = vst [vmem:[#allocation13_spill] sm:$0xff] %v11052_v37  ;;  %8976 = vmatprep.subr.bf16.mxu1 %v11045_v26  ;;  %8501 = vmatmul.mubr.msk.f32.gmra.mrb[12].mxu0 %vm955_vm4, %v947_v29  ;;  %v11067_v50 = vpack.c.bf16 %v821_v44, %v820_v24  ;;  %v822_v56 = vmul.f32 %v10847_v8, %v12727_v39  ;;  %v12736_v29 = vld [vmem:[#allocation33_spill] sm:$0xff] }
 0x331   : > { %12724 = vst [vmem:[#allocation18_spill] sm:$0xff] %v11059_v54  ;;  %9105 = vmatpush3.bf16.msra.mxu0 %v11052_v37  ;;  %v823_v61 = vmul.f32 %v10847_v8, %v12728_v3  ;;  %8503 = vmatprep.mubr.msk.f32.mxu0 %vm10138_vm0, %v12699_v20  ;;  %v11076_v51 = vpack.c.bf16 %v839_v32, %v838_v47  ;;  %v12737_v47 = vld [vmem:[#allocation34_spill] sm:$0xff]  ;;  %v12738_v32 = vld [vmem:[#allocation51_spill] sm:$0xff] }
 0x332   : > { %9107 = vmatprep.subr.bf16.mxu0 %v11059_v54  ;;  %v11079_v34 = vpack.c.bf16 %v853_v33, %v852_v46  ;;  %v854_v41 = vmul.f32 %v10847_v8, %v12730_v12  ;;  %v855_v59 = vmul.f32 %v10847_v8, %v12731_v55  ;;  %v888_v18 = vmul.f32 %v10847_v8, %v12732_v2  ;;  %v12739_v46 = vld [vmem:[#allocation52_spill] sm:$0xff]  ;;  %v913_v39 = vld [vmem:[#allocation4 + $0x38] sm:$0xff] }
 0x333   : > { %8978 = vmatpush3.bf16.msra.mxu1 %v11067_v50  ;;  %v889_v15 = vmul.f32 %v10847_v8, %v12733_v21  ;;  %v11090_v53 = vpack.c.bf16 %v871_v58, %v870_v31  ;;  %v11094_v24 = vpack.c.bf16 %v823_v61, %v822_v56  ;;  %v872_v30 = vmul.f32 %v10847_v8, %v12736_v29  ;;  %v1392_v31 = vld [vmem:[#allocation4 + $0x198] sm:$0xff]  ;;  %v12742_v56 = vld [vmem:[#allocation35_spill] sm:$0xff]  ;;  %v12743_v61 = vld [vmem:[#allocation36_spill] sm:$0xff] }
 0x334   : > { %12729 = vst [vmem:[#allocation19_spill] sm:$0xff] %v11079_v34  ;;  %8980 = vmatprep.subr.bf16.mxu1 %v11076_v51  ;;  %8504 = vmatmul.mubr.msk.f32.gmra.mrb[14].mxu0 %vm955_vm4, %v954_v10  ;;  %v11098_v44 = vpack.c.bf16 %v855_v59, %v854_v41  ;;  %v873_v27 = vmul.f32 %v10847_v8, %v12737_v47  ;;  %v12745_v41 = vld [vmem:[#allocation54_spill] sm:$0xff]  ;;  %v1407_v21 = vld [vmem:[#allocation4 + $0x210] sm:$0xff] }
 0x335   : > { %12734 = vst [vmem:[#allocation22_spill] sm:$0xff] %v11090_v53  ;;  %9109 = vmatpush3.bf16.msra.mxu0 %v11079_v34  ;;  %1624 = vmatprep.mubr.f32.mxu0 %v1393_v28  ;;  %v890_v43 = vmul.f32 %v10847_v8, %v12738_v32  ;;  %v891_v60 = vmul.f32 %v10847_v8, %v12739_v46  ;;  %v12744_v28 = vld [vmem:[#allocation53_spill] sm:$0xff]  ;;  %v12749_v47 = vld [vmem:[#allocation38_spill] sm:$0xff]  ;;  %v12750_v32 = vld [vmem:[#allocation55_spill] sm:$0xff] }
 0x336   : > { %9111 = vmatprep.subr.bf16.mxu0 %v11090_v53  ;;  %12735 = vst [vmem:[#allocation23_spill] sm:$0xff] %v11098_v44  ;;  %v11109_v33 = vpack.c.bf16 %v889_v15, %v888_v18  ;;  %v11114_v58 = vpack.c.bf16 %v873_v27, %v872_v30  ;;  %v874_v3 = vmul.f32 %v10847_v8, %v12742_v56  ;;  %v921_v2 = vld [vmem:[#allocation4 + $0x78] sm:$0xff]  ;;  %v1399_v18 = vld [vmem:[#allocation4 + $0x1d0] sm:$0xff] }
 0x337   : > { %8982 = vmatpush3.bf16.msra.mxu1 %v11094_v24  ;;  %v875_v10 = vmul.f32 %v10847_v8, %v12743_v61  ;;  %v892_v12 = vmul.f32 %v10847_v8, %v12744_v28  ;;  %v893_v55 = vmul.f32 %v10847_v8, %v12745_v41  ;;  %v11124_v59 = vpack.c.bf16 %v891_v60, %v890_v43  ;;  %v12748_v29 = vld [vmem:[#allocation37_spill] sm:$0xff]  ;;  %v12751_v46 = vld [vmem:[#allocation56_spill] sm:$0xff]  ;;  %v12754_v61 = vld [vmem:[#allocation39_spill] sm:$0xff] }
 0x338   : > { %8984 = vmatprep.subr.bf16.mxu1 %v10876_v40  ;;  %12740 = vst [vmem:[#allocation29_spill] sm:$0xff] %v11109_v33  ;;  %12741 = vst [vmem:[#allocation30_spill] sm:$0xff] %v11114_v58  ;;  %v876_v30 = vmul.f32 %v10847_v8, %v12748_v29  ;;  %v877_v27 = vmul.f32 %v10847_v8, %v12749_v47  ;;  %v894_v43 = vmul.f32 %v10847_v8, %v12750_v32  ;;  %v12755_v28 = vld [vmem:[#allocation40_spill] sm:$0xff]  ;;  %v12756_v41 = vld [vmem:[#allocation57_spill] sm:$0xff] }
 0x339   : > { %9113 = vmatpush3.bf16.msra.mxu0 %v11098_v44  ;;  %12746 = vst [vmem:[#allocation14_spill] sm:$0xff] %v11124_v59  ;;  %v11130_v15 = vpack.c.bf16 %v875_v10, %v874_v3  ;;  %v895_v60 = vmul.f32 %v10847_v8, %v12751_v46  ;;  %v927_v3 = vld [vmem:[#allocation4 + $0xa8] sm:$0xff]  ;;  %v878_v10 = vmul.f32 %v10847_v8, %v12754_v61  ;;  %v1413_v29 = vld [vmem:[#allocation4 + $0x240] sm:$0xff]  ;;  %v12760_v32 = vld [vmem:[#allocation41_spill] sm:$0xff] }
 0x33a   : > { %1042 = vmatmul.mubr.f32.vlgmr.msra.gmra.mrb[2].mxu1 %v906_v14  ;;  %9115 = vmatprep.subr.bf16.mxu0 %v11109_v33  ;;  %v920_v14 = vld [vmem:[#allocation4 + $0x70] sm:$0xff]  ;;  %v11146_v56 = vpack.c.bf16 %v877_v27, %v876_v30  ;;  %v1421_v30 = vld [vmem:[#allocation4 + $0x280] sm:$0xff] }
 0x33b   : > { %8986 = vmatpush3.bf16.msra.mxu1 %v10893_v4  ;;  %1046 = vmatprep.mubr.f32.mxu1 %v914_v38  ;;  %12747 = vst [vmem:[#allocation15_spill] sm:$0xff] %v11130_v15  ;;  %v11140_v38 = vpack.c.bf16 %v893_v55, %v892_v12  ;;  %v879_v12 = vmul.f32 %v10847_v8, %v12755_v28  ;;  %v934_v27 = vld [vmem:[#allocation4 + $0xe0] sm:$0xff]  ;;  %v1420_v28 = vld [vmem:[#allocation4 + $0x278] sm:$0xff] }
 0x33c   : > { %8988 = vmatprep.subr.bf16.mxu1 %v10903_v22  ;;  %1625 = vmatmul.mubr.f32.vlgmr.msra.gmra.mrb[16].mxu0 %v1392_v31  ;;  %v928_v31 = vld [vmem:[#allocation4 + $0xb0] sm:$0xff]  ;;  %12753 = vst [vmem:[#allocation21_spill] sm:$0xff] %v11146_v56  ;;  %v896_v55 = vmul.f32 %v10847_v8, %v12756_v41  ;;  %v12761_v46 = vld [vmem:[#allocation42_spill] sm:$0xff] }
 0x33d   : > { %9117 = vmatpush3.bf16.msra.mxu0 %v11114_v58  ;;  %1629 = vmatprep.mubr.f32.mxu0 %v1400_v35  ;;  %12752 = vst [vmem:[#allocation20_spill] sm:$0xff] %v11140_v38  ;;  %v1406_v35 = vld [vmem:[#allocation4 + $0x208] sm:$0xff]  ;;  %v11162_v47 = vpack.c.bf16 %v879_v12, %v878_v10  ;;  %v942_v10 = vld [vmem:[#allocation4 + $0x120] sm:$0xff]  ;;  %v1428_v12 = vld [vmem:[#allocation4 + $0x2b8] sm:$0xff] }
 0x33e   : > { %9119 = vmatprep.subr.bf16.mxu0 %v11124_v59  ;;  %1047 = vmatmul.mubr.f32.gmra.mrb[4].mxu1 %v913_v39  ;;  %v1414_v39 = vld [vmem:[#allocation4 + $0x248] sm:$0xff] }
 0x33f   : > { %8990 = vmatpush3.bf16.msra.mxu1 %v10926_v17  ;;  %1051 = vmatprep.mubr.f32.mxu1 %v921_v2  ;;  %v12757_v2 = vld [vmem:[#allocation58_spill] sm:$0xff]  ;;  %12759 = vst [vmem:[#allocation25_spill] sm:$0xff] %v11162_v47 }
 0x340   : > { %8992 = vmatprep.subr.bf16.mxu1 %v10935_v0  ;;  %1630 = vmatmul.mubr.f32.gmra.mrb[18].mxu0 %v1399_v18  ;;  %v897_v18 = vmul.f32 %v10847_v8, %v12757_v2  ;;  %v941_v2 = vld [vmem:[#allocation4 + $0x118] sm:$0xff] }
 0x341   : > { %9121 = vmatpush3.bf16.msra.mxu0 %v11130_v15  ;;  %1634 = vmatprep.mubr.f32.mxu0 %v1407_v21  ;;  %v11156_v21 = vpack.c.bf16 %v895_v60, %v894_v43  ;;  %v880_v43 = vmul.f32 %v10847_v8, %v12760_v32  ;;  %v881_v60 = vmul.f32 %v10847_v8, %v12761_v46  ;;  %v12768_v32 = vld [vmem:[#allocation61_spill] sm:$0xff]  ;;  %v12769_v46 = vld [vmem:[#allocation62_spill] sm:$0xff] }
 0x342   : > { %9123 = vmatprep.subr.bf16.mxu0 %v11140_v38  ;;  %1052 = vmatmul.mubr.f32.gmra.mrb[6].mxu1 %v920_v14  ;;  %v935_v14 = vld [vmem:[#allocation4 + $0xe8] sm:$0xff] }
 0x343   : > { %8994 = vmatpush3.bf16.msra.mxu1 %v10959_v1  ;;  %1056 = vmatprep.mubr.f32.mxu1 %v928_v31  ;;  %12758 = vst [vmem:[#allocation24_spill] sm:$0xff] %v11156_v21  ;;  %v12762_v31 = vld [vmem:[#allocation59_spill] sm:$0xff]  ;;  %v11178_v41 = vpack.c.bf16 %v881_v60, %v880_v43  ;;  %v949_v43 = vld [vmem:[#allocation4 + $0x158] sm:$0x1]  ;;  %v1427_v60 = vld [vmem:[#allocation4 + $0x2b0] sm:$0xff] }
 0x344   : > { %8996 = vmatprep.subr.bf16.mxu1 %v10968_v23  ;;  %1635 = vmatmul.mubr.f32.gmra.mrb[20].mxu0 %v1406_v35  ;;  %v898_v35 = vmul.f32 %v10847_v8, %v12762_v31  ;;  %v901_v31 = vmul.f32 %v10847_v8, %v12769_v46  ;;  %v903_v46 = vmul.f32 %v10847_v8, %v10834_v16  ;;  %v12777_v16 = vld [vmem:[#allocation47_spill] sm:$0xff] }
 0x345   : > { %9125 = vmatpush3.bf16.msra.mxu0 %v11146_v56  ;;  %1639 = vmatprep.mubr.f32.mxu0 %v1414_v39  ;;  %v12763_v39 = vld [vmem:[#allocation60_spill] sm:$0xff]  ;;  %12765 = vst [vmem:[#allocation32_spill] sm:$0xff] %v11178_v41 }
 0x346   : > { %9127 = vmatprep.subr.bf16.mxu0 %v11156_v21  ;;  %1057 = vmatmul.mubr.f32.gmra.mrb[8].mxu1 %v927_v3  ;;  %v899_v61 = vmul.f32 %v10847_v8, %v12763_v39  ;;  %v11172_v3 = vpack.c.bf16 %v897_v18, %v896_v55  ;;  %v12766_v55 = vld [vmem:[#allocation43_spill] sm:$0xff]  ;;  %v1435_v39 = vld [vmem:[#allocation4 + $0x2f0] sm:$0x1] }
 0x347   : > { %8998 = vmatpush3.bf16.msra.mxu1 %v10990_v36  ;;  %1061 = vmatprep.mubr.f32.mxu1 %v935_v14  ;;  %v882_v18 = vmul.f32 %v10847_v8, %v12766_v55  ;;  %v12767_v14 = vld [vmem:[#allocation44_spill] sm:$0xff] }
 0x348   : > { %12764 = vst [vmem:[#allocation31_spill] sm:$0xff] %v11172_v3  ;;  %9000 = vmatprep.subr.bf16.mxu1 %v10997_v7  ;;  %1640 = vmatmul.mubr.f32.gmra.mrb[22].mxu0 %v1413_v29  ;;  %v883_v29 = vmul.f32 %v10847_v8, %v12767_v14  ;;  %v948_v55 = vld [vmem:[#allocation4 + $0x150] sm:$0x1]  ;;  %v12773_v14 = vld [vmem:[#allocation46_spill] sm:$0xff] }
 0x349   : > { %9129 = vmatpush3.bf16.msra.mxu0 %v11162_v47  ;;  %1644 = vmatprep.mubr.f32.mxu0 %v1421_v30  ;;  %v900_v30 = vmul.f32 %v10847_v8, %v12768_v32  ;;  %v12774_v32 = vld [vmem:[#allocation63_spill] sm:$0xff] }
 0x34a   : > { %9131 = vmatprep.subr.bf16.mxu0 %v11172_v3  ;;  %1062 = vmatmul.mubr.f32.gmra.mrb[10].mxu1 %v934_v27  ;;  %v11188_v27 = vpack.c.bf16 %v899_v61, %v898_v35  ;;  %v12772_v35 = vld [vmem:[#allocation45_spill] sm:$0xff] }
 0x34b   : > { %9002 = vmatpush3.bf16.msra.mxu1 %v11021_v5  ;;  %1066 = vmatprep.mubr.f32.mxu1 %v942_v10  ;;  %v11194_v10 = vpack.c.bf16 %v883_v29, %v882_v18  ;;  %v884_v61 = vmul.f32 %v10847_v8, %v12772_v35  ;;  %v909_v18 = vld [vmem:[#allocation4 + $0x18] sm:$0xff]  ;;  %v1434_v29 = vld [vmem:[#allocation4 + $0x2e8] sm:$0x1] }
 0x34c   : > { %12770 = vst [vmem:[#allocation16_spill] sm:$0xff] %v11188_v27  ;;  %9004 = vmatprep.subr.bf16.mxu1 %v11028_v13  ;;  %1645 = vmatmul.mubr.f32.gmra.mrb[24].mxu0 %v1420_v28  ;;  %v885_v28 = vmul.f32 %v10847_v8, %v12773_v14 }
 0x34d   : > { %9133 = vmatpush3.bf16.msra.mxu0 %v11178_v41  ;;  %1649 = vmatprep.mubr.f32.mxu0 %v1428_v12  ;;  %12771 = vst [vmem:[#allocation17_spill] sm:$0xff] %v11194_v10  ;;  %v902_v12 = vmul.f32 %v10847_v8, %v12774_v32  ;;  %v915_v32 = vld [vmem:[#allocation4 + $0x48] sm:$0xff] }
 0x34e   : > { %9135 = vmatprep.subr.bf16.mxu0 %v11188_v27  ;;  %1067 = vmatmul.mubr.f32.gmra.mrb[12].mxu1 %v941_v2  ;;  %v11204_v2 = vpack.c.bf16 %v901_v31, %v900_v30  ;;  %v11210_v35 = vpack.c.bf16 %v885_v28, %v884_v61  ;;  %v886_v30 = vmul.f32 %v10847_v8, %v12777_v16  ;;  %v12778_v31 = vld [vmem:[#allocation48_spill] sm:$0xff]  ;;  %v12781_v28 = vmov 0.0|0.0   ;;  %v929_v16 = vld [vmem:[#allocation4 + $0xb8] sm:$0xff] }
 0x34f   : > { %9006 = vmatpush3.bf16.msra.mxu1 %v11052_v37  ;;  %1071 = vmatprep.mubr.f32.mxu1 %v949_v43  ;;  %v1395_v43 = vld [vmem:[#allocation4 + $0x1b0] sm:$0xff]  ;;  %v11216_v14 = vpack.c.bf16 %v903_v46, %v902_v12  ;;  %v923_v12 = vld [vmem:[#allocation4 + $0x88] sm:$0xff]  ;;  %v1396_v46 = vld [vmem:[#allocation4 + $0x1b8] sm:$0xff] }
 0x350   : > { %12775 = vst [vmem:[#allocation26_spill] sm:$0xff] %v11204_v2  ;;  %9008 = vmatprep.subr.bf16.mxu1 %v11059_v54  ;;  %1650 = vmatmul.mubr.f32.gmra.mrb[26].mxu0 %v1427_v60  ;;  %12776 = vst [vmem:[#allocation27_spill] sm:$0xff] %v11210_v35  ;;  %v887_v60 = vmul.f32 %v10847_v8, %v12778_v31  ;;  %v916_v61 = vld [vmem:[#allocation4 + $0x50] sm:$0xff]  ;;  %v1394_v8 = vld [vmem:[#allocation4 + $0x1a8] sm:$0xff] }
 0x351   : > { %9137 = vmatpush3.bf16.msra.mxu0 %v11194_v10  ;;  %1654 = vmatprep.mubr.f32.mxu0 %v1435_v39  ;;  %12779 = vst [vmem:[#allocation49_spill] sm:$0xff] %v11216_v14  ;;  %v908_v39 = vld [vmem:[#allocation4 + $0x10] sm:$0xff]  ;;  %v1410_v31 = vld [vmem:[#allocation4 + $0x228] sm:$0xff] }
 0x352   : > { %9139 = vmatprep.subr.bf16.mxu0 %v11204_v2  ;;  %1072 = vmatmul.mubr.f32.gmra.mrb[14].mxu1 %v948_v55  ;;  %v11222_v55 = vpack.c.bf16 %v887_v60, %v886_v30  ;;  %v937_v30 = vld [vmem:[#allocation4 + $0xf8] sm:$0xff]  ;;  %v936_v60 = vld [vmem:[#allocation4 + $0xf0] sm:$0xff] }
 0x353   : > { %9010 = vmatpush3.bf16.msra.mxu1 %v11079_v34  ;;  %1141 = vmatprep.mubr.f32.mxu1 %v909_v18  ;;  %v922_v18 = vld [vmem:[#allocation4 + $0x80] sm:$0xff] }
 0x354   : > { %9012 = vmatprep.subr.bf16.mxu1 %v11090_v53  ;;  %1655 = vmatmul.mubr.f32.gmra.mrb[28].mxu0 %v1434_v29  ;;  %12780 = vst [vmem:[#allocation50_spill] sm:$0xff] %v11222_v55  ;;  %v930_v29 = vld [vmem:[#allocation4 + $0xc0] sm:$0xff] }
 0x355   : > { %9141 = vmatpush3.bf16.msra.mxu0 %v11210_v35  ;;  %1724 = vmatprep.mubr.f32.mxu0 %v1395_v43  ;;  %v1403_v43 = vld [vmem:[#allocation4 + $0x1f0] sm:$0xff] }
 0x356   : > { %9143 = vmatprep.subr.bf16.mxu0 %v11216_v14 }
 0x357   : > { %9014 = vmatpush3.bf16.msra.mxu1 %v11098_v44 }
 0x358   : > { %9016 = vmatprep.subr.bf16.mxu1 %v11109_v33 }
 0x359   : > { %9145 = vmatpush3.bf16.msra.mxu0 %v11222_v55 }
 0x35a   : > { %1142 = vmatmul.mubr.f32.vlgmr.msra.gmra.mrb[16].mxu1 %v908_v39  ;;  %9146 = vmatprep.subr.bf16.mxu0 %v12781_v28  ;;  %v944_v39 = vld [vmem:[#allocation4 + $0x130] sm:$0xff] }
 0x35b   : > { %9018 = vmatpush3.bf16.msra.mxu1 %v11114_v58  ;;  %1146 = vmatprep.mubr.f32.mxu1 %v916_v61  ;;  %v1417_v61 = vld [vmem:[#allocation4 + $0x260] sm:$0xff] }
 0x35c   : > { %9020 = vmatprep.subr.bf16.mxu1 %v11124_v59  ;;  %1725 = vmatmul.mubr.f32.vlgmr.msra.gmra.mrb[30].mxu0 %v1394_v8  ;;  %v943_v8 = vld [vmem:[#allocation4 + $0x128] sm:$0xff] }
 0x35d   : > { %9148 = vmatpush3.bf16.msra.mxu0 %v10851_v63  ;;  %8510 = vmatprep.mubr.msk.f32.mxu0 %vm10138_vm0, %v12699_v20 }
 0x35e   : > { %1147 = vmatmul.mubr.f32.gmra.mrb[18].mxu1 %v915_v32  ;;  %9150 = vmatprep.subr.bf16.mxu0 %v10865_v42  ;;  %v951_v32 = vld [vmem:[#allocation4 + $0x168] sm:$0x1] }
 0x35f   : > { %9022 = vmatpush3.bf16.msra.mxu1 %v11130_v15  ;;  %1151 = vmatprep.mubr.f32.mxu1 %v923_v12  ;;  %v1424_v12 = vld [vmem:[#allocation4 + $0x298] sm:$0xff] }
 0x360   : > { %9024 = vmatprep.subr.bf16.mxu1 %v11140_v38  ;;  %8511 = vmatmul.mubr.msk.f32.vlgmr.msra.gmra.mrb[32].mxu0 %vm955_vm4, %v1396_v46  ;;  %v950_v46 = vld [vmem:[#allocation4 + $0x160] sm:$0x1] }
 0x361   : > { %9152 = vmatpush3.bf16.msra.mxu0 %v10874_v9  ;;  %8513 = vmatprep.mubr.msk.f32.mxu0 %vm10138_vm0, %v12699_v20 }
 0x362   : > { %1152 = vmatmul.mubr.f32.gmra.mrb[20].mxu1 %v922_v18  ;;  %9154 = vmatprep.subr.bf16.mxu0 %v10883_v62  ;;  %v911_v18 = vld [vmem:[#allocation4 + $0x28] sm:$0xff] }
 0x363   : > { %9026 = vmatpush3.bf16.msra.mxu1 %v11146_v56  ;;  %1156 = vmatprep.mubr.f32.mxu1 %v930_v29  ;;  %v1431_v29 = vld [vmem:[#allocation4 + $0x2d0] sm:$0xff] }
 0x364   : > { %9028 = vmatprep.subr.bf16.mxu1 %v11156_v21  ;;  %8514 = vmatmul.mubr.msk.f32.gmra.mrb[34].mxu0 %vm955_vm4, %v1403_v43  ;;  %v1438_v43 = vld [vmem:[#allocation4 + $0x308] sm:$0x1] }
 0x365   : > { %9156 = vmatpush3.bf16.msra.mxu0 %v10901_v11  ;;  %8516 = vmatprep.mubr.msk.f32.mxu0 %vm10138_vm0, %v12699_v20 }
 0x366   : > { %1157 = vmatmul.mubr.f32.gmra.mrb[22].mxu1 %v929_v16  ;;  %9158 = vmatprep.subr.bf16.mxu0 %v10908_v25  ;;  %v2075_v16 = vld [vmem:[#allocation4 + $0x318] sm:$0xff] }
 0x367   : > { %9030 = vmatpush3.bf16.msra.mxu1 %v11162_v47  ;;  %1161 = vmatprep.mubr.f32.mxu1 %v937_v30  ;;  %v910_v30 = vld [vmem:[#allocation4 + $0x20] sm:$0xff] }
 0x368   : > { %9032 = vmatprep.subr.bf16.mxu1 %v11172_v3  ;;  %8517 = vmatmul.mubr.msk.f32.gmra.mrb[36].mxu0 %vm955_vm4, %v1410_v31  ;;  %v918_v31 = vld [vmem:[#allocation4 + $0x60] sm:$0xff] }
 0x369   : > { %9160 = vmatpush3.bf16.msra.mxu0 %v10933_v52  ;;  %8519 = vmatprep.mubr.msk.f32.mxu0 %vm10138_vm0, %v12699_v20 }
 0x36a   : > { %1162 = vmatmul.mubr.f32.gmra.mrb[24].mxu1 %v936_v60  ;;  %9162 = vmatprep.subr.bf16.mxu0 %v10950_v49  ;;  %v917_v60 = vld [vmem:[#allocation4 + $0x58] sm:$0xff] }
 0x36b   : > { %9034 = vmatpush3.bf16.msra.mxu1 %v11178_v41  ;;  %1166 = vmatprep.mubr.f32.mxu1 %v944_v39  ;;  %v925_v39 = vld [vmem:[#allocation4 + $0x98] sm:$0xff] }
 0x36c   : > { %9036 = vmatprep.subr.bf16.mxu1 %v11188_v27  ;;  %8520 = vmatmul.mubr.msk.f32.gmra.mrb[38].mxu0 %vm955_vm4, %v1417_v61  ;;  %v2074_v61 = vld [vmem:[#allocation4 + $0x310] sm:$0xff] }
 0x36d   : > { %9164 = vmatpush3.bf16.msra.mxu0 %v10966_v48  ;;  %8522 = vmatprep.mubr.msk.f32.mxu0 %vm10138_vm0, %v12699_v20 }
 0x36e   : > { %1167 = vmatmul.mubr.f32.gmra.mrb[26].mxu1 %v943_v8  ;;  %9166 = vmatprep.subr.bf16.mxu0 %v10981_v57  ;;  %v2082_v8 = vld [vmem:[#allocation4 + $0x350] sm:$0xff] }
 0x36f   : > { %9038 = vmatpush3.bf16.msra.mxu1 %v11194_v10  ;;  %1171 = vmatprep.mubr.f32.mxu1 %v951_v32  ;;  %v924_v32 = vld [vmem:[#allocation4 + $0x90] sm:$0xff] }
 0x370   : > { %9040 = vmatprep.subr.bf16.mxu1 %v11204_v2  ;;  %8523 = vmatmul.mubr.msk.f32.gmra.mrb[40].mxu0 %vm955_vm4, %v1424_v12  ;;  %v932_v12 = vld [vmem:[#allocation4 + $0xd0] sm:$0xff] }
 0x371   : > { %9168 = vmatpush3.bf16.msra.mxu0 %v11005_v6  ;;  %8525 = vmatprep.mubr.msk.f32.mxu0 %vm10138_vm0, %v12699_v20 }
 0x372   : > { %1172 = vmatmul.mubr.f32.gmra.mrb[28].mxu1 %v950_v46  ;;  %9170 = vmatprep.subr.bf16.mxu0 %v11012_v45  ;;  %v2081_v46 = vld [vmem:[#allocation4 + $0x348] sm:$0xff] }
 0x373   : > { %9042 = vmatpush3.bf16.msra.mxu1 %v11210_v35  ;;  %1241 = vmatprep.mubr.f32.mxu1 %v911_v18  ;;  %v2089_v18 = vld [vmem:[#allocation4 + $0x388] sm:$0xff] }
 0x374   : > { %9044 = vmatprep.subr.bf16.mxu1 %v11216_v14  ;;  %8526 = vmatmul.mubr.msk.f32.gmra.mrb[42].mxu0 %vm955_vm4, %v1431_v29  ;;  %v931_v29 = vld [vmem:[#allocation4 + $0xc8] sm:$0xff] }
 0x375   : > { %9172 = vmatpush3.bf16.msra.mxu0 %v11036_v19  ;;  %8528 = vmatprep.mubr.msk.f32.mxu0 %vm10138_vm0, %v12699_v20 }
 0x376   : > { %9174 = vmatprep.subr.bf16.mxu0 %v11045_v26 }
 0x377   : > { %9046 = vmatpush3.bf16.msra.mxu1 %v11222_v55 }
 0x378   : > { %9051 = vmatprep.subr.bf16.mxu1 %v10865_v42  ;;  %8529 = vmatmul.mubr.msk.f32.gmra.mrb[44].mxu0 %vm955_vm4, %v1438_v43  ;;  %v939_v43 = vld [vmem:[#allocation4 + $0x108] sm:$0xff] }
 0x379   : > { %9176 = vmatpush3.bf16.msra.mxu0 %v11067_v50  ;;  %2208 = vmatprep.mubr.f32.mxu0 %v2075_v16  ;;  %v2088_v16 = vld [vmem:[#allocation4 + $0x380] sm:$0xff] }
 0x37a   : > { %1242 = vmatmul.mubr.f32.vlgmr.msra.gmra.mrb[30].mxu1 %v910_v30  ;;  %9178 = vmatprep.subr.bf16.mxu0 %v11076_v51  ;;  %v2096_v30 = vld [vmem:[#allocation4 + $0x3c0] sm:$0xff] }
 0x37b   : > { %9053 = vmatpush3.bf16.msra.mxu1 %v10874_v9  ;;  %1246 = vmatprep.mubr.f32.mxu1 %v918_v31  ;;  %v938_v31 = vld [vmem:[#allocation4 + $0x100] sm:$0xff] }
 0x37c   : > { %9055 = vmatprep.subr.bf16.mxu1 %v10883_v62 }
 0x37d   : > { %9180 = vmatpush3.bf16.msra.mxu0 %v11094_v24 }
 0x37e   : > { %1247 = vmatmul.mubr.f32.gmra.mrb[32].mxu1 %v917_v60  ;;  %9182 = vmatprep.subr.bf16.mxu0 %v10876_v40  ;;  %v946_v60 = vld [vmem:[#allocation4 + $0x140] sm:$0xff] }
 0x37f   : > { %9057 = vmatpush3.bf16.msra.mxu1 %v10901_v11  ;;  %1251 = vmatprep.mubr.f32.mxu1 %v925_v39  ;;  %v2095_v39 = vld [vmem:[#allocation4 + $0x3b8] sm:$0xff] }
 0x380   : > { %9059 = vmatprep.subr.bf16.mxu1 %v10908_v25  ;;  %2209 = vmatmul.mubr.f32.vlgmr.msra.gmra.mrb[46].mxu0 %v2074_v61  ;;  %v2103_v61 = vld [vmem:[#allocation4 + $0x3f8] sm:$0xff] }
 0x381   : > { %9184 = vmatpush3.bf16.msra.mxu0 %v10893_v4  ;;  %2213 = vmatprep.mubr.f32.mxu0 %v2082_v8  ;;  %v945_v8 = vld [vmem:[#allocation4 + $0x138] sm:$0xff] }
 0x382   : > { %1252 = vmatmul.mubr.f32.gmra.mrb[34].mxu1 %v924_v32  ;;  %9186 = vmatprep.subr.bf16.mxu0 %v10903_v22  ;;  %v953_v32 = vld [vmem:[#allocation4 + $0x178] sm:$0x1] }
 0x383   : > { %9061 = vmatpush3.bf16.msra.mxu1 %v10933_v52  ;;  %1256 = vmatprep.mubr.f32.mxu1 %v932_v12  ;;  %v2102_v12 = vld [vmem:[#allocation4 + $0x3f0] sm:$0xff] }
 0x384   : > { %9063 = vmatprep.subr.bf16.mxu1 %v10950_v49  ;;  %2214 = vmatmul.mubr.f32.gmra.mrb[48].mxu0 %v2081_v46  ;;  %v2110_v46 = vld [vmem:[#allocation4 + $0x430] sm:$0xff] }
 0x385   : > { %9188 = vmatpush3.bf16.msra.mxu0 %v10926_v17  ;;  %2218 = vmatprep.mubr.f32.mxu0 %v2089_v18  ;;  %v952_v18 = vld [vmem:[#allocation4 + $0x170] sm:$0x1] }
 0x386   : > { %1257 = vmatmul.mubr.f32.gmra.mrb[36].mxu1 %v931_v29  ;;  %9190 = vmatprep.subr.bf16.mxu0 %v10935_v0  ;;  %v1391_v29 = vld [vmem:[#allocation4 + $0x190] sm:$0xff] }
 0x387   : > { %9065 = vmatpush3.bf16.msra.mxu1 %v10966_v48  ;;  %1261 = vmatprep.mubr.f32.mxu1 %v939_v43  ;;  %v2109_v43 = vld [vmem:[#allocation4 + $0x428] sm:$0xff] }
 0x388   : > { %9067 = vmatprep.subr.bf16.mxu1 %v10981_v57  ;;  %2219 = vmatmul.mubr.f32.gmra.mrb[50].mxu0 %v2088_v16  ;;  %v2117_v16 = vld [vmem:[#allocation4 + $0x468] sm:$0x1] }
 0x389   : > { %9192 = vmatpush3.bf16.msra.mxu0 %v10959_v1  ;;  %2223 = vmatprep.mubr.f32.mxu0 %v2096_v30  ;;  %v2116_v30 = vld [vmem:[#allocation4 + $0x460] sm:$0x1] }
 0x38a   : > { %1262 = vmatmul.mubr.f32.gmra.mrb[38].mxu1 %v938_v31  ;;  %9194 = vmatprep.subr.bf16.mxu0 %v10968_v23  ;;  %v2077_v31 = vld [vmem:[#allocation4 + $0x328] sm:$0xff] }
 0x38b   : > { %9069 = vmatpush3.bf16.msra.mxu1 %v11005_v6  ;;  %1266 = vmatprep.mubr.f32.mxu1 %v946_v60  ;;  %v1390_v60 = vld [vmem:[#allocation4 + $0x188] sm:$0xff] }
 0x38c   : > { %9071 = vmatprep.subr.bf16.mxu1 %v11012_v45  ;;  %2224 = vmatmul.mubr.f32.gmra.mrb[52].mxu0 %v2095_v39  ;;  %v1398_v39 = vld [vmem:[#allocation4 + $0x1c8] sm:$0xff] }
 0x38d   : > { %9196 = vmatpush3.bf16.msra.mxu0 %v10990_v36  ;;  %2228 = vmatprep.mubr.f32.mxu0 %v2103_v61  ;;  %v1397_v61 = vld [vmem:[#allocation4 + $0x1c0] sm:$0xff] }
 0x38e   : > { %1267 = vmatmul.mubr.f32.gmra.mrb[40].mxu1 %v945_v8  ;;  %9198 = vmatprep.subr.bf16.mxu0 %v10997_v7  ;;  %v1405_v8 = vld [vmem:[#allocation4 + $0x200] sm:$0xff] }
 0x38f   : > { %9073 = vmatpush3.bf16.msra.mxu1 %v11036_v19  ;;  %1271 = vmatprep.mubr.f32.mxu1 %v953_v32  ;;  %v2076_v32 = vld [vmem:[#allocation4 + $0x320] sm:$0xff] }
 0x390   : > { %9075 = vmatprep.subr.bf16.mxu1 %v11045_v26  ;;  %2229 = vmatmul.mubr.f32.gmra.mrb[54].mxu0 %v2102_v12  ;;  %v2084_v12 = vld [vmem:[#allocation4 + $0x360] sm:$0xff] }
 0x391   : > { %9200 = vmatpush3.bf16.msra.mxu0 %v11021_v5  ;;  %2233 = vmatprep.mubr.f32.mxu0 %v2110_v46  ;;  %v1404_v46 = vld [vmem:[#allocation4 + $0x1f8] sm:$0xff] }
 0x392   : > { %1272 = vmatmul.mubr.f32.gmra.mrb[42].mxu1 %v952_v18  ;;  %9202 = vmatprep.subr.bf16.mxu0 %v11028_v13  ;;  %v1412_v18 = vld [vmem:[#allocation4 + $0x238] sm:$0xff] }
 0x393   : > { %9077 = vmatpush3.bf16.msra.mxu1 %v11067_v50  ;;  %1524 = vmatprep.mubr.f32.mxu1 %v1391_v29  ;;  %v2083_v29 = vld [vmem:[#allocation4 + $0x358] sm:$0xff] }
 0x394   : > { %9079 = vmatprep.subr.bf16.mxu1 %v11076_v51  ;;  %2234 = vmatmul.mubr.f32.gmra.mrb[56].mxu0 %v2109_v43  ;;  %v2091_v43 = vld [vmem:[#allocation4 + $0x398] sm:$0xff] }
 0x395   : > { %9204 = vmatpush3.bf16.msra.mxu0 %v11052_v37  ;;  %2238 = vmatprep.mubr.f32.mxu0 %v2117_v16  ;;  %v1411_v16 = vld [vmem:[#allocation4 + $0x230] sm:$0xff]  ;;  %v9959_v5 = vld [vmem:[#allocation6 + $0x30] sm:$0xff]  }
 0x396   : > { %9206 = vmatprep.subr.bf16.mxu0 %v11059_v54  ;;  %v3257_v54 = vld [vmem:[#allocation4 + $0x628] sm:$0xff] }
 0x397   : > { %9081 = vmatpush3.bf16.msra.mxu1 %v11094_v24 }
 0x398   : > { %9851 = vmatprep.subr.bf16.mxu1 %v11109_v33  ;;  %2239 = vmatmul.mubr.f32.gmra.mrb[58].mxu0 %v2116_v30  ;;  %v1419_v30 = vld [vmem:[#allocation4 + $0x270] sm:$0xff] }
 0x399   : > { %9208 = vmatpush3.bf16.msra.mxu0 %v11079_v34  ;;  %2308 = vmatprep.mubr.f32.mxu0 %v2077_v31  ;;  %v2090_v31 = vld [vmem:[#allocation4 + $0x390] sm:$0xff]  ;;  %v9957_v34 = vld [vmem:[#allocation6 + $0x20] sm:$0xff]  }
 0x39a   : > { %1525 = vmatmul.mubr.f32.vlgmr.msra.gmra.mrb[44].mxu1 %v1390_v60  ;;  %9210 = vmatprep.subr.bf16.mxu0 %v11090_v53  ;;  %v2098_v60 = vld [vmem:[#allocation4 + $0x3d0] sm:$0xff]  ;;  %v2711_v53 = vld [vmem:[#allocation4 + $0x608] sm:$0x1] }
 0x39b   : > { %9859 = vmatpush3.bf16.msra.mxu1 %v11114_v58  ;;  %1529 = vmatprep.mubr.f32.mxu1 %v1398_v39  ;;  %v1418_v39 = vld [vmem:[#allocation4 + $0x268] sm:$0xff] }
 0x39c   : > { %9852 = vmatprep.subr.bf16.mxu1 %v11124_v59 }
 0x39d   : > { %9212 = vmatpush3.bf16.msra.mxu0 %v11098_v44 }
 0x39e   : > { %1530 = vmatmul.mubr.f32.gmra.mrb[46].mxu1 %v1397_v61  ;;  %9245 = vmatprep.subr.bf16.mxu0 %v12781_v28  ;;  %v1426_v61 = vld [vmem:[#allocation4 + $0x2a8] sm:$0xff]  ;;  %v2712_v28 = vld [vmem:[#allocation4 + $0x610] sm:$0x1] }
 0x39f   : > { %9860 = vmatpush3.bf16.msra.mxu1 %v11130_v15  ;;  %1534 = vmatprep.mubr.f32.mxu1 %v1405_v8  ;;  %v2097_v8 = vld [vmem:[#allocation4 + $0x3c8] sm:$0xff] }
 0x3a0   : > { %9853 = vmatprep.subr.bf16.mxu1 %v11140_v38  ;;  %2309 = vmatmul.mubr.f32.vlgmr.msra.gmra.mrb[60].mxu0 %v2076_v32  ;;  %v2105_v32 = vld [vmem:[#allocation4 + $0x408] sm:$0xff] }
 0x3a1   : > { %9247 = vmatpush3.bf16.msra.mxu0 %v10851_v63  ;;  %2313 = vmatprep.mubr.f32.mxu0 %v2084_v12  ;;  %v1425_v12 = vld [vmem:[#allocation4 + $0x2a0] sm:$0xff]  ;;  %v2705_v63 = vld [vmem:[#allocation4 + $0x5d8] sm:$0xff] }
 0x3a2   : > { %1535 = vmatmul.mubr.f32.gmra.mrb[48].mxu1 %v1404_v46  ;;  %9249 = vmatprep.subr.bf16.mxu0 %v10865_v42  ;;  %v1433_v46 = vld [vmem:[#allocation4 + $0x2e0] sm:$0x1] }
 0x3a3   : > { %9861 = vmatpush3.bf16.msra.mxu1 %v11146_v56  ;;  %1539 = vmatprep.mubr.f32.mxu1 %v1412_v18  ;;  %v2104_v18 = vld [vmem:[#allocation4 + $0x400] sm:$0xff] }
 0x3a4   : > { %9854 = vmatprep.subr.bf16.mxu1 %v11156_v21  ;;  %2314 = vmatmul.mubr.f32.gmra.mrb[62].mxu0 %v2083_v29  ;;  %v2112_v29 = vld [vmem:[#allocation4 + $0x440] sm:$0xff] }
 0x3a5   : > { %2318 = vmatprep.mubr.f32.mxu0 %v2091_v43  ;;  %v1432_v43 = vld [vmem:[#allocation4 + $0x2d8] sm:$0x1] }
 0x3a6   : > { %1540 = vmatmul.mubr.f32.gmra.mrb[50].mxu1 %v1411_v16  ;;  %v1402_v16 = vld [vmem:[#allocation4 + $0x1e8] sm:$0xff] }
 0x3a7   : > { %9862 = vmatpush3.bf16.msra.mxu1 %v11162_v47  ;;  %1544 = vmatprep.mubr.f32.mxu1 %v1419_v30  ;;  %v2111_v30 = vld [vmem:[#allocation4 + $0x438] sm:$0xff] }
 0x3a8   : > { %9855 = vmatprep.subr.bf16.mxu1 %v11172_v3  ;;  %2319 = vmatmul.mubr.f32.gmra.mrb[64].mxu0 %v2090_v31  ;;  %v2119_v31 = vld [vmem:[#allocation4 + $0x478] sm:$0x1] }
 0x3a9   : > { %2323 = vmatprep.mubr.f32.mxu0 %v2098_v60  ;;  %v2118_v60 = vld [vmem:[#allocation4 + $0x470] sm:$0x1] }
 0x3aa   : > { %1545 = vmatmul.mubr.f32.gmra.mrb[52].mxu1 %v1418_v39  ;;  %v1401_v39 = vld [vmem:[#allocation4 + $0x1e0] sm:$0xff] }
 0x3ab   : > { %9863 = vmatpush3.bf16.msra.mxu1 %v11178_v41  ;;  %1549 = vmatprep.mubr.f32.mxu1 %v1426_v61  ;;  %v1409_v61 = vld [vmem:[#allocation4 + $0x220] sm:$0xff] }
 0x3ac   : > { %9856 = vmatprep.subr.bf16.mxu1 %v11188_v27  ;;  %2324 = vmatmul.mubr.f32.gmra.mrb[66].mxu0 %v2097_v8  ;;  %v2080_v8 = vld [vmem:[#allocation4 + $0x340] sm:$0xff] }
 0x3ad   : > { %2328 = vmatprep.mubr.f32.mxu0 %v2105_v32  ;;  %v1408_v32 = vld [vmem:[#allocation4 + $0x218] sm:$0xff] }
 0x3ae   : > { %1550 = vmatmul.mubr.f32.gmra.mrb[54].mxu1 %v1425_v12  ;;  %v1416_v12 = vld [vmem:[#allocation4 + $0x258] sm:$0xff] }
 0x3af   : > { %9864 = vmatpush3.bf16.msra.mxu1 %v11194_v10  ;;  %1554 = vmatprep.mubr.f32.mxu1 %v1433_v46  ;;  %v2087_v46 = vld [vmem:[#allocation4 + $0x378] sm:$0xff] }
 0x3b0   : > { %9857 = vmatprep.subr.bf16.mxu1 %v11204_v2  ;;  %2329 = vmatmul.mubr.f32.gmra.mrb[68].mxu0 %v2104_v18  ;;  %v1415_v18 = vld [vmem:[#allocation4 + $0x250] sm:$0xff] }
 0x3b1   : > { %2333 = vmatprep.mubr.f32.mxu0 %v2112_v29  ;;  %v1423_v29 = vld [vmem:[#allocation4 + $0x290] sm:$0xff] }
 0x3b2   : > { %1555 = vmatmul.mubr.f32.gmra.mrb[56].mxu1 %v1432_v43  ;;  %v2094_v43 = vld [vmem:[#allocation4 + $0x3b0] sm:$0xff] }
 0x3b3   : > { %9865 = vmatpush3.bf16.msra.mxu1 %v11210_v35  ;;  %1729 = vmatprep.mubr.f32.mxu1 %v1402_v16  ;;  %v1422_v16 = vld [vmem:[#allocation4 + $0x288] sm:$0xff] }
 0x3b4   : > { %9858 = vmatprep.subr.bf16.mxu1 %v11216_v14  ;;  %2334 = vmatmul.mubr.f32.gmra.mrb[70].mxu0 %v2111_v30  ;;  %v1430_v30 = vld [vmem:[#allocation4 + $0x2c8] sm:$0xff] }
 0x3b5   : > { %2338 = vmatprep.mubr.f32.mxu0 %v2119_v31  ;;  %v2101_v31 = vld [vmem:[#allocation4 + $0x3e8] sm:$0xff] }
 0x3b7   : > { %9866 = vmatpush3.bf16.msra.mxu1 %v11222_v55 }
 0x3b8   : > { %2339 = vmatmul.mubr.f32.gmra.mrb[72].mxu0 %v2118_v60  ;;  %v1429_v60 = vld [vmem:[#allocation4 + $0x2c0] sm:$0xff]  ;;  %8531 = vmatprep.subr.bf16.mxu1 %v9957_v34 }
 0x3b9   : > { %8567 = vmatprep.mubr.msk.f32.mxu0 %vm10138_vm0, %v12699_v20 }
 0x3ba   : > { %1730 = vmatmul.mubr.f32.vlgmr.msra.gmra.mrb[58].mxu1 %v1401_v39  ;;  %v1437_v39 = vld [vmem:[#allocation4 + $0x300] sm:$0x1] }
 0x3bb   : > { %1734 = vmatprep.mubr.f32.mxu1 %v1409_v61  ;;  %v2108_v61 = vld [vmem:[#allocation4 + $0x420] sm:$0xff]  ;;  %8532 = vmatpush3.bf16.msra.mxu1 %v9957_v34 }
 0x3bc   : > { %8568 = vmatmul.mubr.msk.f32.vlgmr.msra.gmra.mrb[74].mxu0 %vm955_vm4, %v2080_v8  ;;  %v1436_v8 = vld [vmem:[#allocation4 + $0x2f8] sm:$0x1]  ;;  %v3256_v34 = vld [vmem:[#allocation4 + $0x620] sm:$0xff] }
 0x3bd   : > { %9251 = vmatpush3.bf16.msra.mxu0 %v10874_v9  ;;  %8570 = vmatprep.mubr.msk.f32.mxu0 %vm10138_vm0, %v12699_v20 }
 0x3be   : > { %1735 = vmatmul.mubr.f32.gmra.mrb[60].mxu1 %v1408_v32  ;;  %9253 = vmatprep.subr.bf16.mxu0 %v10883_v62  ;;  %v2115_v32 = vld [vmem:[#allocation4 + $0x458] sm:$0xff] }
 0x3bf   : > { %1739 = vmatprep.mubr.f32.mxu1 %v1416_v12  ;;  %v2122_v12 = vld [vmem:[#allocation4 + $0x490] sm:$0x1] }
 0x3c0   : > { %8571 = vmatmul.mubr.msk.f32.gmra.mrb[76].mxu0 %vm955_vm4, %v2087_v46  ;;  %v2666_v46 = vld [vmem:[#allocation4 + $0x4a0] sm:$0xff] }
 0x3c1   : > { %9255 = vmatpush3.bf16.msra.mxu0 %v10901_v11  ;;  %8573 = vmatprep.mubr.msk.f32.mxu0 %vm10138_vm0, %v12699_v20 }
 0x3c2   : > { %1740 = vmatmul.mubr.f32.gmra.mrb[62].mxu1 %v1415_v18  ;;  %9257 = vmatprep.subr.bf16.mxu0 %v10908_v25  ;;  %v2665_v18 = vld [vmem:[#allocation4 + $0x498] sm:$0xff] }
 0x3c3   : > { %1744 = vmatprep.mubr.f32.mxu1 %v1423_v29  ;;  %v2673_v29 = vld [vmem:[#allocation4 + $0x4d8] sm:$0xff] }
 0x3c4   : > { %8574 = vmatmul.mubr.msk.f32.gmra.mrb[78].mxu0 %vm955_vm4, %v2094_v43  ;;  %v2672_v43 = vld [vmem:[#allocation4 + $0x4d0] sm:$0xff] }
 0x3c5   : > { %9259 = vmatpush3.bf16.msra.mxu0 %v10933_v52  ;;  %8576 = vmatprep.mubr.msk.f32.mxu0 %vm10138_vm0, %v12699_v20 }
 0x3c6   : > { %1745 = vmatmul.mubr.f32.gmra.mrb[64].mxu1 %v1422_v16  ;;  %9261 = vmatprep.subr.bf16.mxu0 %v10950_v49  ;;  %v2680_v16 = vld [vmem:[#allocation4 + $0x510] sm:$0xff] }
 0x3c7   : > { %1749 = vmatprep.mubr.f32.mxu1 %v1430_v30  ;;  %v2679_v30 = vld [vmem:[#allocation4 + $0x508] sm:$0xff] }
 0x3c8   : > { %8577 = vmatmul.mubr.msk.f32.gmra.mrb[80].mxu0 %vm955_vm4, %v2101_v31  ;;  %v2687_v31 = vld [vmem:[#allocation4 + $0x548] sm:$0xff] }
 0x3c9   : > { %9263 = vmatpush3.bf16.msra.mxu0 %v10966_v48  ;;  %8579 = vmatprep.mubr.msk.f32.mxu0 %vm10138_vm0, %v12699_v20 }
 0x3ca   : > { %1750 = vmatmul.mubr.f32.gmra.mrb[66].mxu1 %v1429_v60  ;;  %9265 = vmatprep.subr.bf16.mxu0 %v10981_v57  ;;  %v2686_v60 = vld [vmem:[#allocation4 + $0x540] sm:$0xff] }
 0x3cb   : > { %1754 = vmatprep.mubr.f32.mxu1 %v1437_v39  ;;  %v2694_v39 = vld [vmem:[#allocation4 + $0x580] sm:$0xff] }
 0x3cc   : > { %8580 = vmatmul.mubr.msk.f32.gmra.mrb[82].mxu0 %vm955_vm4, %v2108_v61  ;;  %v2693_v61 = vld [vmem:[#allocation4 + $0x578] sm:$0xff] }
 0x3cd   : > { %9267 = vmatpush3.bf16.msra.mxu0 %v11005_v6  ;;  %8582 = vmatprep.mubr.msk.f32.mxu0 %vm10138_vm0, %v12699_v20 }
 0x3ce   : > { %1755 = vmatmul.mubr.f32.gmra.mrb[68].mxu1 %v1436_v8  ;;  %9269 = vmatprep.subr.bf16.mxu0 %v11012_v45  ;;  %v2701_v8 = vld [vmem:[#allocation4 + $0x5b8] sm:$0xff] }
 0x3d0   : > { %8583 = vmatmul.mubr.msk.f32.gmra.mrb[84].mxu0 %vm955_vm4, %v2115_v32  ;;  %v2700_v32 = vld [vmem:[#allocation4 + $0x5b0] sm:$0xff] }
 0x3d1   : > { %9271 = vmatpush3.bf16.msra.mxu0 %v11036_v19  ;;  %8585 = vmatprep.mubr.msk.f32.mxu0 %vm10138_vm0, %v12699_v20  ;;  %v2698_v20 = vld [vmem:[#allocation4 + $0x5a0] sm:$0xff] }
 0x3d2   : > { %9273 = vmatprep.subr.bf16.mxu0 %v11045_v26 }
 0x3d4   : > { %8586 = vmatmul.mubr.msk.f32.gmra.mrb[86].mxu0 %vm955_vm4, %v2122_v12  ;;  %v2708_v12 = vld [vmem:[#allocation4 + $0x5f0] sm:$0x1] }
 0x3d5   : > { %9275 = vmatpush3.bf16.msra.mxu0 %v11067_v50  ;;  %2799 = vmatprep.mubr.f32.mxu0 %v2666_v46 }
 0x3d6   : > { %9277 = vmatprep.subr.bf16.mxu0 %v11076_v51 }
 0x3d9   : > { %9279 = vmatpush3.bf16.msra.mxu0 %v11094_v24 }
 0x3da   : > { %9313 = vmatprep.subr.bf16.mxu0 %v11109_v33 }
 0x3dc   : > { %2800 = vmatmul.mubr.f32.vlgmr.msra.gmra.mrb[88].mxu0 %v2665_v18 }
 0x3dd   : > { %9315 = vmatpush3.bf16.msra.mxu0 %v11114_v58  ;;  %2804 = vmatprep.mubr.f32.mxu0 %v2673_v29  ;;  %v2707_v29 = vld [vmem:[#allocation4 + $0x5e8] sm:$0x1] }
 0x3de   : > { %9317 = vmatprep.subr.bf16.mxu0 %v11124_v59 }
 0x3e0   : > { %2805 = vmatmul.mubr.f32.gmra.mrb[90].mxu0 %v2672_v43  ;;  %v2670_v43 = vld [vmem:[#allocation4 + $0x4c0] sm:$0xff] }
 0x3e1   : > { %9319 = vmatpush3.bf16.msra.mxu0 %v11130_v15  ;;  %2809 = vmatprep.mubr.f32.mxu0 %v2680_v16 }
 0x3e2   : > { %9321 = vmatprep.subr.bf16.mxu0 %v11140_v38 }
 0x3e4   : > { %2810 = vmatmul.mubr.f32.gmra.mrb[92].mxu0 %v2679_v30 }
 0x3e5   : > { %9323 = vmatpush3.bf16.msra.mxu0 %v11146_v56  ;;  %2814 = vmatprep.mubr.f32.mxu0 %v2687_v31 }
 0x3e6   : > { %9325 = vmatprep.subr.bf16.mxu0 %v11156_v21 }
 0x3e8   : > { %2815 = vmatmul.mubr.f32.gmra.mrb[94].mxu0 %v2686_v60 }
 0x3e9   : > { %9327 = vmatpush3.bf16.msra.mxu0 %v11162_v47  ;;  %2819 = vmatprep.mubr.f32.mxu0 %v2694_v39  ;;  %v2669_v39 = vld [vmem:[#allocation4 + $0x4b8] sm:$0xff] }
 0x3ea   : > { %9329 = vmatprep.subr.bf16.mxu0 %v11172_v3 }
 0x3ec   : > { %2820 = vmatmul.mubr.f32.gmra.mrb[96].mxu0 %v2693_v61  ;;  %v2677_v61 = vld [vmem:[#allocation4 + $0x4f8] sm:$0xff] }
 0x3ed   : > { %9331 = vmatpush3.bf16.msra.mxu0 %v11178_v41  ;;  %2824 = vmatprep.mubr.f32.mxu0 %v2701_v8 }
 0x3ee   : > { %9333 = vmatprep.subr.bf16.mxu0 %v11188_v27 }
 0x3ef   : > { %v11378_v46 = vpop.f32.mrb[2].mxu0 }
 0x3f0   : > { %2825 = vmatmul.mubr.f32.gmra.mrb[98].mxu0 %v2700_v32  ;;  %v8487_v18 = vpop.f32.mrb[3].mxu0 }
 0x3f1   : > { %9335 = vmatpush3.bf16.msra.mxu0 %v11194_v10  ;;  %2829 = vmatprep.mubr.f32.mxu0 %v2708_v12  ;;  %v2676_v12 = vld [vmem:[#allocation4 + $0x4f0] sm:$0xff] }
 0x3f2   : > { %9337 = vmatprep.subr.bf16.mxu0 %v11204_v2  ;;  %v2684_v18 = vld [vmem:[#allocation4 + $0x530] sm:$0xff] }
 0x3f3   : > { %v11382_v16 = vpop.f32.mrb[4].mxu0 }
 0x3f4   : > { %2830 = vmatmul.mubr.f32.gmra.mrb[100].mxu0 %v2707_v29  ;;  %v8490_v30 = vpop.f32.mrb[5].mxu0 }
 0x3f5   : > { %9339 = vmatpush3.bf16.msra.mxu0 %v11210_v35  ;;  %2999 = vmatprep.mubr.f32.mxu0 %v2670_v43  ;;  %v2683_v30 = vld [vmem:[#allocation4 + $0x528] sm:$0xff] }
 0x3f6   : > { %9341 = vmatprep.subr.bf16.mxu0 %v11216_v14 }
 0x3f7   : > { %v11386_v31 = vpop.f32.mrb[6].mxu0 }
 0x3f8   : > { %v8493_v60 = vpop.f32.mrb[7].mxu0 }
 0x3f9   : > { %9343 = vmatpush3.bf16.msra.mxu0 %v11222_v55  ;;  %v2691_v60 = vld [vmem:[#allocation4 + $0x568] sm:$0xff] }
 0x3fa   : > { %9348 = vmatprep.subr.bf16.mxu0 %v10865_v42 }
 0x3fb   : > { %v11390_v8 = vpop.f32.mrb[8].mxu0 }
 0x3fc   : > { %3000 = vmatmul.mubr.f32.vlgmr.msra.gmra.mrb[102].mxu0 %v2669_v39  ;;  %v8496_v32 = vpop.f32.mrb[9].mxu0 }
 0x3fd   : > { %9350 = vmatpush3.bf16.msra.mxu0 %v10874_v9  ;;  %3004 = vmatprep.mubr.f32.mxu0 %v2677_v61  ;;  %v2690_v61 = vld [vmem:[#allocation4 + $0x560] sm:$0xff] }
 0x3fe   : > { %9352 = vmatprep.subr.bf16.mxu0 %v10883_v62 }
 0x3ff   : > { %v11394_v29 = vpop.f32.mrb[10].mxu0 }
 0x400   : > { %3005 = vmatmul.mubr.f32.gmra.mrb[104].mxu0 %v2676_v12  ;;  %v8499_v43 = vpop.f32.mrb[11].mxu0 }
 0x401   : > { %9354 = vmatpush3.bf16.msra.mxu0 %v10901_v11  ;;  %3009 = vmatprep.mubr.f32.mxu0 %v2684_v18  ;;  %v2697_v18 = vld [vmem:[#allocation4 + $0x598] sm:$0xff] }
 0x402   : > { %9356 = vmatprep.subr.bf16.mxu0 %v10908_v25 }
 0x403   : > { %v11398_v39 = vpop.f32.mrb[12].mxu0 }
 0x404   : > { %3010 = vmatmul.mubr.f32.gmra.mrb[106].mxu0 %v2683_v30  ;;  %v8502_v32 = vpop.f32.mrb[13].mxu0 }
 0x405   : > { %9358 = vmatpush3.bf16.msra.mxu0 %v10933_v52  ;;  %3014 = vmatprep.mubr.f32.mxu0 %v2691_v60  ;;  %v2704_v60 = vld [vmem:[#allocation4 + $0x5d0] sm:$0xff] }
 0x406   : > { %9360 = vmatprep.subr.bf16.mxu0 %v10950_v49 }
 0x407   : > { %v11402_v12 = vpop.f32.mrb[14].mxu0 }
 0x408   : > { %12782 = vst [vmem:[#allocation33_spill] sm:$0xff] %v11402_v12  ;;  %3015 = vmatmul.mubr.f32.gmra.mrb[108].mxu0 %v2690_v61  ;;  %v8505_v43 = vpop.f32.mrb[15].mxu0 }
 0x409   : > { %9362 = vmatpush3.bf16.msra.mxu0 %v10966_v48  ;;  %3019 = vmatprep.mubr.f32.mxu0 %v2698_v20 }
 0x40a   : > { %9364 = vmatprep.subr.bf16.mxu0 %v10981_v57 }
 0x40c   : > { %3020 = vmatmul.mubr.f32.gmra.mrb[110].mxu0 %v2697_v18 }
 0x40d   : > { %v6873_v30 = vpop.f32.mrb[2].mxu1  ;;  %9366 = vmatpush3.bf16.msra.mxu0 %v11005_v6  ;;  %3024 = vmatprep.mubr.f32.mxu0 %v2705_v63 }
 0x40e   : > { %v6874_v32 = vpop.f32.mrb[3].mxu1  ;;  %9368 = vmatprep.subr.bf16.mxu0 %v11012_v45 }
 0x40f   : > { %v11408_v44 = vadd.f32 %v6874_v32, %v6873_v30  ;;  %v7094_v61 = vpop.f32.mrb[16].mxu0  ;;  %v9958_v32 = vld [vmem:[#allocation6 + $0x28] sm:$0xff]  }
 0x410   : > { %3025 = vmatmul.mubr.f32.gmra.mrb[112].mxu0 %v2704_v60  ;;  %v7095_v43 = vpop.f32.mrb[17].mxu0  ;;  %8533 = vmatprep.subr.bf16.mxu1 %v9958_v32 }
 0x411   : > { %9370 = vmatpush3.bf16.msra.mxu0 %v11036_v19  ;;  %v6876_v20 = vpop.f32.mrb[4].mxu1  ;;  %3029 = vmatprep.mubr.f32.mxu0 %v2712_v28  ;;  %v11411_v18 = vadd.f32 %v7095_v43, %v7094_v61 }
 0x412   : > { %9372 = vmatprep.subr.bf16.mxu0 %v11045_v26  ;;  %v6877_v63 = vpop.f32.mrb[5].mxu1  ;;  %8534 = vmatpush3.bf16.msra.mxu1 %v9958_v32 }
 0x413   : > { %12783 = vst [vmem:[#allocation34_spill] sm:$0xff] %v11411_v18  ;;  %v11414_v37 = vadd.f32 %v6877_v63, %v6876_v20  ;;  %v7097_v13 = vpop.f32.mrb[18].mxu0  ;;  %8535 = vmatprep.subr.bf16.mxu1 %v9959_v5 }
 0x414   : > { %3030 = vmatmul.mubr.f32.gmra.mrb[114].mxu0 %v2711_v53  ;;  %v7098_v30 = vpop.f32.mrb[19].mxu0 }
 0x415   : > { %9374 = vmatpush3.bf16.msra.mxu0 %v11067_v50  ;;  %v6879_v60 = vpop.f32.mrb[6].mxu1  ;;  %3390 = vmatprep.mubr.f32.mxu0 %v3257_v54  ;;  %v11417_v28 = vadd.f32 %v7098_v30, %v7097_v13  ;;  %v3264_v54 = vld [vmem:[#allocation4 + $0x660] sm:$0xff] }
 0x416   : > { %9376 = vmatprep.subr.bf16.mxu0 %v11076_v51  ;;  %v6880_v61 = vpop.f32.mrb[7].mxu1  ;;  %8536 = vmatpush3.bf16.msra.mxu1 %v9959_v5 }
 0x417   : > { %12784 = vst [vmem:[#allocation51_spill] sm:$0xff] %v11417_v28  ;;  %v11420_v43 = vadd.f32 %v6880_v61, %v6879_v60  ;;  %v7100_v18 = vpop.f32.mrb[20].mxu0  ;;  %v3263_v61 = vld [vmem:[#allocation4 + $0x658] sm:$0xff] }
 0x418   : > { %v7101_v20 = vpop.f32.mrb[21].mxu0 }
 0x419   : > { %9378 = vmatpush3.bf16.msra.mxu0 %v11094_v24  ;;  %v6882_v53 = vpop.f32.mrb[8].mxu1  ;;  %v11423_v63 = vadd.f32 %v7101_v20, %v7100_v18  ;;  %v9960_v18 = vld [vmem:[#allocation6 + $0x38] sm:$0xff]  }
 0x41a   : > { %9412 = vmatprep.subr.bf16.mxu0 %v11109_v33  ;;  %v6883_v13 = vpop.f32.mrb[9].mxu1  ;;  %v3271_v33 = vld [vmem:[#allocation4 + $0x698] sm:$0xff]  ;;  %8537 = vmatprep.subr.bf16.mxu1 %v9960_v18 }
 0x41b   : > { %12785 = vst [vmem:[#allocation52_spill] sm:$0xff] %v11423_v63  ;;  %v11426_v30 = vadd.f32 %v6883_v13, %v6882_v53  ;;  %v7103_v28 = vpop.f32.mrb[22].mxu0  ;;  %8538 = vmatpush3.bf16.msra.mxu1 %v9960_v18  ;;  %v3270_v13 = vld [vmem:[#allocation4 + $0x690] sm:$0xff] }
 0x41c   : > { %3391 = vmatmul.mubr.f32.vlgmr.msra.gmra.mrb[116].mxu0 %v3256_v34  ;;  %v7104_v60 = vpop.f32.mrb[23].mxu0 }
 0x41d   : > { %9414 = vmatpush3.bf16.msra.mxu0 %v11114_v58  ;;  %v6885_v32 = vpop.f32.mrb[10].mxu1  ;;  %3395 = vmatprep.mubr.f32.mxu0 %v3264_v54  ;;  %v11429_v12 = vadd.f32 %v7104_v60, %v7103_v28  ;;  %v11437_v28 = vld [vmem:[#allocation6] sm:$0xff]  }
 0x41e   : > { %9416 = vmatprep.subr.bf16.mxu0 %v11124_v59  ;;  %v6886_v20 = vpop.f32.mrb[11].mxu1  ;;  %v3278_v59 = vld [vmem:[#allocation4 + $0x6d0] sm:$0xff]  ;;  %8547 = vmatprep.subr.bf16.mxu1 %v11437_v28 }
 0x41f   : > { %v11432_v63 = vadd.f32 %v6886_v20, %v6885_v32  ;;  %v7106_v53 = vpop.f32.mrb[24].mxu0 }
 0x420   : > { %3396 = vmatmul.mubr.f32.gmra.mrb[118].mxu0 %v3263_v61  ;;  %v7107_v34 = vpop.f32.mrb[25].mxu0 }
 0x421   : > { %9418 = vmatpush3.bf16.msra.mxu0 %v11130_v15  ;;  %v6888_v5 = vpop.f32.mrb[12].mxu1  ;;  %3400 = vmatprep.mubr.f32.mxu0 %v3271_v33  ;;  %v11435_v54 = vadd.f32 %v7107_v34, %v7106_v53  ;;  %v3277_v33 = vld [vmem:[#allocation4 + $0x6c8] sm:$0xff] }
 0x422   : > { %9420 = vmatprep.subr.bf16.mxu0 %v11140_v38  ;;  %v6889_v60 = vpop.f32.mrb[13].mxu1  ;;  %v3285_v38 = vld [vmem:[#allocation4 + $0x708] sm:$0xff] }
 0x423   : > { %v11440_v32 = vadd.f32 %v6889_v60, %v6888_v5  ;;  %v7109_v20 = vpop.f32.mrb[26].mxu0 }
 0x424   : > { %3401 = vmatmul.mubr.f32.gmra.mrb[120].mxu0 %v3270_v13  ;;  %v7110_v61 = vpop.f32.mrb[27].mxu0  ;;  %v3284_v13 = vld [vmem:[#allocation4 + $0x700] sm:$0xff] }
 0x425   : > { %9422 = vmatpush3.bf16.msra.mxu0 %v11146_v56  ;;  %v6891_v18 = vpop.f32.mrb[14].mxu1  ;;  %3405 = vmatprep.mubr.f32.mxu0 %v3278_v59  ;;  %v11444_v53 = vadd.f32 %v7110_v61, %v7109_v20  ;;  %v3292_v59 = vld [vmem:[#allocation4 + $0x740] sm:$0xff]  ;;  %v3291_v61 = vld [vmem:[#allocation4 + $0x738] sm:$0xff] }
 0x426   : > { %9424 = vmatprep.subr.bf16.mxu0 %v11156_v21  ;;  %v6892_v34 = vpop.f32.mrb[15].mxu1 }
 0x427   : > { %v11447_v15 = vadd.f32 %v6892_v34, %v6891_v18  ;;  %v7112_v5 = vpop.f32.mrb[28].mxu0 }
 0x428   : > { %3406 = vmatmul.mubr.f32.gmra.mrb[122].mxu0 %v3277_v33  ;;  %v7113_v60 = vpop.f32.mrb[29].mxu0  ;;  %v3299_v33 = vld [vmem:[#allocation4 + $0x778] sm:$0x1] }
 0x429   : > { %9426 = vmatpush3.bf16.msra.mxu0 %v11162_v47  ;;  %3410 = vmatprep.mubr.f32.mxu0 %v3285_v38  ;;  %v11450_v58 = vadd.f32 %v7113_v60, %v7112_v5 }
 0x42a   : > { %9428 = vmatprep.subr.bf16.mxu0 %v11172_v3 }
 0x42c   : > { %3411 = vmatmul.mubr.f32.gmra.mrb[124].mxu0 %v3284_v13  ;;  %v3298_v13 = vld [vmem:[#allocation4 + $0x770] sm:$0x1] }
 0x42d   : > { %v6926_v20 = vpop.f32.mrb[16].mxu1  ;;  %9430 = vmatpush3.bf16.msra.mxu0 %v11178_v41  ;;  %3415 = vmatprep.mubr.f32.mxu0 %v3292_v59  ;;  %v3261_v41 = vld [vmem:[#allocation4 + $0x648] sm:$0xff] }
 0x42e   : > { %v6927_v18 = vpop.f32.mrb[17].mxu1  ;;  %9432 = vmatprep.subr.bf16.mxu0 %v11188_v27 }
 0x42f   : > { %v6928_v34 = vadd.f32 %v6927_v18, %v6926_v20  ;;  %v7147_v21 = vpop.f32.mrb[30].mxu0 }
 0x430   : > { %3416 = vmatmul.mubr.f32.gmra.mrb[126].mxu0 %v3291_v61  ;;  %v7148_v38 = vpop.f32.mrb[31].mxu0 }
 0x431   : > { %v11456_v5 = vadd.f32 %v6928_v34, %v11408_v44  ;;  %v6929_v60 = vpop.f32.mrb[18].mxu1  ;;  %9434 = vmatpush3.bf16.msra.mxu0 %v11194_v10  ;;  %3420 = vmatprep.mubr.f32.mxu0 %v3299_v33  ;;  %v11459_v3 = vadd.f32 %v7148_v38, %v7147_v21 }
 0x432   : > { %v6930_v59 = vpop.f32.mrb[19].mxu1  ;;  %9436 = vmatprep.subr.bf16.mxu0 %v11204_v2 }
 0x433   : > { %v6931_v27 = vadd.f32 %v6930_v59, %v6929_v60  ;;  %v11462_v47 = vpop.f32.mrb[32].mxu0 }
 0x434   : > { %3421 = vmatmul.mubr.f32.gmra.mrb[128].mxu0 %v3298_v13  ;;  %v8512_v20 = vpop.f32.mrb[33].mxu0  ;;  %v3260_v13 = vld [vmem:[#allocation4 + $0x640] sm:$0xff] }
 0x435   : > { %v11465_v61 = vadd.f32 %v6931_v27, %v11414_v37  ;;  %v6932_v44 = vpop.f32.mrb[20].mxu1  ;;  %9438 = vmatpush3.bf16.msra.mxu0 %v11210_v35  ;;  %3590 = vmatprep.mubr.f32.mxu0 %v3261_v41  ;;  %v3268_v27 = vld [vmem:[#allocation4 + $0x680] sm:$0xff] }
 0x436   : > { %v6933_v18 = vpop.f32.mrb[21].mxu1  ;;  %9440 = vmatprep.subr.bf16.mxu0 %v11216_v14 }
 0x437   : > { %v6934_v21 = vadd.f32 %v6933_v18, %v6932_v44  ;;  %v11469_v33 = vpop.f32.mrb[34].mxu0 }
 0x438   : > { %v8515_v34 = vpop.f32.mrb[35].mxu0 }
 0x439   : > { %v11472_v38 = vadd.f32 %v6934_v21, %v11420_v43  ;;  %v6935_v60 = vpop.f32.mrb[22].mxu1  ;;  %9442 = vmatpush3.bf16.msra.mxu0 %v11222_v55  ;;  %v3267_v43 = vld [vmem:[#allocation4 + $0x678] sm:$0xff] }
 0x43a   : > { %v6936_v37 = vpop.f32.mrb[23].mxu1  ;;  %9447 = vmatprep.subr.bf16.mxu0 %v10865_v42  ;;  %v3275_v34 = vld [vmem:[#allocation4 + $0x6b8] sm:$0xff] }
 0x43b   : > { %v6937_v59 = vadd.f32 %v6936_v37, %v6935_v60  ;;  %v11476_v41 = vpop.f32.mrb[36].mxu0 }
 0x43c   : > { %3591 = vmatmul.mubr.f32.vlgmr.msra.gmra.mrb[130].mxu0 %v3260_v13  ;;  %v8518_v20 = vpop.f32.mrb[37].mxu0 }
 0x43d   : > { %v11479_v44 = vadd.f32 %v6937_v59, %v11426_v30  ;;  %v6938_v18 = vpop.f32.mrb[24].mxu1  ;;  %9449 = vmatpush3.bf16.msra.mxu0 %v10874_v9  ;;  %3595 = vmatprep.mubr.f32.mxu0 %v3268_v27  ;;  %v3274_v30 = vld [vmem:[#allocation4 + $0x6b0] sm:$0xff] }
 0x43e   : > { %v6939_v21 = vpop.f32.mrb[25].mxu1  ;;  %9451 = vmatprep.subr.bf16.mxu0 %v10883_v62  ;;  %v3282_v27 = vld [vmem:[#allocation4 + $0x6f0] sm:$0xff] }
 0x43f   : > { %v6940_v55 = vadd.f32 %v6939_v21, %v6938_v18  ;;  %v11483_v14 = vpop.f32.mrb[38].mxu0 }
 0x440   : > { %3596 = vmatmul.mubr.f32.gmra.mrb[132].mxu0 %v3267_v43  ;;  %v8521_v60 = vpop.f32.mrb[39].mxu0 }
 0x441   : > { %v11486_v13 = vadd.f32 %v6940_v55, %v11432_v63  ;;  %v6941_v37 = vpop.f32.mrb[26].mxu1  ;;  %9453 = vmatpush3.bf16.msra.mxu0 %v10901_v11  ;;  %3600 = vmatprep.mubr.f32.mxu0 %v3275_v34  ;;  %v3281_v55 = vld [vmem:[#allocation4 + $0x6e8] sm:$0xff] }
 0x442   : > { %v6942_v59 = vpop.f32.mrb[27].mxu1  ;;  %9455 = vmatprep.subr.bf16.mxu0 %v10908_v25  ;;  %v3289_v34 = vld [vmem:[#allocation4 + $0x728] sm:$0xff] }
 0x443   : > { %v6943_v20 = vadd.f32 %v6942_v59, %v6941_v37  ;;  %v11490_v35 = vpop.f32.mrb[40].mxu0  ;;  %v3296_v59 = vld [vmem:[#allocation4 + $0x760] sm:$0xff] }
 0x444   : > { %3601 = vmatmul.mubr.f32.gmra.mrb[134].mxu0 %v3274_v30  ;;  %v8524_v18 = vpop.f32.mrb[41].mxu0 }
 0x445   : > { %v11493_v43 = vadd.f32 %v6943_v20, %v11440_v32  ;;  %v6944_v21 = vpop.f32.mrb[28].mxu1  ;;  %9457 = vmatpush3.bf16.msra.mxu0 %v10933_v52  ;;  %3605 = vmatprep.mubr.f32.mxu0 %v3282_v27  ;;  %v3288_v32 = vld [vmem:[#allocation4 + $0x720] sm:$0xff] }
 0x446   : > { %v6945_v63 = vpop.f32.mrb[29].mxu1  ;;  %9459 = vmatprep.subr.bf16.mxu0 %v10950_v49 }
 0x447   : > { %v6946_v60 = vadd.f32 %v6945_v63, %v6944_v21  ;;  %v11497_v2 = vpop.f32.mrb[42].mxu0  ;;  %v3295_v21 = vld [vmem:[#allocation4 + $0x758] sm:$0xff] }
 0x448   : > { %3606 = vmatmul.mubr.f32.gmra.mrb[136].mxu0 %v3281_v55  ;;  %v8527_v37 = vpop.f32.mrb[43].mxu0 }
 0x449   : > { %v11500_v30 = vadd.f32 %v6946_v60, %v11447_v15  ;;  %9461 = vmatpush3.bf16.msra.mxu0 %v10966_v48  ;;  %3610 = vmatprep.mubr.f32.mxu0 %v3289_v34  ;;  %v3303_v15 = vld [vmem:[#allocation4 + $0x798] sm:$0x1]  ;;  %v3302_v37 = vld [vmem:[#allocation4 + $0x790] sm:$0x1] }
 0x44a   : > { %9463 = vmatprep.subr.bf16.mxu0 %v10981_v57 }
 0x44b   : > { %v11504_v27 = vpop.f32.mrb[44].mxu0 }
 0x44c   : > { %3611 = vmatmul.mubr.f32.gmra.mrb[138].mxu0 %v3288_v32  ;;  %v8530_v20 = vpop.f32.mrb[45].mxu0 }
 0x44d   : > { %v6979_v18 = vpop.f32.mrb[30].mxu1  ;;  %9465 = vmatpush3.bf16.msra.mxu0 %v11005_v6  ;;  %3615 = vmatprep.mubr.f32.mxu0 %v3296_v59  ;;  %v3848_v20 = vld [vmem:[#allocation4 + $0x7b0] sm:$0xff] }
 0x44e   : > { %v6980_v55 = vpop.f32.mrb[31].mxu1  ;;  %9467 = vmatprep.subr.bf16.mxu0 %v11012_v45 }
 0x44f   : > { %v6981_v63 = vadd.f32 %v6980_v55, %v6979_v18 }
 0x450   : > { %3616 = vmatmul.mubr.f32.gmra.mrb[140].mxu0 %v3295_v21 }
 0x451   : > { %v1244_v34 = vadd.f32 %v6981_v63, %v11456_v5  ;;  %v6982_v60 = vpop.f32.mrb[32].mxu1  ;;  %9469 = vmatpush3.bf16.msra.mxu0 %v11036_v19  ;;  %3620 = vmatprep.mubr.f32.mxu0 %v3303_v15 }
 0x452   : > { %v6983_v32 = vpop.f32.mrb[33].mxu1  ;;  %9471 = vmatprep.subr.bf16.mxu0 %v11045_v26 }
 0x453   : > { %v11512_v59 = vadd.f32 %v11378_v46, %v1244_v34  ;;  %v6984_v10 = vadd.f32 %v6983_v32, %v6982_v60  ;;  %v3855_v34 = vld [vmem:[#allocation4 + $0x7e8] sm:$0xff] }
 0x454   : > { %3621 = vmatmul.mubr.f32.gmra.mrb[142].mxu0 %v3302_v37 }
 0x455   : > { %v1249_v56 = vadd.f32 %v6984_v10, %v11465_v61  ;;  %v6985_v18 = vpop.f32.mrb[34].mxu1  ;;  %9473 = vmatpush3.bf16.msra.mxu0 %v11067_v50  ;;  %3981 = vmatprep.mubr.f32.mxu0 %v3848_v20  ;;  %v3847_v10 = vld [vmem:[#allocation4 + $0x7a8] sm:$0xff]  ;;  %v3862_v20 = vld [vmem:[#allocation4 + $0x820] sm:$0xff] }
 0x456   : > { %v6986_v5 = vpop.f32.mrb[35].mxu1  ;;  %9475 = vmatprep.subr.bf16.mxu0 %v11076_v51 }
 0x457   : > { %v11518_v21 = vadd.f32 %v11382_v16, %v1249_v56  ;;  %v6987_v55 = vadd.f32 %v6986_v5, %v6985_v18 }
 0x459   : > { %v1254_v46 = vadd.f32 %v6987_v55, %v11472_v38  ;;  %v6988_v63 = vpop.f32.mrb[36].mxu1  ;;  %9477 = vmatpush3.bf16.msra.mxu0 %v11094_v24  ;;  %v3854_v38 = vld [vmem:[#allocation4 + $0x7e0] sm:$0xff] }
 0x45a   : > { %v6989_v61 = vpop.f32.mrb[37].mxu1  ;;  %9479 = vmatprep.subr.bf16.mxu0 %v10876_v40 }
 0x45b   : > { %v11526_v60 = vadd.f32 %v11386_v31, %v1254_v46  ;;  %v6990_v37 = vadd.f32 %v6989_v61, %v6988_v63  ;;  %v3861_v46 = vld [vmem:[#allocation4 + $0x818] sm:$0xff]  ;;  %v12792_v31 = vld [vmem:[#allocation51_spill] sm:$0xff] }
 0x45c   : > { %3982 = vmatmul.mubr.f32.vlgmr.msra.gmra.mrb[144].mxu0 %v3847_v10  ;;  %v3869_v10 = vld [vmem:[#allocation4 + $0x858] sm:$0xff] }
 0x45d   : > { %v1259_v56 = vadd.f32 %v6990_v37, %v11479_v44  ;;  %v6991_v16 = vpop.f32.mrb[38].mxu1  ;;  %9481 = vmatpush3.bf16.msra.mxu0 %v10893_v4  ;;  %3986 = vmatprep.mubr.f32.mxu0 %v3855_v34 }
 0x45e   : > { %v6992_v32 = vpop.f32.mrb[39].mxu1  ;;  %9483 = vmatprep.subr.bf16.mxu0 %v10903_v22 }
 0x45f   : > { %v11532_v18 = vadd.f32 %v11390_v8, %v1259_v56  ;;  %v6993_v5 = vadd.f32 %v6992_v32, %v6991_v16  ;;  %v3876_v16 = vld [vmem:[#allocation4 + $0x890] sm:$0xff] }
 0x460   : > { %3987 = vmatmul.mubr.f32.gmra.mrb[146].mxu0 %v3854_v38 }
 0x461   : > { %v1264_v55 = vadd.f32 %v6993_v5, %v11486_v13  ;;  %v6994_v44 = vpop.f32.mrb[40].mxu1  ;;  %9485 = vmatpush3.bf16.msra.mxu0 %v10926_v17  ;;  %3991 = vmatprep.mubr.f32.mxu0 %v3862_v20  ;;  %v3868_v13 = vld [vmem:[#allocation4 + $0x850] sm:$0xff]  ;;  %v3883_v5 = vld [vmem:[#allocation4 + $0x8c8] sm:$0xff] }
 0x462   : > { %v6995_v63 = vpop.f32.mrb[41].mxu1  ;;  %9487 = vmatprep.subr.bf16.mxu0 %v10935_v0 }
 0x463   : > { %v11540_v61 = vadd.f32 %v11394_v29, %v1264_v55  ;;  %v6996_v8 = vadd.f32 %v6995_v63, %v6994_v44  ;;  %v12786_v55 = vld [vmem:[#allocation33_spill] sm:$0xff]  ;;  %v3882_v63 = vld [vmem:[#allocation4 + $0x8c0] sm:$0xff] }
 0x464   : > { %3992 = vmatmul.mubr.f32.gmra.mrb[148].mxu0 %v3861_v46  ;;  %v12787_v46 = vld [vmem:[#allocation28_spill] sm:$0xff] }
 0x465   : > { %v1269_v34 = vadd.f32 %v6996_v8, %v11493_v43  ;;  %v6997_v37 = vpop.f32.mrb[42].mxu1  ;;  %9489 = vmatpush3.bf16.msra.mxu0 %v10959_v1  ;;  %3996 = vmatprep.mubr.f32.mxu0 %v3869_v10  ;;  %v3875_v43 = vld [vmem:[#allocation4 + $0x888] sm:$0xff] }
 0x466   : > { %v6998_v56 = vpop.f32.mrb[43].mxu1  ;;  %9491 = vmatprep.subr.bf16.mxu0 %v10968_v23  ;;  %v12788_v8 = vld [vmem:[#allocation12_spill] sm:$0xff] }
 0x467   : > { %v11546_v38 = vadd.f32 %v11398_v39, %v1269_v34  ;;  %v6999_v32 = vadd.f32 %v6998_v56, %v6997_v37  ;;  %v12789_v37 = vld [vmem:[#allocation34_spill] sm:$0xff] }
 0x468   : > { %3997 = vmatmul.mubr.f32.gmra.mrb[150].mxu0 %v3868_v13 }
 0x469   : > { %v1274_v20 = vadd.f32 %v6999_v32, %v11500_v30  ;;  %9493 = vmatpush3.bf16.msra.mxu0 %v10990_v36  ;;  %4001 = vmatprep.mubr.f32.mxu0 %v3876_v16  ;;  %v3890_v30 = vld [vmem:[#allocation4 + $0x900] sm:$0x1]  ;;  %v12790_v16 = vld [vmem:[#allocation13_spill] sm:$0xff] }
 0x46a   : > { %9495 = vmatprep.subr.bf16.mxu0 %v10997_v7  ;;  %v3889_v32 = vld [vmem:[#allocation4 + $0x8f8] sm:$0x1] }
 0x46b   : > { %v11554_v44 = vadd.f32 %v12786_v55, %v1274_v20  ;;  %v3850_v55 = vld [vmem:[#allocation4 + $0x7c0] sm:$0xff] }
 0x46c   : > { %4002 = vmatmul.mubr.f32.gmra.mrb[152].mxu0 %v3875_v43  ;;  %v12791_v43 = vld [vmem:[#allocation18_spill] sm:$0xff] }
 0x46d   : > { %v7041_v39 = vpop.f32.mrb[44].mxu1  ;;  %9497 = vmatpush3.bf16.msra.mxu0 %v12787_v46  ;;  %4006 = vmatprep.mubr.f32.mxu0 %v3883_v5 }
 0x46e   : > { %v7042_v10 = vpop.f32.mrb[45].mxu1  ;;  %9499 = vmatprep.subr.bf16.mxu0 %v12788_v8 }
 0x46f   : > { %v7043_v34 = vadd.f32 %v7042_v10, %v7041_v39  ;;  %v12793_v10 = vld [vmem:[#allocation19_spill] sm:$0xff] }
 0x470   : > { %4007 = vmatmul.mubr.f32.gmra.mrb[154].mxu0 %v3882_v63 }
 0x471   : > { %v1627_v13 = vadd.f32 %v12789_v37, %v7043_v34  ;;  %v7044_v56 = vpop.f32.mrb[46].mxu1  ;;  %9501 = vmatpush3.bf16.msra.mxu0 %v12790_v16  ;;  %4011 = vmatprep.mubr.f32.mxu0 %v3890_v30  ;;  %v12794_v30 = vld [vmem:[#allocation22_spill] sm:$0xff]  ;;  %v12795_v16 = vld [vmem:[#allocation52_spill] sm:$0xff] }
 0x472   : > { %v7045_v20 = vpop.f32.mrb[47].mxu1  ;;  %9503 = vmatprep.subr.bf16.mxu0 %v12791_v43 }
 0x473   : > { %v7046_v29 = vadd.f32 %v7045_v20, %v7044_v56  ;;  %v1727_v5 = vadd.f32 %v11459_v3, %v1627_v13  ;;  %v12796_v56 = vld [vmem:[#allocation23_spill] sm:$0xff]  ;;  %v3849_v3 = vld [vmem:[#allocation4 + $0x7b8] sm:$0xff] }
 0x474   : > { %4012 = vmatmul.mubr.f32.gmra.mrb[156].mxu0 %v3889_v32  ;;  %v12797_v32 = vmov 0.0|0.0  }
 0x475   : > { %v1632_v15 = vadd.f32 %v12792_v31, %v7046_v29  ;;  %v11564_v39 = vadd.f32 %v11462_v47, %v1727_v5  ;;  %v7047_v63 = vpop.f32.mrb[48].mxu1  ;;  %9505 = vmatpush3.bf16.msra.mxu0 %v12793_v10  ;;  %4081 = vmatprep.mubr.f32.mxu0 %v3850_v55  ;;  %v3857_v31 = vld [vmem:[#allocation4 + $0x7f8] sm:$0xff]  ;;  %v12798_v55 = vld [vmem:[#allocation64_spill] sm:$0xff] }
 0x476   : > { %v7048_v34 = vpop.f32.mrb[49].mxu1  ;;  %9507 = vmatprep.subr.bf16.mxu0 %v12794_v30  ;;  %v3856_v5 = vld [vmem:[#allocation4 + $0x7f0] sm:$0xff]  ;;  %v3878_v30 = vld [vmem:[#allocation4 + $0x8a0] sm:$0xff] }
 0x477   : > { %v7049_v37 = vadd.f32 %v7048_v34, %v7047_v63 }
 0x479   : > { %v1637_v43 = vadd.f32 %v12795_v16, %v7049_v37  ;;  %v7050_v8 = vpop.f32.mrb[50].mxu1  ;;  %9509 = vmatpush3.bf16.msra.mxu0 %v12796_v56  ;;  %v3864_v16 = vld [vmem:[#allocation4 + $0x830] sm:$0xff] }
 0x47a   : > { %v7051_v13 = vpop.f32.mrb[51].mxu1  ;;  %9542 = vmatprep.subr.bf16.mxu0 %v12797_v32  ;;  %v3863_v32 = vld [vmem:[#allocation4 + $0x828] sm:$0xff] }
 0x47b   : > { %v7052_v47 = vadd.f32 %v7051_v13, %v7050_v8 }
 0x47c   : > { %4082 = vmatmul.mubr.f32.vlgmr.msra.gmra.mrb[158].mxu0 %v3849_v3  ;;  %v3871_v3 = vld [vmem:[#allocation4 + $0x868] sm:$0xff] }
 0x47d   : > { %v1642_v29 = vadd.f32 %v11429_v12, %v7052_v47  ;;  %v7053_v20 = vpop.f32.mrb[52].mxu1  ;;  %9544 = vmatpush3.bf16.msra.mxu0 %v12798_v55  ;;  %4086 = vmatprep.mubr.f32.mxu0 %v3857_v31  ;;  %v3870_v31 = vld [vmem:[#allocation4 + $0x860] sm:$0xff] }
 0x47e   : > { %v7054_v63 = vpop.f32.mrb[53].mxu1  ;;  %9546 = vmatprep.subr.bf16.mxu0 %v10865_v42 }
 0x47f   : > { %v7055_v34 = vadd.f32 %v7054_v63, %v7053_v20 }
 0x480   : > { %4087 = vmatmul.mubr.f32.gmra.mrb[160].mxu0 %v3856_v5  ;;  %v3885_v5 = vld [vmem:[#allocation4 + $0x8d8] sm:$0xff] }
 0x481   : > { %v1647_v37 = vadd.f32 %v11435_v54, %v7055_v34  ;;  %v7056_v56 = vpop.f32.mrb[54].mxu1  ;;  %4091 = vmatprep.mubr.f32.mxu0 %v3864_v16  ;;  %v3877_v54 = vld [vmem:[#allocation4 + $0x898] sm:$0xff]  ;;  %v3892_v16 = vld [vmem:[#allocation4 + $0x910] sm:$0x1] }
 0x482   : > { %v7057_v8 = vpop.f32.mrb[55].mxu1 }
 0x483   : > { %v7058_v13 = vadd.f32 %v7057_v8, %v7056_v56  ;;  %v3884_v56 = vld [vmem:[#allocation4 + $0x8d0] sm:$0xff] }
 0x484   : > { %4092 = vmatmul.mubr.f32.gmra.mrb[162].mxu0 %v3863_v32 }
 0x485   : > { %v1652_v12 = vadd.f32 %v11444_v53, %v7058_v13  ;;  %v7059_v47 = vpop.f32.mrb[56].mxu1  ;;  %4096 = vmatprep.mubr.f32.mxu0 %v3871_v3  ;;  %v3891_v3 = vld [vmem:[#allocation4 + $0x908] sm:$0x1] }
 0x486   : > { %v7060_v55 = vpop.f32.mrb[57].mxu1 }
 0x487   : > { %v7061_v10 = vadd.f32 %v7060_v55, %v7059_v47 }
 0x488   : > { %4097 = vmatmul.mubr.f32.gmra.mrb[164].mxu0 %v3870_v31  ;;  %v12799_v31 = vmov 0.0  }
 0x489   : > { %v11577_v20 = vadd.f32 %v11450_v58, %v7061_v10  ;;  %4101 = vmatprep.mubr.f32.mxu0 %v3878_v30 }
 0x48c   : > { %4102 = vmatmul.mubr.f32.gmra.mrb[166].mxu0 %v3877_v54  ;;  %v3853_v54 = vld [vmem:[#allocation4 + $0x7d8] sm:$0xff] }
 0x48d   : > { %v7150_v63 = vpop.f32.mrb[58].mxu1  ;;  %4106 = vmatprep.mubr.f32.mxu0 %v3885_v5 }
 0x48e   : > { %v7151_v32 = vpop.f32.mrb[59].mxu1 }
 0x48f   : > { %v7152_v53 = vadd.f32 %v7151_v32, %v7150_v63 }
 0x490   : > { %4107 = vmatmul.mubr.f32.gmra.mrb[168].mxu0 %v3884_v56 }
 0x491   : > { %v1732_v34 = vadd.f32 %v7152_v53, %v1632_v15  ;;  %v7153_v8 = vpop.f32.mrb[60].mxu1  ;;  %4111 = vmatprep.mubr.f32.mxu0 %v3892_v16 }
 0x492   : > { %v7154_v55 = vpop.f32.mrb[61].mxu1 }
 0x493   : > { %v1832_v13 = vadd.f32 %v11469_v33, %v1732_v34  ;;  %v7155_v58 = vadd.f32 %v7154_v55, %v7153_v8  ;;  %v9962_v34 = vld [vmem:[#allocation6 + $0x8] sm:$0xff]   ;;  %v3867_v8 = vld [vmem:[#allocation4 + $0x848] sm:$0xff] }
 0x494   : > { %4112 = vmatmul.mubr.f32.gmra.mrb[170].mxu0 %v3891_v3 }
 0x495   : > { %v1860_v10 = vpack.c.bf16 %v1832_v13, %v11564_v39  ;;  %v1737_v30 = vadd.f32 %v7155_v58, %v1637_v43  ;;  %v7156_v47 = vpop.f32.mrb[62].mxu1  ;;  %8690 = vmatprep.mubr.msk.f32.mxu0 %vm10138_vm0, %v12799_v31  ;;  %v3860_v43 = vld [vmem:[#allocation4 + $0x810] sm:$0xff]  ;;  %v9963_v58 = vld [vmem:[#allocation6 + $0x10] sm:$0xff]  }
 0x496   : > { %v7157_v5 = vpop.f32.mrb[63].mxu1 }
 0x497   : > { %v1837_v63 = vadd.f32 %v11476_v41, %v1737_v30  ;;  %v7158_v15 = vadd.f32 %v7157_v5, %v7156_v47  ;;  %8539 = vmatprep.mubr.msk.bf16.mxu1 %vm433_vm1, %v1860_v10  ;;  %v3874_v10 = vld [vmem:[#allocation4 + $0x880] sm:$0xff]  ;;  %v3881_v5 = vld [vmem:[#allocation4 + $0x8b8] sm:$0xff] }
 0x498   : > { %8691 = vmatmul.mubr.msk.f32.vlgmr.msra.gmra.mrb[172].mxu0 %vm955_vm4, %v3853_v54  ;;  %v9964_v54 = vld [vmem:[#allocation6 + $0x18] sm:$0xff]  }
 0x499   : > { %v1742_v56 = vadd.f32 %v7158_v15, %v1642_v29  ;;  %9548 = vmatpush3.bf16.msra.mxu0 %v10874_v9  ;;  %v7159_v33 = vpop.f32.mrb[64].mxu1  ;;  %8693 = vmatprep.mubr.msk.f32.mxu0 %vm10138_vm0, %v12799_v31  ;;  %v12801_v15 = vld [vmem:[#allocation29_spill] sm:$0xff] }
 0x49a   : > { %9550 = vmatprep.subr.bf16.mxu0 %v10883_v62  ;;  %v7160_v39 = vpop.f32.mrb[65].mxu1 }
 0x49b   : > { %v1842_v32 = vadd.f32 %v11483_v14, %v1742_v56  ;;  %v7161_v16 = vadd.f32 %v7160_v39, %v7159_v33  ;;  %v3895_v56 = vld [vmem:[#allocation4 + $0x928] sm:$0x1]  ;;  %v4439_v33 = vld [vmem:[#allocation4 + $0x938] sm:$0xff] }
 0x49c   : > { %8694 = vmatmul.mubr.msk.f32.gmra.mrb[174].mxu0 %vm955_vm4, %v3860_v43  ;;  %v12804_v43 = vpack.c.bf16 %v11546_v38, %v11540_v61  ;;  %v12805_v39 = vld [vmem:[#allocation14_spill] sm:$0xff]  ;;  %v4445_v61 = vld [vmem:[#allocation4 + $0x968] sm:$0xff] }
 0x49d   : > { %v1861_v41 = vpack.c.bf16 %v1842_v32, %v1837_v63  ;;  %v1747_v53 = vadd.f32 %v7161_v16, %v1647_v37  ;;  %9552 = vmatpush3.bf16.msra.mxu0 %v10901_v11  ;;  %v7162_v29 = vpop.f32.mrb[66].mxu1  ;;  %8696 = vmatprep.mubr.msk.f32.mxu0 %vm10138_vm0, %v12799_v31  ;;  %v4438_v32 = vld [vmem:[#allocation4 + $0x930] sm:$0xff]  ;;  %v4453_v38 = vld [vmem:[#allocation4 + $0x9a8] sm:$0xff] }
 0x49e   : > { %9554 = vmatprep.subr.bf16.mxu0 %v10908_v25  ;;  %v7163_v3 = vpop.f32.mrb[67].mxu1  ;;  %v4446_v16 = vld [vmem:[#allocation4 + $0x970] sm:$0xff] }
 0x49f   : > { %v1847_v55 = vadd.f32 %v11490_v35, %v1747_v53  ;;  %v7164_v13 = vadd.f32 %v7163_v3, %v7162_v29  ;;  %8540 = vmatmul.mubr.msk.bf16.vlgmr.msra.gmra.mrb[72].mxu1 %vm433_vm1, %v1861_v41  ;;  %v12806_v41 = vld [vmem:[#allocation15_spill] sm:$0xff]  ;;  %v12808_v53 = vld [vmem:[#allocation21_spill] sm:$0xff] }
 0x4a0   : > { %8548 = vmatpush3.bf16.msra.mxu1 %v11437_v28  ;;  %8697 = vmatmul.mubr.msk.f32.gmra.mrb[176].mxu0 %vm955_vm4, %v3867_v8  ;;  %v2079_v29 = vld [vmem:[#allocation4 + $0x338] sm:$0xff]  ;;  %v4460_v8 = vld [vmem:[#allocation4 + $0x9e0] sm:$0xff] }
 0x4a1   : > { %v1752_v14 = vadd.f32 %v7164_v13, %v1652_v12  ;;  %9556 = vmatpush3.bf16.msra.mxu0 %v10933_v52  ;;  %v7165_v37 = vpop.f32.mrb[68].mxu1  ;;  %8549 = vmatprep.subr.bf16.mxu1 %v9962_v34  ;;  %v12810_v3 = vld [vmem:[#allocation25_spill] sm:$0xff] }
 0x4a2   : > { %9558 = vmatprep.subr.bf16.mxu0 %v10950_v49  ;;  %v7166_v30 = vpop.f32.mrb[69].mxu1  ;;  %8699 = vmatprep.mubr.msk.f32.mxu0 %vm10138_vm0, %v12799_v31  ;;  %v4459_v13 = vld [vmem:[#allocation4 + $0x9d8] sm:$0xff] }
 0x4a3   : > { %v1852_v35 = vadd.f32 %v11497_v2, %v1752_v14  ;;  %v7167_v47 = vadd.f32 %v7166_v30, %v7165_v37  ;;  %v4467_v14 = vld [vmem:[#allocation4 + $0xa18] sm:$0xff]  ;;  %v12812_v37 = vld [vmem:[#allocation32_spill] sm:$0xff] }
 0x4a4   : > { %8550 = vmatpush3.bf16.msra.mxu1 %v9962_v34  ;;  %8700 = vmatmul.mubr.msk.f32.gmra.mrb[178].mxu0 %vm955_vm4, %v3874_v10  ;;  %v12809_v34 = vld [vmem:[#allocation24_spill] sm:$0xff] }
 0x4a5   : > { %v1862_v28 = vpack.c.bf16 %v1852_v35, %v1847_v55  ;;  %v1757_v12 = vadd.f32 %v7167_v47, %v11577_v20  ;;  %9560 = vmatpush3.bf16.msra.mxu0 %v10966_v48  ;;  %8551 = vmatprep.subr.bf16.mxu1 %v9963_v58  ;;  %v3888_v20 = vld [vmem:[#allocation4 + $0x8f0] sm:$0xff]  ;;  %v12811_v55 = vld [vmem:[#allocation31_spill] sm:$0xff]  ;;  %v12815_v47 = vld [vmem:[#allocation26_spill] sm:$0xff] }
 0x4a6   : > { %9562 = vmatprep.subr.bf16.mxu0 %v10981_v57  ;;  %8702 = vmatprep.mubr.msk.f32.mxu0 %vm10138_vm0, %v12799_v31  ;;  %v4466_v10 = vld [vmem:[#allocation4 + $0xa10] sm:$0xff] }
 0x4a7   : > { %v1857_v63 = vadd.f32 %v11504_v27, %v1757_v12  ;;  %8543 = vmatprep.mubr.msk.bf16.mxu1 %vm433_vm1, %v1862_v28  ;;  %v12800_v27 = vpack.c.bf16 %v11518_v21, %v11512_v59  ;;  %v12802_v59 = vpack.c.bf16 %v11532_v18, %v11526_v60  ;;  %v12803_v21 = vld [vmem:[#allocation30_spill] sm:$0xff]  ;;  %v1380_v60 = vpack.c.bf16 %v11554_v44, %v11554_v44  ;;  %v12807_v18 = vld [vmem:[#allocation20_spill] sm:$0xff]  ;;  %v12814_v35 = vld [vmem:[#allocation17_spill] sm:$0xff] }
 0x4a8   : > { %8552 = vmatpush3.bf16.msra.mxu1 %v9963_v58  ;;  %8703 = vmatmul.mubr.msk.f32.gmra.mrb[180].mxu0 %vm955_vm4, %v3881_v5  ;;  %v4452_v44 = vld [vmem:[#allocation4 + $0x9a0] sm:$0xff]  ;;  %v12813_v58 = vld [vmem:[#allocation16_spill] sm:$0xff]  ;;  %v4481_v12 = vld [vmem:[#allocation4 + $0xa88] sm:$0x1] }
 0x4a9   : > { %v1863_v2 = vpack.c.bf16 %v1857_v63, %v1857_v63  ;;  %9564 = vmatpush3.bf16.msra.mxu0 %v11005_v6  ;;  %8553 = vmatprep.subr.bf16.mxu1 %v9964_v54  ;;  %v4474_v30 = vld [vmem:[#allocation4 + $0xa50] sm:$0xff]  ;;  %v4473_v28 = vld [vmem:[#allocation4 + $0xa48] sm:$0xff] }
 0x4aa   : > { %9566 = vmatprep.subr.bf16.mxu0 %v11012_v45  ;;  %8705 = vmatprep.mubr.msk.f32.mxu0 %vm10138_vm0, %v12799_v31  ;;  %v12817_v5 = vld [vmem:[#allocation49_spill] sm:$0xff]  ;;  %v9965_v63 = vld [vmem:[#allocation6 + $0x40] sm:$0xff]  }
 0x4ab   : > { %8544 = vmatmul.mubr.msk.bf16.gmra.mrb[76].mxu1 %vm433_vm1, %v1863_v2  ;;  %v4480_v2 = vld [vmem:[#allocation4 + $0xa80] sm:$0x1] }
 0x4ac   : > { %8554 = vmatpush3.bf16.msra.mxu1 %v9964_v54  ;;  %8555 = vmatprep.mubr.msk.bf16.mxu1 %vm433_vm1, %v12800_v27  ;;  %v12816_v54 = vld [vmem:[#allocation27_spill] sm:$0xff]  ;;  %v12818_v27 = vld [vmem:[#allocation50_spill] sm:$0xff] }
 0x4ad   : > { %9214 = vmatprep.subr.bf16.mxu1 %v12801_v15  ;;  %9568 = vmatpush3.bf16.msra.mxu0 %v11036_v19 }
 0x4ae   : > { %9570 = vmatprep.subr.bf16.mxu0 %v11045_v26  ;;  %8706 = vmatmul.mubr.msk.f32.gmra.mrb[182].mxu0 %vm955_vm4, %v3888_v20  ;;  %v4443_v20 = vld [vmem:[#allocation4 + $0x958] sm:$0xff] }
 0x4af   : > { %8708 = vmatprep.mubr.msk.f32.mxu0 %vm10138_vm0, %v12799_v31 }
 0x4b1   : > { %9572 = vmatpush3.bf16.msra.mxu0 %v11067_v50 }
 0x4b2   : > { %9574 = vmatprep.subr.bf16.mxu0 %v11076_v51  ;;  %8709 = vmatmul.mubr.msk.f32.gmra.mrb[184].mxu0 %vm955_vm4, %v3895_v56  ;;  %v2078_v56 = vld [vmem:[#allocation4 + $0x330] sm:$0xff] }
 0x4b3   : > { %8556 = vmatmul.mubr.msk.bf16.vlgmr.msra.gmra.mrb[72].mxu1 %vm433_vm1, %v12802_v59  ;;  %4572 = vmatprep.mubr.f32.mxu0 %v4439_v33  ;;  %v2086_v33 = vld [vmem:[#allocation4 + $0x370] sm:$0xff] }
 0x4b4   : > { %9216 = vmatpush3.bf16.msra.mxu1 %v12803_v21  ;;  %8559 = vmatprep.mubr.msk.bf16.mxu1 %vm433_vm1, %v12804_v43  ;;  %v9966_v59 = vld [vmem:[#allocation6 + $0x48] sm:$0xff]   ;;  %v2085_v43 = vld [vmem:[#allocation4 + $0x368] sm:$0xff] }
 0x4b5   : > { %9218 = vmatprep.subr.bf16.mxu1 %v12805_v39  ;;  %9576 = vmatpush3.bf16.msra.mxu0 %v11094_v24 }
 0x4b6   : > { %9610 = vmatprep.subr.bf16.mxu0 %v12801_v15 }
 0x4b8   : > { %9220 = vmatpush3.bf16.msra.mxu1 %v12806_v41  ;;  %4573 = vmatmul.mubr.f32.vlgmr.msra.gmra.mrb[186].mxu0 %v4438_v32  ;;  %v4442_v32 = vld [vmem:[#allocation4 + $0x950] sm:$0xff] }
 0x4b9   : > { %9222 = vmatprep.subr.bf16.mxu1 %v12807_v18  ;;  %9612 = vmatpush3.bf16.msra.mxu0 %v12803_v21 }
 0x4ba   : > { %9614 = vmatprep.subr.bf16.mxu0 %v12805_v39  ;;  %4577 = vmatprep.mubr.f32.mxu0 %v4446_v16  ;;  %v2093_v16 = vld [vmem:[#allocation4 + $0x3a8] sm:$0xff] }
 0x4bb   : > { %8560 = vmatmul.mubr.msk.bf16.gmra.mrb[80].mxu1 %vm433_vm1, %v1380_v60  ;;  %v9967_v60 = vld [vmem:[#allocation6 + $0x50] sm:$0xff]  }
 0x4bc   : > { %9224 = vmatpush3.bf16.msra.mxu1 %v12808_v53  ;;  %4578 = vmatmul.mubr.f32.gmra.mrb[188].mxu0 %v4445_v61  ;;  %v2092_v61 = vld [vmem:[#allocation4 + $0x3a0] sm:$0xff] }
 0x4bd   : > { %9226 = vmatprep.subr.bf16.mxu1 %v12809_v34  ;;  %9616 = vmatpush3.bf16.msra.mxu0 %v12806_v41 }
 0x4be   : > { %9618 = vmatprep.subr.bf16.mxu0 %v12807_v18  ;;  %4582 = vmatprep.mubr.f32.mxu0 %v4453_v38  ;;  %v4450_v38 = vld [vmem:[#allocation4 + $0x990] sm:$0xff] }
 0x4bf   : > { %2408 = vmatprep.mubr.f32.mxu1 %v2079_v29  ;;  %v2100_v29 = vld [vmem:[#allocation4 + $0x3e0] sm:$0xff] }
 0x4c0   : > { %9228 = vmatpush3.bf16.msra.mxu1 %v12810_v3  ;;  %4583 = vmatmul.mubr.f32.gmra.mrb[190].mxu0 %v4452_v44  ;;  %v9968_v44 = vld [vmem:[#allocation6 + $0x58] sm:$0xff]  }
 0x4c1   : > { %9230 = vmatprep.subr.bf16.mxu1 %v12811_v55  ;;  %9620 = vmatpush3.bf16.msra.mxu0 %v12808_v53 }
 0x4c2   : > { %9622 = vmatprep.subr.bf16.mxu0 %v12809_v34  ;;  %4587 = vmatprep.mubr.f32.mxu0 %v4460_v8  ;;  %v4449_v8 = vld [vmem:[#allocation4 + $0x988] sm:$0xff] }
 0x4c4   : > { %9232 = vmatpush3.bf16.msra.mxu1 %v12812_v37  ;;  %4588 = vmatmul.mubr.f32.gmra.mrb[192].mxu0 %v4459_v13  ;;  %v2099_v13 = vld [vmem:[#allocation4 + $0x3d8] sm:$0xff] }
 0x4c5   : > { %9234 = vmatprep.subr.bf16.mxu1 %v12813_v58  ;;  %9624 = vmatpush3.bf16.msra.mxu0 %v12810_v3 }
 0x4c6   : > { %9626 = vmatprep.subr.bf16.mxu0 %v12811_v55  ;;  %4592 = vmatprep.mubr.f32.mxu0 %v4467_v14  ;;  %v4457_v14 = vld [vmem:[#allocation4 + $0x9c8] sm:$0xff] }
 0x4c8   : > { %9236 = vmatpush3.bf16.msra.mxu1 %v12814_v35  ;;  %4593 = vmatmul.mubr.f32.gmra.mrb[194].mxu0 %v4466_v10  ;;  %v2107_v10 = vld [vmem:[#allocation4 + $0x418] sm:$0xff] }
 0x4c9   : > { %9238 = vmatprep.subr.bf16.mxu1 %v12815_v47  ;;  %9628 = vmatpush3.bf16.msra.mxu0 %v12812_v37 }
 0x4ca   : > { %9630 = vmatprep.subr.bf16.mxu0 %v12813_v58  ;;  %4597 = vmatprep.mubr.f32.mxu0 %v4474_v30  ;;  %v4456_v30 = vld [vmem:[#allocation4 + $0x9c0] sm:$0xff] }
 0x4cc   : > { %9240 = vmatpush3.bf16.msra.mxu1 %v12816_v54  ;;  %4598 = vmatmul.mubr.f32.gmra.mrb[196].mxu0 %v4473_v28  ;;  %v2106_v28 = vld [vmem:[#allocation4 + $0x410] sm:$0xff] }
 0x4cd   : > { %9242 = vmatprep.subr.bf16.mxu1 %v12817_v5  ;;  %9632 = vmatpush3.bf16.msra.mxu0 %v12814_v35 }
 0x4ce   : > { %9634 = vmatprep.subr.bf16.mxu0 %v12815_v47  ;;  %4602 = vmatprep.mubr.f32.mxu0 %v4481_v12  ;;  %v4464_v12 = vld [vmem:[#allocation4 + $0xa00] sm:$0xff] }
 0x4d0   : > { %9244 = vmatpush3.bf16.msra.mxu1 %v12818_v27  ;;  %4603 = vmatmul.mubr.f32.gmra.mrb[198].mxu0 %v4480_v2  ;;  %v7225_v2 = vpop.f32.mrb[46].mxu0 }
 0x4d1   : > { %9636 = vmatpush3.bf16.msra.mxu0 %v12816_v54  ;;  %8588 = vmatprep.subr.bf16.mxu1 %v9965_v63 }
 0x4d2   : > { %9638 = vmatprep.subr.bf16.mxu0 %v12817_v5  ;;  %4772 = vmatprep.mubr.f32.mxu0 %v4443_v20  ;;  %v7226_v20 = vpop.f32.mrb[47].mxu0 }
 0x4d3   : > { %2409 = vmatmul.mubr.f32.vlgmr.msra.gmra.mrb[70].mxu1 %v2078_v56  ;;  %v4463_v56 = vld [vmem:[#allocation4 + $0x9f8] sm:$0xff] }
 0x4d4   : > { %8589 = vmatpush3.bf16.msra.mxu1 %v9965_v63  ;;  %2413 = vmatprep.mubr.f32.mxu1 %v2086_v33  ;;  %v2114_v63 = vld [vmem:[#allocation4 + $0x450] sm:$0xff]  ;;  %v11683_v33 = vadd.f32 %v7226_v20, %v7225_v2  ;;  %v4477_v2 = vld [vmem:[#allocation4 + $0xa68] sm:$0xff] }
 0x4d5   : > { %9640 = vmatpush3.bf16.msra.mxu0 %v12818_v27  ;;  %8590 = vmatprep.subr.bf16.mxu1 %v9966_v59 }
 0x4d6   : > { %9645 = vmatprep.subr.bf16.mxu0 %v10865_v42 }
 0x4d7   : > { %2414 = vmatmul.mubr.f32.gmra.mrb[84].mxu1 %v2085_v43  ;;  %v2113_v43 = vld [vmem:[#allocation4 + $0x448] sm:$0xff] }
 0x4d8   : > { %8591 = vmatpush3.bf16.msra.mxu1 %v9966_v59  ;;  %4773 = vmatmul.mubr.f32.vlgmr.msra.gmra.mrb[200].mxu0 %v4442_v32  ;;  %v7228_v59 = vpop.f32.mrb[48].mxu0  ;;  %v4471_v32 = vld [vmem:[#allocation4 + $0xa38] sm:$0xff] }
 0x4d9   : > { %9647 = vmatpush3.bf16.msra.mxu0 %v10874_v9  ;;  %2418 = vmatprep.mubr.f32.mxu1 %v2093_v16  ;;  %v7229_v16 = vpop.f32.mrb[49].mxu0 }
 0x4da   : > { %9649 = vmatprep.subr.bf16.mxu0 %v10883_v62  ;;  %8592 = vmatprep.subr.bf16.mxu1 %v9967_v60 }
 0x4db   : > { %2419 = vmatmul.mubr.f32.gmra.mrb[86].mxu1 %v2092_v61  ;;  %4777 = vmatprep.mubr.f32.mxu0 %v4450_v38  ;;  %v11686_v61 = vadd.f32 %v7229_v16, %v7228_v59  ;;  %v7231_v38 = vpop.f32.mrb[50].mxu0  ;;  %v4485_v59 = vld [vmem:[#allocation4 + $0xaa8] sm:$0x1] }
 0x4dc   : > { %8593 = vmatpush3.bf16.msra.mxu1 %v9967_v60  ;;  %2423 = vmatprep.mubr.f32.mxu1 %v2100_v29  ;;  %v2121_v60 = vld [vmem:[#allocation4 + $0x488] sm:$0x1]  ;;  %v7232_v29 = vpop.f32.mrb[51].mxu0 }
 0x4dd   : > { %9651 = vmatpush3.bf16.msra.mxu0 %v10901_v11  ;;  %8594 = vmatprep.subr.bf16.mxu1 %v9968_v44 }
 0x4de   : > { %9653 = vmatprep.subr.bf16.mxu0 %v10908_v25  ;;  %4778 = vmatmul.mubr.f32.gmra.mrb[202].mxu0 %v4449_v8  ;;  %v11689_v8 = vadd.f32 %v7232_v29, %v7231_v38  ;;  %v4484_v38 = vld [vmem:[#allocation4 + $0xaa0] sm:$0x1] }
 0x4df   : > { %2424 = vmatmul.mubr.f32.gmra.mrb[88].mxu1 %v2099_v13  ;;  %4782 = vmatprep.mubr.f32.mxu0 %v4457_v14  ;;  %v7234_v13 = vpop.f32.mrb[52].mxu0  ;;  %v2120_v14 = vld [vmem:[#allocation4 + $0x480] sm:$0x1] }
 0x4e0   : > { %8595 = vmatpush3.bf16.msra.mxu1 %v9968_v44  ;;  %2428 = vmatprep.mubr.f32.mxu1 %v2107_v10  ;;  %v4470_v44 = vld [vmem:[#allocation4 + $0xa30] sm:$0xff] }
 0x4e1   : > { %9281 = vmatprep.subr.bf16.mxu1 %v10876_v40  ;;  %9655 = vmatpush3.bf16.msra.mxu0 %v10933_v52  ;;  %v4478_v10 = vld [vmem:[#allocation4 + $0xa70] sm:$0xff] }
 0x4e2   : > { %9657 = vmatprep.subr.bf16.mxu0 %v10950_v49  ;;  %4783 = vmatmul.mubr.f32.gmra.mrb[204].mxu0 %v4456_v30  ;;  %v7235_v30 = vpop.f32.mrb[53].mxu0 }
 0x4e3   : > { %2429 = vmatmul.mubr.f32.gmra.mrb[90].mxu1 %v2106_v28  ;;  %4787 = vmatprep.mubr.f32.mxu0 %v4464_v12  ;;  %v11692_v28 = vadd.f32 %v7235_v30, %v7234_v13  ;;  %v7237_v12 = vpop.f32.mrb[54].mxu0  ;;  %v5030_v13 = vld [vmem:[#allocation4 + $0xac0] sm:$0xff] }
 0x4e4   : > { %2433 = vmatprep.mubr.f32.mxu1 %v2114_v63  ;;  %v7238_v63 = vpop.f32.mrb[55].mxu0 }
 0x4e5   : > { %9659 = vmatpush3.bf16.msra.mxu0 %v10966_v48  ;;  %v11695_v20 = vadd.f32 %v7238_v63, %v7237_v12 }
 0x4e6   : > { %9661 = vmatprep.subr.bf16.mxu0 %v10981_v57  ;;  %4788 = vmatmul.mubr.f32.gmra.mrb[206].mxu0 %v4463_v56  ;;  %v7240_v56 = vpop.f32.mrb[56].mxu0 }
 0x4e7   : > { %2434 = vmatmul.mubr.f32.gmra.mrb[92].mxu1 %v2113_v43  ;;  %4792 = vmatprep.mubr.f32.mxu0 %v4471_v32  ;;  %v7241_v43 = vpop.f32.mrb[57].mxu0 }
 0x4e8   : > { %2438 = vmatprep.mubr.f32.mxu1 %v2121_v60  ;;  %v11698_v32 = vadd.f32 %v7241_v43, %v7240_v56  ;;  %v7243_v16 = vpop.f32.mrb[58].mxu0 }
 0x4e9   : > { %9663 = vmatpush3.bf16.msra.mxu0 %v11005_v6  ;;  %v7244_v60 = vpop.f32.mrb[59].mxu0 }
 0x4ea   : > { %9665 = vmatprep.subr.bf16.mxu0 %v11012_v45  ;;  %4793 = vmatmul.mubr.f32.gmra.mrb[208].mxu0 %v4470_v44  ;;  %v11701_v29 = vadd.f32 %v7244_v60, %v7243_v16  ;;  %v7278_v44 = vpop.f32.mrb[60].mxu0  ;;  %v5037_v60 = vld [vmem:[#allocation4 + $0xaf8] sm:$0xff] }
 0x4eb   : > { %2439 = vmatmul.mubr.f32.gmra.mrb[94].mxu1 %v2120_v14  ;;  %4797 = vmatprep.mubr.f32.mxu0 %v4478_v10  ;;  %v7279_v14 = vpop.f32.mrb[61].mxu0 }
 0x4ec   : > { %v11704_v10 = vadd.f32 %v7279_v14, %v7278_v44  ;;  %v7281_v30 = vpop.f32.mrb[62].mxu0  ;;  %v5044_v44 = vld [vmem:[#allocation4 + $0xb30] sm:$0xff]  ;;  %v5051_v14 = vld [vmem:[#allocation4 + $0xb68] sm:$0xff] }
 0x4ed   : > { %9667 = vmatpush3.bf16.msra.mxu0 %v11036_v19  ;;  %v7282_v12 = vpop.f32.mrb[63].mxu0 }
 0x4ee   : > { %9669 = vmatprep.subr.bf16.mxu0 %v11045_v26  ;;  %4798 = vmatmul.mubr.f32.gmra.mrb[210].mxu0 %v4477_v2  ;;  %v11707_v63 = vadd.f32 %v7282_v12, %v7281_v30  ;;  %v7284_v2 = vpop.f32.mrb[64].mxu0 }
 0x4ef   : > { %4802 = vmatprep.mubr.f32.mxu0 %v4485_v59  ;;  %v7285_v56 = vpop.f32.mrb[65].mxu0  ;;  %v5029_v59 = vld [vmem:[#allocation4 + $0xab8] sm:$0xff] }
 0x4f0   : > { %v11710_v43 = vadd.f32 %v7285_v56, %v7284_v2  ;;  %v7287_v16 = vpop.f32.mrb[66].mxu0  ;;  %v5050_v2 = vld [vmem:[#allocation4 + $0xb60] sm:$0xff] }
 0x4f1   : > { %9671 = vmatpush3.bf16.msra.mxu0 %v11067_v50  ;;  %v7288_v30 = vpop.f32.mrb[67].mxu0 }
 0x4f2   : > { %9673 = vmatprep.subr.bf16.mxu0 %v11076_v51  ;;  %4803 = vmatmul.mubr.f32.gmra.mrb[212].mxu0 %v4484_v38  ;;  %v5036_v38 = vld [vmem:[#allocation4 + $0xaf0] sm:$0xff]  ;;  %v7289_v12 = vadd.f32 %v7288_v30, %v7287_v16  ;;  %v7290_v56 = vpop.f32.mrb[68].mxu0 }
 0x4f3   : > { %5163 = vmatprep.mubr.f32.mxu0 %v5030_v13  ;;  %v5043_v13 = vld [vmem:[#allocation4 + $0xb28] sm:$0xff] }
 0x4f5   : > { %9675 = vmatpush3.bf16.msra.mxu0 %v11094_v24 }
 0x4f6   : > { %9677 = vmatprep.subr.bf16.mxu0 %v10876_v40 }
 0x4f8   : > { %5164 = vmatmul.mubr.f32.vlgmr.msra.gmra.mrb[214].mxu0 %v5029_v59  ;;  %v5058_v59 = vld [vmem:[#allocation4 + $0xba0] sm:$0xff] }
 0x4f9   : > { %9679 = vmatpush3.bf16.msra.mxu0 %v10893_v4  ;;  %5168 = vmatprep.mubr.f32.mxu0 %v5037_v60  ;;  %v7291_v60 = vpop.f32.mrb[69].mxu0 }
 0x4fa   : > { %9681 = vmatprep.subr.bf16.mxu0 %v10903_v22  ;;  %v7293_v40 = vpop.f32.mrb[70].mxu0 }
 0x4fc   : > { %5169 = vmatmul.mubr.f32.gmra.mrb[216].mxu0 %v5036_v38  ;;  %v7292_v38 = vadd.f32 %v7291_v60, %v7290_v56  ;;  %v12819_v56 = vld [vmem:[#allocation12_spill] sm:$0xff]  ;;  %v12820_v60 = vld [vmem:[#allocation13_spill] sm:$0xff] }
 0x4fd   : > { %9683 = vmatpush3.bf16.msra.mxu0 %v10926_v17  ;;  %5173 = vmatprep.mubr.f32.mxu0 %v5044_v44  ;;  %v7294_v44 = vpop.f32.mrb[71].mxu0 }
 0x4fe   : > { %9685 = vmatprep.subr.bf16.mxu0 %v10935_v0  ;;  %v5057_v0 = vld [vmem:[#allocation4 + $0xb98] sm:$0xff]  ;;  %v7295_v17 = vadd.f32 %v7294_v44, %v7293_v40  ;;  %v7296_v16 = vpop.f32.mrb[72].mxu0  ;;  %v5032_v44 = vld [vmem:[#allocation4 + $0xad0] sm:$0xff] }
 0x4ff   : > { %v12821_v40 = vld [vmem:[#allocation18_spill] sm:$0xff] }
 0x500   : > { %5174 = vmatmul.mubr.f32.gmra.mrb[218].mxu0 %v5043_v13  ;;  %v5065_v13 = vld [vmem:[#allocation4 + $0xbd8] sm:$0xff] }
 0x501   : > { %9687 = vmatpush3.bf16.msra.mxu0 %v10959_v1  ;;  %5178 = vmatprep.mubr.f32.mxu0 %v5051_v14  ;;  %v7297_v14 = vpop.f32.mrb[73].mxu0 }
 0x502   : > { %9689 = vmatprep.subr.bf16.mxu0 %v10968_v23  ;;  %v7298_v30 = vadd.f32 %v7297_v14, %v7296_v16  ;;  %v5064_v23 = vld [vmem:[#allocation4 + $0xbd0] sm:$0xff]  ;;  %v11729_v16 = vadd.f32 %v11704_v10, %v11683_v33  ;;  %v12825_v14 = vmov 0.0|0.0   ;;  %v5045_v33 = vld [vmem:[#allocation4 + $0xb38] sm:$0xff] }
 0x503   : > { %v5053_v10 = vld [vmem:[#allocation4 + $0xb78] sm:$0xff] }
 0x504   : > { %5179 = vmatmul.mubr.f32.gmra.mrb[220].mxu0 %v5050_v2  ;;  %v5072_v2 = vld [vmem:[#allocation4 + $0xc10] sm:$0x1] }
 0x505   : > { %9691 = vmatpush3.bf16.msra.mxu0 %v10990_v36  ;;  %5183 = vmatprep.mubr.f32.mxu0 %v5058_v59  ;;  %v5071_v59 = vld [vmem:[#allocation4 + $0xc08] sm:$0x1] }
 0x506   : > { %9693 = vmatprep.subr.bf16.mxu0 %v10997_v7  ;;  %v12822_v7 = vld [vmem:[#allocation19_spill] sm:$0xff] }
 0x508   : > { %5184 = vmatmul.mubr.f32.gmra.mrb[222].mxu0 %v5057_v0  ;;  %v12823_v0 = vld [vmem:[#allocation22_spill] sm:$0xff] }
 0x509   : > { %9695 = vmatpush3.bf16.msra.mxu0 %v12787_v46  ;;  %5188 = vmatprep.mubr.f32.mxu0 %v5065_v13  ;;  %v12824_v13 = vld [vmem:[#allocation23_spill] sm:$0xff] }
 0x50a   : > { %9697 = vmatprep.subr.bf16.mxu0 %v12819_v56 }
 0x50c   : > { %5189 = vmatmul.mubr.f32.gmra.mrb[224].mxu0 %v5064_v23  ;;  %v5031_v23 = vld [vmem:[#allocation4 + $0xac8] sm:$0xff] }
 0x50d   : > { %9699 = vmatpush3.bf16.msra.mxu0 %v12820_v60  ;;  %5193 = vmatprep.mubr.f32.mxu0 %v5072_v2  ;;  %v5039_v2 = vld [vmem:[#allocation4 + $0xb08] sm:$0xff] }
 0x50e   : > { %9701 = vmatprep.subr.bf16.mxu0 %v12821_v40  ;;  %v12826_v60 = vld [vmem:[#allocation64_spill] sm:$0xff] }
 0x510   : > { %5194 = vmatmul.mubr.f32.gmra.mrb[226].mxu0 %v5071_v59  ;;  %v5038_v59 = vld [vmem:[#allocation4 + $0xb00] sm:$0xff] }
 0x511   : > { %9703 = vmatpush3.bf16.msra.mxu0 %v12822_v7  ;;  %5263 = vmatprep.mubr.f32.mxu0 %v5032_v44  ;;  %v5046_v44 = vld [vmem:[#allocation4 + $0xb40] sm:$0xff] }
 0x512   : > { %9705 = vmatprep.subr.bf16.mxu0 %v12823_v0  ;;  %v11737_v0 = vadd.f32 %v11707_v63, %v11686_v61  ;;  %v5067_v61 = vld [vmem:[#allocation4 + $0xbe8] sm:$0xff]  ;;  %v11747_v63 = vadd.f32 %v7292_v38, %v11695_v20 }
 0x513   : > { %v5035_v38 = vld [vmem:[#allocation4 + $0xae8] sm:$0xff] }
 0x515   : > { %9707 = vmatpush3.bf16.msra.mxu0 %v12824_v13  ;;  %v11741_v13 = vadd.f32 %v11710_v43, %v11689_v8  ;;  %v11749_v8 = vpop.f32.mrb[74].mxu0  ;;  %v11752_v43 = vadd.f32 %v7295_v17, %v11698_v32  ;;  %v5042_v17 = vld [vmem:[#allocation4 + $0xb20] sm:$0xff] }
 0x516   : > { %9740 = vmatprep.subr.bf16.mxu0 %v12825_v14 }
 0x518   : > { %5264 = vmatmul.mubr.f32.vlgmr.msra.gmra.mrb[228].mxu0 %v5031_v23  ;;  %v5052_v23 = vld [vmem:[#allocation4 + $0xb70] sm:$0xff] }
 0x519   : > { %9742 = vmatpush3.bf16.msra.mxu0 %v12826_v60  ;;  %5268 = vmatprep.mubr.f32.mxu0 %v5039_v2  ;;  %v5060_v2 = vld [vmem:[#allocation4 + $0xbb0] sm:$0xff]  ;;  %v11744_v60 = vadd.f32 %v7289_v12, %v11692_v28  ;;  %v5073_v28 = vld [vmem:[#allocation4 + $0xc18] sm:$0x1] }
 0x51a   : > { %9744 = vmatprep.subr.bf16.mxu0 %v10865_v42  ;;  %v5059_v42 = vld [vmem:[#allocation4 + $0xba8] sm:$0xff] }
 0x51c   : > { %5269 = vmatmul.mubr.f32.gmra.mrb[230].mxu0 %v5038_v59  ;;  %v5066_v59 = vld [vmem:[#allocation4 + $0xbe0] sm:$0xff] }
 0x51d   : > { %5273 = vmatprep.mubr.f32.mxu0 %v5046_v44  ;;  %v5074_v44 = vld [vmem:[#allocation4 + $0xc20] sm:$0x1] }
 0x520   : > { %5274 = vmatmul.mubr.f32.gmra.mrb[232].mxu0 %v5045_v33  ;;  %v8569_v33 = vpop.f32.mrb[75].mxu0 }
 0x521   : > { %5278 = vmatprep.mubr.f32.mxu0 %v5053_v10  ;;  %v11754_v12 = vpop.f32.mrb[76].mxu0  ;;  %v11757_v10 = vadd.f32 %v7298_v30, %v11701_v29  ;;  %v5049_v30 = vld [vmem:[#allocation4 + $0xb58] sm:$0xff] }
 0x522   : > { %v8572_v20 = vpop.f32.mrb[77].mxu0 }
 0x524   : > { %5279 = vmatmul.mubr.f32.gmra.mrb[234].mxu0 %v5052_v23  ;;  %v11761_v23 = vpop.f32.mrb[78].mxu0 }
 0x525   : > { %5283 = vmatprep.mubr.f32.mxu0 %v5060_v2  ;;  %v8575_v2 = vpop.f32.mrb[79].mxu0 }
 0x526   : > { %v11768_v32 = vpop.f32.mrb[80].mxu0 }
 0x527   : > { %v8578_v29 = vpop.f32.mrb[81].mxu0 }
 0x528   : > { %5284 = vmatmul.mubr.f32.gmra.mrb[236].mxu0 %v5059_v42 }
 0x529   : > { %5288 = vmatprep.mubr.f32.mxu0 %v5067_v61 }
 0x52c   : > { %5289 = vmatmul.mubr.f32.gmra.mrb[238].mxu0 %v5066_v59 }
 0x52d   : > { %5293 = vmatprep.mubr.f32.mxu0 %v5074_v44 }
 0x530   : > { %5294 = vmatmul.mubr.f32.gmra.mrb[240].mxu0 %v5073_v28 }
 0x531   : > { %8772 = vmatprep.mubr.msk.f32.mxu0 %vm10138_vm0, %v12799_v31 }
 0x534   : > { %8773 = vmatmul.mubr.msk.f32.vlgmr.msra.gmra.mrb[242].mxu0 %vm955_vm4, %v5035_v38 }
 0x535   : > { %9746 = vmatpush3.bf16.msra.mxu0 %v10874_v9  ;;  %8775 = vmatprep.mubr.msk.f32.mxu0 %vm10138_vm0, %v12799_v31  ;;  %v11776_v9 = vpop.f32.mrb[82].mxu0 }
 0x536   : > { %9748 = vmatprep.subr.bf16.mxu0 %v10883_v62  ;;  %v5056_v62 = vld [vmem:[#allocation4 + $0xb90] sm:$0xff]  ;;  %v8581_v42 = vpop.f32.mrb[83].mxu0 }
 0x538   : > { %8776 = vmatmul.mubr.msk.f32.gmra.mrb[244].mxu0 %vm955_vm4, %v5042_v17 }
 0x539   : > { %9750 = vmatpush3.bf16.msra.mxu0 %v10901_v11  ;;  %8778 = vmatprep.mubr.msk.f32.mxu0 %vm10138_vm0, %v12799_v31  ;;  %v11783_v11 = vpop.f32.mrb[84].mxu0 }
 0x53a   : > { %9752 = vmatprep.subr.bf16.mxu0 %v10908_v25  ;;  %v5063_v25 = vld [vmem:[#allocation4 + $0xbc8] sm:$0xff]  ;;  %v8584_v61 = vpop.f32.mrb[85].mxu0 }
 0x53c   : > { %8779 = vmatmul.mubr.msk.f32.gmra.mrb[246].mxu0 %vm955_vm4, %v5049_v30 }
 0x53d   : > { %9754 = vmatpush3.bf16.msra.mxu0 %v10933_v52  ;;  %8781 = vmatprep.mubr.msk.f32.mxu0 %vm10138_vm0, %v12799_v31  ;;  %v11789_v52 = vpop.f32.mrb[86].mxu0 }
 0x53e   : > { %9756 = vmatprep.subr.bf16.mxu0 %v10950_v49  ;;  %v8587_v59 = vpop.f32.mrb[87].mxu0  ;;  %v5070_v49 = vld [vmem:[#allocation4 + $0xc00] sm:$0xff] }
 0x540   : > { %8782 = vmatmul.mubr.msk.f32.gmra.mrb[248].mxu0 %vm955_vm4, %v5056_v62 }
 0x541   : > { %9758 = vmatpush3.bf16.msra.mxu0 %v10966_v48  ;;  %8784 = vmatprep.mubr.msk.f32.mxu0 %vm10138_vm0, %v12799_v31  ;;  %v5077_v48 = vld [vmem:[#allocation4 + $0xc38] sm:$0x1] }
 0x542   : > { %9760 = vmatprep.subr.bf16.mxu0 %v10981_v57  ;;  %v5621_v57 = vld [vmem:[#allocation4 + $0xc48] sm:$0xff] }
 0x544   : > { %8785 = vmatmul.mubr.msk.f32.gmra.mrb[250].mxu0 %vm955_vm4, %v5063_v25 }
 0x545   : > { %9762 = vmatpush3.bf16.msra.mxu0 %v11005_v6  ;;  %8787 = vmatprep.mubr.msk.f32.mxu0 %vm10138_vm0, %v12799_v31  ;;  %v5620_v6 = vld [vmem:[#allocation4 + $0xc40] sm:$0xff] }
 0x546   : > { %9764 = vmatprep.subr.bf16.mxu0 %v11012_v45 }
 0x548   : > { %8788 = vmatmul.mubr.msk.f32.gmra.mrb[252].mxu0 %vm955_vm4, %v5070_v49 }
 0x549   : > { %9766 = vmatpush3.bf16.msra.mxu0 %v11036_v19  ;;  %8790 = vmatprep.mubr.msk.f32.mxu0 %vm10138_vm0, %v12799_v31 }
 0x54a   : > { %9768 = vmatprep.subr.bf16.mxu0 %v11045_v26 }
 0x54c   : > { %8791 = vmatmul.mubr.msk.f32.gmra.mrb[254].mxu0 %vm955_vm4, %v5077_v48 }
 0x54d   : > { %9770 = vmatpush3.bf16.msra.mxu0 %v11067_v50  ;;  %5754 = vmatprep.mubr.f32.mxu0 %v5621_v57 }
 0x54e   : > { %9772 = vmatprep.subr.bf16.mxu0 %v11076_v51 }
 0x551   : > { %9774 = vmatpush3.bf16.msra.mxu0 %v11094_v24 }
 0x552   : > { %9808 = vmatprep.subr.bf16.mxu0 %v12801_v15 }
 0x554   : > { %5755 = vmatmul.mubr.f32.vlgmr.msra.gmra.mrb[0].mxu0 %v5620_v6 }
 0x555   : > { %9810 = vmatpush3.bf16.msra.mxu0 %v12803_v21 }
 0x556   : > { %9812 = vmatprep.subr.bf16.mxu0 %v12805_v39 }
 0x559   : > { %9814 = vmatpush3.bf16.msra.mxu0 %v12806_v41 }
 0x55a   : > { %9816 = vmatprep.subr.bf16.mxu0 %v12807_v18 }
 0x55d   : > { %9818 = vmatpush3.bf16.msra.mxu0 %v12808_v53 }
 0x55e   : > { %9820 = vmatprep.subr.bf16.mxu0 %v12809_v34 }
 0x561   : > { %9822 = vmatpush3.bf16.msra.mxu0 %v12810_v3 }
 0x562   : > { %9824 = vmatprep.subr.bf16.mxu0 %v12811_v55 }
 0x565   : > { %9826 = vmatpush3.bf16.msra.mxu0 %v12812_v37 }
 0x566   : > { %9828 = vmatprep.subr.bf16.mxu0 %v12813_v58 }
 0x569   : > { %9830 = vmatpush3.bf16.msra.mxu0 %v12814_v35 }
 0x56a   : > { %9832 = vmatprep.subr.bf16.mxu0 %v12815_v47 }
 0x56d   : > { %9834 = vmatpush3.bf16.msra.mxu0 %v12816_v54 }
 0x56e   : > { %9836 = vmatprep.subr.bf16.mxu0 %v12817_v5 }
 0x571   : > { %9838 = vmatpush3.bf16.msra.mxu0 %v12818_v27 }
 0x572   : > { %9842 = vmatprep.subr.bf16.mxu0 %v12825_v14 }
 0x57e   : > { %v8545_v45 = vpop.f32.mrb[76].mxu1 }
 0x57f   : > { %v1959_v19 = vpop.f32.mrb[77].mxu1 }
 0x580   : > { %v8546_v26 = vpop.f32.mrb[78].mxu1 }
 0x581   : > { %v1962_v50 = vpop.f32.mrb[79].mxu1 }
 0x58e   : > { %v8561_v51 = vpop.f32.mrb[80].mxu1 }
 0x58f   : > { %v11822_v24 = vadd.f32 %v8561_v51, %v8545_v45  ;;  %v2059_v44 = vpop.f32.mrb[81].mxu1 }
 0x590   : > { %v11824_v33 = vadd.f32 %v2059_v44, %v1959_v19  ;;  %v8562_v28 = vpop.f32.mrb[82].mxu1 }
 0x591   : > { %v2062_v20 = vpop.f32.mrb[83].mxu1 }
 0x592   : > { %v11826_v38 = vadd.f32 %v2062_v20, %v1962_v50 }
 0x5a6   : > { %v7331_v2 = vpop.f32.mrb[70].mxu1 }
 0x5a7   : > { %v7332_v17 = vpop.f32.mrb[71].mxu1 }
 0x5a8   : > { %v7333_v29 = vadd.f32 %v7332_v17, %v7331_v2 }
 0x5aa   : > { %v2411_v30 = vadd.f32 %v7333_v29, %v11729_v16  ;;  %v7334_v62 = vpop.f32.mrb[84].mxu1 }
 0x5ab   : > { %v7335_v42 = vpop.f32.mrb[85].mxu1 }
 0x5ac   : > { %v2511_v25 = vadd.f32 %v11749_v8, %v2411_v30  ;;  %v7336_v61 = vadd.f32 %v7335_v42, %v7334_v62 }
 0x5ae   : > { %v2416_v59 = vadd.f32 %v7336_v61, %v11737_v0  ;;  %v7337_v49 = vpop.f32.mrb[86].mxu1  ;;  %v12828_v61 = vld [vmem:[#allocation67_spill] sm:$0xff] }
 0x5af   : > { %v7338_v48 = vpop.f32.mrb[87].mxu1 }
 0x5b0   : > { %v2516_v57 = vadd.f32 %v11754_v12, %v2416_v59  ;;  %v7339_v6 = vadd.f32 %v7338_v48, %v7337_v49  ;;  %v12829_v48 = vld [vmem:[#allocation68_spill] sm:$0xff] }
 0x5b2   : > { %v2544_v45 = vpack.c.bf16 %v2516_v57, %v2511_v25  ;;  %v7340_v19 = vpop.f32.mrb[88].mxu1  ;;  %v2421_v26 = vadd.f32 %v7339_v6, %v11741_v13  ;;  %v12827_v25 = vld [vmem:[#allocation66_spill] sm:$0xff]  ;;  %v12833_v57 = vld [vmem:[#allocation23_spill] sm:$0xff] }
 0x5b3   : > { %v7341_v50 = vpop.f32.mrb[89].mxu1  ;;  %v2667_v6 = vld [vmem:[#allocation4 + $0x4a8] sm:$0xff] }
 0x5b4   : > { %v2521_v51 = vadd.f32 %v11761_v23, %v2421_v26  ;;  %v7342_v16 = vadd.f32 %v7341_v50, %v7340_v19  ;;  %8596 = vmatprep.mubr.msk.bf16.mxu1 %vm433_vm1, %v2544_v45  ;;  %v2675_v45 = vld [vmem:[#allocation4 + $0x4e8] sm:$0xff]  ;;  %v2674_v50 = vld [vmem:[#allocation4 + $0x4e0] sm:$0xff] }
 0x5b5   : > { %v9969_v19 = vld [vmem:[#allocation6 + $0x60] sm:$0xff]  }
 0x5b6   : > { %v7343_v44 = vpop.f32.mrb[90].mxu1  ;;  %v2426_v8 = vadd.f32 %v7342_v16, %v11744_v60  ;;  %v12834_v26 = vld [vmem:[#allocation64_spill] sm:$0xff]  ;;  %v2681_v16 = vld [vmem:[#allocation4 + $0x518] sm:$0xff] }
 0x5b7   : > { %v7344_v28 = vpop.f32.mrb[91].mxu1 }
 0x5b8   : > { %v2526_v0 = vadd.f32 %v11768_v32, %v2426_v8  ;;  %v7345_v20 = vadd.f32 %v7344_v28, %v7343_v44  ;;  %v2689_v44 = vld [vmem:[#allocation4 + $0x558] sm:$0xff]  ;;  %v2688_v8 = vld [vmem:[#allocation4 + $0x550] sm:$0xff] }
 0x5b9   : > { %v2696_v28 = vld [vmem:[#allocation4 + $0x590] sm:$0xff] }
 0x5ba   : > { %v2545_v2 = vpack.c.bf16 %v2526_v0, %v2521_v51  ;;  %v7346_v12 = vpop.f32.mrb[92].mxu1  ;;  %v2431_v17 = vadd.f32 %v7345_v20, %v11747_v63  ;;  %v2682_v51 = vld [vmem:[#allocation4 + $0x520] sm:$0xff]  ;;  %v2695_v0 = vld [vmem:[#allocation4 + $0x588] sm:$0xff] }
 0x5bb   : > { %v7347_v29 = vpop.f32.mrb[93].mxu1  ;;  %v2703_v20 = vld [vmem:[#allocation4 + $0x5c8] sm:$0xff] }
 0x5bc   : > { %v7348_v30 = vadd.f32 %v7347_v29, %v7346_v12  ;;  %v2531_v13 = vadd.f32 %v11776_v9, %v2431_v17  ;;  %8597 = vmatmul.mubr.msk.bf16.vlgmr.msra.gmra.mrb[72].mxu1 %vm433_vm1, %v2545_v2  ;;  %v2702_v2 = vld [vmem:[#allocation4 + $0x5c0] sm:$0xff]  ;;  %v2709_v17 = vld [vmem:[#allocation4 + $0x5f8] sm:$0x1]  ;;  %v2671_v29 = vld [vmem:[#allocation4 + $0x4c8] sm:$0xff] }
 0x5bd   : > { %9283 = vmatpush3.bf16.msra.mxu1 %v10893_v4  ;;  %v2710_v12 = vld [vmem:[#allocation4 + $0x600] sm:$0x1] }
 0x5be   : > { %9285 = vmatprep.subr.bf16.mxu1 %v10903_v22  ;;  %v7349_v23 = vpop.f32.mrb[94].mxu1  ;;  %v2436_v60 = vadd.f32 %v7348_v30, %v11752_v43  ;;  %v2668_v43 = vld [vmem:[#allocation4 + $0x4b0] sm:$0xff] }
 0x5bf   : > { %v7350_v62 = vpop.f32.mrb[95].mxu1  ;;  %v9970_v30 = vld [vmem:[#allocation6 + $0x68] sm:$0xff]  }
 0x5c0   : > { %v7351_v32 = vadd.f32 %v7350_v62, %v7349_v23  ;;  %v2536_v42 = vadd.f32 %v11783_v11, %v2436_v60  ;;  %v12830_v11 = vld [vmem:[#allocation69_spill] sm:$0xff]  ;;  %v9972_v62 = vld [vmem:[#allocation6 + $0x78] sm:$0xff]  }
 0x5c1   : > { %9287 = vmatpush3.bf16.msra.mxu1 %v12827_v25  ;;  %v9971_v23 = vld [vmem:[#allocation6 + $0x70] sm:$0xff]  }
 0x5c2   : > { %v2546_v63 = vpack.c.bf16 %v2536_v42, %v2531_v13  ;;  %9289 = vmatprep.subr.bf16.mxu1 %v12828_v61  ;;  %v2441_v9 = vadd.f32 %v7351_v32, %v11757_v10  ;;  %v12831_v10 = vld [vmem:[#allocation13_spill] sm:$0xff]  ;;  %v2678_v13 = vld [vmem:[#allocation4 + $0x500] sm:$0xff]  ;;  %v2699_v42 = vld [vmem:[#allocation4 + $0x5a8] sm:$0xff] }
 0x5c3   : > { %v2685_v60 = vld [vmem:[#allocation4 + $0x538] sm:$0xff]  ;;  %v2692_v32 = vld [vmem:[#allocation4 + $0x570] sm:$0xff] }
 0x5c4   : > { %v2541_v59 = vadd.f32 %v11789_v52, %v2441_v9  ;;  %8600 = vmatprep.mubr.msk.bf16.mxu1 %vm433_vm1, %v2546_v63  ;;  %v12832_v52 = vld [vmem:[#allocation22_spill] sm:$0xff]  ;;  %v12835_v63 = vld [vmem:[#allocation65_spill] sm:$0xff] }
 0x5c5   : > { %9291 = vmatpush3.bf16.msra.mxu1 %v10959_v1  ;;  %v2706_v9 = vld [vmem:[#allocation4 + $0x5e0] sm:$0xff] }
 0x5c6   : > { %v2547_v49 = vpack.c.bf16 %v2541_v59, %v2541_v59  ;;  %9293 = vmatprep.subr.bf16.mxu1 %v12829_v48  ;;  %v2713_v59 = vld [vmem:[#allocation4 + $0x618] sm:$0x1] }
 0x5c8   : > { %8601 = vmatmul.mubr.msk.bf16.gmra.mrb[96].mxu1 %vm433_vm1, %v2547_v49  ;;  %v7401_v49 = vpop.f32.mrb[88].mxu0 }
 0x5c9   : > { %9295 = vmatpush3.bf16.msra.mxu1 %v10990_v36  ;;  %2899 = vmatprep.mubr.f32.mxu1 %v2668_v43  ;;  %v7402_v43 = vpop.f32.mrb[89].mxu0 }
 0x5ca   : > { %9297 = vmatprep.subr.bf16.mxu1 %v12830_v11 }
 0x5cd   : > { %9299 = vmatpush3.bf16.msra.mxu1 %v12787_v46 }
 0x5ce   : > { %9301 = vmatprep.subr.bf16.mxu1 %v12819_v56 }
 0x5d1   : > { %9303 = vmatpush3.bf16.msra.mxu1 %v12831_v10 }
 0x5d2   : > { %9305 = vmatprep.subr.bf16.mxu1 %v12821_v40 }
 0x5d5   : > { %9307 = vmatpush3.bf16.msra.mxu1 %v12822_v7 }
 0x5d6   : > { %9309 = vmatprep.subr.bf16.mxu1 %v12832_v52 }
 0x5d9   : > { %9311 = vmatpush3.bf16.msra.mxu1 %v12833_v57 }
 0x5da   : > { %9344 = vmatprep.subr.bf16.mxu1 %v12825_v14 }
 0x5dc   : > { %2900 = vmatmul.mubr.f32.vlgmr.msra.gmra.mrb[100].mxu1 %v2667_v6  ;;  %v7403_v6 = vadd.f32 %v7402_v43, %v7401_v49 }
 0x5dd   : > { %9346 = vmatpush3.bf16.msra.mxu1 %v12834_v26  ;;  %2904 = vmatprep.mubr.f32.mxu1 %v2675_v45  ;;  %v7404_v45 = vpop.f32.mrb[90].mxu0 }
 0x5de   : > { %8629 = vmatprep.subr.bf16.mxu1 %v9969_v19 }
 0x5e0   : > { %2905 = vmatmul.mubr.f32.gmra.mrb[102].mxu1 %v2674_v50 }
 0x5e1   : > { %2909 = vmatprep.mubr.f32.mxu1 %v2682_v51 }
 0x5e4   : > { %2910 = vmatmul.mubr.f32.gmra.mrb[104].mxu1 %v2681_v16 }
 0x5e5   : > { %2914 = vmatprep.mubr.f32.mxu1 %v2689_v44 }
 0x5e8   : > { %2915 = vmatmul.mubr.f32.gmra.mrb[106].mxu1 %v2688_v8 }
 0x5e9   : > { %2919 = vmatprep.mubr.f32.mxu1 %v2696_v28 }
 0x5ec   : > { %2920 = vmatmul.mubr.f32.gmra.mrb[108].mxu1 %v2695_v0 }
 0x5ed   : > { %2924 = vmatprep.mubr.f32.mxu1 %v2703_v20 }
 0x5f0   : > { %2925 = vmatmul.mubr.f32.gmra.mrb[110].mxu1 %v2702_v2 }
 0x5f1   : > { %2929 = vmatprep.mubr.f32.mxu1 %v2710_v12 }
 0x5f4   : > { %2930 = vmatmul.mubr.f32.gmra.mrb[112].mxu1 %v2709_v17 }
 0x5f5   : > { %8608 = vmatprep.mubr.msk.f32.mxu1 %vm10138_vm0, %v12799_v31 }
 0x5f8   : > { %8609 = vmatmul.mubr.msk.f32.vlgmr.msra.gmra.mrb[114].mxu1 %vm955_vm4, %v2671_v29 }
 0x5f9   : > { %8630 = vmatpush3.bf16.msra.mxu1 %v9969_v19  ;;  %8611 = vmatprep.mubr.msk.f32.mxu1 %vm10138_vm0, %v12799_v31  ;;  %v7405_v19 = vpop.f32.mrb[91].mxu0 }
 0x5fa   : > { %8631 = vmatprep.subr.bf16.mxu1 %v9970_v30  ;;  %v7406_v50 = vadd.f32 %v7405_v19, %v7404_v45  ;;  %v7407_v51 = vpop.f32.mrb[92].mxu0 }
 0x5fb   : > { %v7408_v16 = vpop.f32.mrb[93].mxu0 }
 0x5fc   : > { %8612 = vmatmul.mubr.msk.f32.gmra.mrb[116].mxu1 %vm955_vm4, %v2678_v13  ;;  %v7409_v44 = vadd.f32 %v7408_v16, %v7407_v51  ;;  %v7410_v8 = vpop.f32.mrb[94].mxu0 }
 0x5fd   : > { %8632 = vmatpush3.bf16.msra.mxu1 %v9970_v30  ;;  %8614 = vmatprep.mubr.msk.f32.mxu1 %vm10138_vm0, %v12799_v31  ;;  %v7411_v28 = vpop.f32.mrb[95].mxu0 }
 0x5fe   : > { %8633 = vmatprep.subr.bf16.mxu1 %v9971_v23  ;;  %v7412_v0 = vadd.f32 %v7411_v28, %v7410_v8  ;;  %v7413_v20 = vpop.f32.mrb[96].mxu0 }
 0x5ff   : > { %v7414_v2 = vpop.f32.mrb[97].mxu0 }
 0x600   : > { %8615 = vmatmul.mubr.msk.f32.gmra.mrb[118].mxu1 %vm955_vm4, %v2685_v60  ;;  %v7415_v12 = vadd.f32 %v7414_v2, %v7413_v20  ;;  %v7416_v17 = vpop.f32.mrb[98].mxu0 }
 0x601   : > { %8634 = vmatpush3.bf16.msra.mxu1 %v9971_v23  ;;  %8617 = vmatprep.mubr.msk.f32.mxu1 %vm10138_vm0, %v12799_v31  ;;  %v7417_v29 = vpop.f32.mrb[99].mxu0 }
 0x602   : > { %8635 = vmatprep.subr.bf16.mxu1 %v9972_v62  ;;  %v7418_v30 = vadd.f32 %v7417_v29, %v7416_v17  ;;  %v7419_v13 = vpop.f32.mrb[100].mxu0 }
 0x603   : > { %v7420_v23 = vpop.f32.mrb[101].mxu0 }
 0x604   : > { %8618 = vmatmul.mubr.msk.f32.gmra.mrb[120].mxu1 %vm955_vm4, %v2692_v32  ;;  %v7421_v60 = vadd.f32 %v7420_v23, %v7419_v13 }
 0x605   : > { %8636 = vmatpush3.bf16.msra.mxu1 %v9972_v62  ;;  %8620 = vmatprep.mubr.msk.f32.mxu1 %vm10138_vm0, %v12799_v31  ;;  %v7507_v62 = vpop.f32.mrb[102].mxu0 }
 0x606   : > { %9380 = vmatprep.subr.bf16.mxu1 %v12835_v63  ;;  %v7508_v32 = vpop.f32.mrb[103].mxu0 }
 0x608   : > { %8621 = vmatmul.mubr.msk.f32.gmra.mrb[122].mxu1 %vm955_vm4, %v2699_v42  ;;  %v7509_v42 = vadd.f32 %v7508_v32, %v7507_v62 }
 0x609   : > { %8623 = vmatprep.mubr.msk.f32.mxu1 %vm10138_vm0, %v12799_v31 }
 0x60c   : > { %8624 = vmatmul.mubr.msk.f32.gmra.mrb[124].mxu1 %vm955_vm4, %v2706_v9  ;;  %v7510_v9 = vpop.f32.mrb[104].mxu0 }
 0x60d   : > { %8626 = vmatprep.mubr.msk.f32.mxu1 %vm10138_vm0, %v12799_v31 }
 0x610   : > { %8627 = vmatmul.mubr.msk.f32.gmra.mrb[126].mxu1 %vm955_vm4, %v2713_v59  ;;  %v7511_v59 = vpop.f32.mrb[105].mxu0 }
 0x611   : > { %v7512_v49 = vadd.f32 %v7511_v59, %v7510_v9  ;;  %v7513_v43 = vpop.f32.mrb[106].mxu0 }
 0x612   : > { %v7514_v45 = vpop.f32.mrb[107].mxu0 }
 0x613   : > { %v7515_v19 = vadd.f32 %v7514_v45, %v7513_v43  ;;  %v7516_v51 = vpop.f32.mrb[108].mxu0 }
 0x614   : > { %v7517_v16 = vpop.f32.mrb[109].mxu0 }
 0x615   : > { %v7518_v8 = vadd.f32 %v7517_v16, %v7516_v51  ;;  %v7519_v28 = vpop.f32.mrb[110].mxu0 }
 0x616   : > { %v7520_v20 = vpop.f32.mrb[111].mxu0 }
 0x617   : > { %v7521_v2 = vadd.f32 %v7520_v20, %v7519_v28  ;;  %v7522_v63 = vpop.f32.mrb[112].mxu0 }
 0x618   : > { %v7523_v17 = vpop.f32.mrb[113].mxu0 }
 0x619   : > { %v7524_v29 = vadd.f32 %v7523_v17, %v7522_v63  ;;  %v7525_v27 = vpop.f32.mrb[114].mxu0 }
 0x61a   : > { %v7526_v13 = vpop.f32.mrb[115].mxu0 }
 0x61b   : > { %v7527_v23 = vadd.f32 %v7526_v13, %v7525_v27 }
 0x69b   : > { %v8602_v5 = vpop.f32.mrb[96].mxu1 }
 0x69c   : > { %v11886_v62 = vadd.f32 %v8602_v5, %v11822_v24  ;;  %v2643_v32 = vpop.f32.mrb[97].mxu1 }
 0x69d   : > { %v11889_v9 = vadd.f32 %v2643_v32, %v11824_v33  ;;  %v8603_v59 = vpop.f32.mrb[98].mxu1 }
 0x69e   : > { %v2646_v43 = vpop.f32.mrb[99].mxu1 }
 0x69f   : > { %v11892_v45 = vadd.f32 %v2646_v43, %v11826_v38 }
 0x6af   : > { %v7454_v51 = vpop.f32.mrb[100].mxu1 }
 0x6b0   : > { %v7455_v16 = vpop.f32.mrb[101].mxu1 }
 0x6b1   : > { %v7456_v28 = vadd.f32 %v7455_v16, %v7454_v51 }
 0x6b3   : > { %v2902_v63 = vadd.f32 %v7456_v28, %v7403_v6  ;;  %v7457_v20 = vpop.f32.mrb[102].mxu1 }
 0x6b4   : > { %v7458_v17 = vpop.f32.mrb[103].mxu1 }
 0x6b5   : > { %v7459_v27 = vadd.f32 %v7458_v17, %v7457_v20  ;;  %v3002_v13 = vadd.f32 %v7509_v42, %v2902_v63 }
 0x6b7   : > { %v2907_v54 = vadd.f32 %v7459_v27, %v7406_v50  ;;  %v7460_v5 = vpop.f32.mrb[104].mxu1 }
 0x6b8   : > { %v7461_v24 = vpop.f32.mrb[105].mxu1 }
 0x6b9   : > { %v7462_v47 = vadd.f32 %v7461_v24, %v7460_v5  ;;  %v3007_v35 = vadd.f32 %v7512_v49, %v2907_v54 }
 0x6bb   : > { %v2912_v33 = vadd.f32 %v7462_v47, %v7409_v44  ;;  %v7463_v32 = vpop.f32.mrb[106].mxu1 }
 0x6bc   : > { %v7464_v59 = vpop.f32.mrb[107].mxu1 }
 0x6bd   : > { %v7465_v58 = vadd.f32 %v7464_v59, %v7463_v32  ;;  %v3012_v37 = vadd.f32 %v7515_v19, %v2912_v33 }
 0x6bf   : > { %v2917_v38 = vadd.f32 %v7465_v58, %v7412_v0  ;;  %v7466_v43 = vpop.f32.mrb[108].mxu1 }
 0x6c0   : > { %v7467_v55 = vpop.f32.mrb[109].mxu1 }
 0x6c1   : > { %v7468_v3 = vadd.f32 %v7467_v55, %v7466_v43  ;;  %v3017_v51 = vadd.f32 %v7518_v8, %v2917_v38 }
 0x6c3   : > { %v2922_v6 = vadd.f32 %v7468_v3, %v7415_v12  ;;  %v7469_v16 = vpop.f32.mrb[110].mxu1 }
 0x6c4   : > { %v7470_v28 = vpop.f32.mrb[111].mxu1 }
 0x6c5   : > { %v7471_v20 = vadd.f32 %v7470_v28, %v7469_v16  ;;  %v3022_v42 = vadd.f32 %v7521_v2, %v2922_v6  ;;  %v3259_v16 = vld [vmem:[#allocation4 + $0x638] sm:$0xff]  ;;  %v3258_v28 = vld [vmem:[#allocation4 + $0x630] sm:$0xff] }
 0x6c7   : > { %v2927_v50 = vadd.f32 %v7471_v20, %v7418_v30  ;;  %v7472_v63 = vpop.f32.mrb[112].mxu1  ;;  %v3266_v20 = vld [vmem:[#allocation4 + $0x670] sm:$0xff] }
 0x6c8   : > { %v7473_v17 = vpop.f32.mrb[113].mxu1 }
 0x6c9   : > { %v7474_v27 = vadd.f32 %v7473_v17, %v7472_v63  ;;  %v3027_v54 = vadd.f32 %v7524_v29, %v2927_v50  ;;  %v3265_v50 = vld [vmem:[#allocation4 + $0x668] sm:$0xff]  ;;  %v3272_v17 = vld [vmem:[#allocation4 + $0x6a0] sm:$0xff] }
 0x6ca   : > { %v3273_v63 = vld [vmem:[#allocation4 + $0x6a8] sm:$0xff] }
 0x6cb   : > { %v2932_v47 = vadd.f32 %v7474_v27, %v7421_v60  ;;  %v3101_v44 = vpop.f32.mrb[114].mxu1  ;;  %v3280_v27 = vld [vmem:[#allocation4 + $0x6e0] sm:$0xff] }
 0x6cc   : > { %v3102_v49 = vadd.f32 %v3101_v44, %v3002_v13  ;;  %v8610_v5 = vpop.f32.mrb[115].mxu1  ;;  %v3286_v44 = vld [vmem:[#allocation4 + $0x710] sm:$0xff] }
 0x6cd   : > { %v3032_v19 = vadd.f32 %v7527_v23, %v2932_v47  ;;  %v3287_v47 = vld [vmem:[#allocation4 + $0x718] sm:$0xff]  ;;  %v3293_v5 = vld [vmem:[#allocation4 + $0x748] sm:$0xff] }
 0x6cf   : > { %v3106_v58 = vpop.f32.mrb[116].mxu1 }
 0x6d0   : > { %v3107_v0 = vadd.f32 %v3106_v58, %v3007_v35  ;;  %v8613_v24 = vpop.f32.mrb[117].mxu1  ;;  %v3300_v58 = vld [vmem:[#allocation4 + $0x780] sm:$0x1] }
 0x6d1   : > { %v9974_v24 = vld [vmem:[#allocation6 + $0x88] sm:$0xff]  }
 0x6d2   : > { %v3135_v55 = vpack.c.bf16 %v3107_v0, %v3102_v49  ;;  %v3294_v49 = vld [vmem:[#allocation4 + $0x750] sm:$0xff] }
 0x6d3   : > { %v3111_v8 = vpop.f32.mrb[118].mxu1  ;;  %v3262_v0 = vld [vmem:[#allocation4 + $0x650] sm:$0xff] }
 0x6d4   : > { %v3112_v3 = vadd.f32 %v3111_v8, %v3012_v37  ;;  %v8616_v12 = vpop.f32.mrb[119].mxu1  ;;  %8637 = vmatprep.mubr.msk.bf16.mxu1 %vm433_vm1, %v3135_v55  ;;  %v3269_v55 = vld [vmem:[#allocation4 + $0x688] sm:$0xff]  ;;  %v9975_v8 = vld [vmem:[#allocation6 + $0x90] sm:$0xff]  }
 0x6d5   : > { %v9976_v12 = vld [vmem:[#allocation6 + $0x98] sm:$0xff]  }
 0x6d7   : > { %v3116_v2 = vpop.f32.mrb[120].mxu1 }
 0x6d8   : > { %v3117_v30 = vadd.f32 %v3116_v2, %v3017_v51  ;;  %v8619_v33 = vpop.f32.mrb[121].mxu1  ;;  %v3283_v2 = vld [vmem:[#allocation4 + $0x6f8] sm:$0xff] }
 0x6d9   : > { %v3297_v33 = vld [vmem:[#allocation4 + $0x768] sm:$0xff] }
 0x6da   : > { %v3136_v32 = vpack.c.bf16 %v3117_v30, %v3112_v3  ;;  %v3276_v3 = vld [vmem:[#allocation4 + $0x6c0] sm:$0xff]  ;;  %v3290_v30 = vld [vmem:[#allocation4 + $0x730] sm:$0xff] }
 0x6db   : > { %v3121_v59 = vpop.f32.mrb[122].mxu1 }
 0x6dc   : > { %v3122_v29 = vadd.f32 %v3121_v59, %v3022_v42  ;;  %8638 = vmatmul.mubr.msk.bf16.vlgmr.msra.gmra.mrb[72].mxu1 %vm433_vm1, %v3136_v32  ;;  %v8622_v60 = vpop.f32.mrb[123].mxu1  ;;  %v9973_v42 = vld [vmem:[#allocation6 + $0x80] sm:$0xff]   ;;  %v3304_v32 = vld [vmem:[#allocation4 + $0x7a0] sm:$0x1]  ;;  %v7577_v59 = vpop.f32.mrb[116].mxu0 }
 0x6dd   : > { %9382 = vmatpush3.bf16.msra.mxu1 %v10893_v4 }
 0x6de   : > { %9384 = vmatprep.subr.bf16.mxu1 %v10903_v22 }
 0x6df   : > { %v3126_v35 = vpop.f32.mrb[124].mxu1 }
 0x6e0   : > { %v3127_v23 = vadd.f32 %v3126_v35, %v3027_v54  ;;  %v8625_v13 = vpop.f32.mrb[125].mxu1  ;;  %v3279_v54 = vld [vmem:[#allocation4 + $0x6d8] sm:$0xff] }
 0x6e1   : > { %9386 = vmatpush3.bf16.msra.mxu1 %v12827_v25 }
 0x6e2   : > { %v3137_v37 = vpack.c.bf16 %v3127_v23, %v3122_v29  ;;  %9388 = vmatprep.subr.bf16.mxu1 %v12828_v61  ;;  %v7578_v29 = vpop.f32.mrb[117].mxu0 }
 0x6e3   : > { %v3131_v38 = vpop.f32.mrb[126].mxu1  ;;  %v11937_v60 = vadd.f32 %v7578_v29, %v7577_v59  ;;  %v7580_v35 = vpop.f32.mrb[118].mxu0 }
 0x6e4   : > { %v3132_v43 = vadd.f32 %v3131_v38, %v3032_v19  ;;  %8641 = vmatprep.mubr.msk.bf16.mxu1 %vm433_vm1, %v3137_v37  ;;  %v8628_v51 = vpop.f32.mrb[127].mxu1  ;;  %v3301_v19 = vld [vmem:[#allocation4 + $0x788] sm:$0x1]  ;;  %v7581_v23 = vpop.f32.mrb[119].mxu0 }
 0x6e5   : > { %9390 = vmatpush3.bf16.msra.mxu1 %v10959_v1  ;;  %v11939_v13 = vadd.f32 %v7581_v23, %v7580_v35  ;;  %v7583_v37 = vpop.f32.mrb[120].mxu0 }
 0x6e6   : > { %v3138_v6 = vpack.c.bf16 %v3132_v43, %v3132_v43  ;;  %9392 = vmatprep.subr.bf16.mxu1 %v12829_v48  ;;  %v7584_v38 = vpop.f32.mrb[121].mxu0 }
 0x6e7   : > { %v11941_v43 = vadd.f32 %v7584_v38, %v7583_v37  ;;  %v7586_v51 = vpop.f32.mrb[122].mxu0 }
 0x6e8   : > { %8642 = vmatmul.mubr.msk.bf16.gmra.mrb[128].mxu1 %vm433_vm1, %v3138_v6  ;;  %v7587_v6 = vpop.f32.mrb[123].mxu0 }
 0x6e9   : > { %9394 = vmatpush3.bf16.msra.mxu1 %v10990_v36  ;;  %3490 = vmatprep.mubr.f32.mxu1 %v3259_v16  ;;  %v11943_v16 = vadd.f32 %v7587_v6, %v7586_v51 }
 0x6ea   : > { %9396 = vmatprep.subr.bf16.mxu1 %v12830_v11 }
 0x6ed   : > { %9398 = vmatpush3.bf16.msra.mxu1 %v12787_v46 }
 0x6ee   : > { %9400 = vmatprep.subr.bf16.mxu1 %v12819_v56 }
 0x6f1   : > { %9402 = vmatpush3.bf16.msra.mxu1 %v12831_v10 }
 0x6f2   : > { %9404 = vmatprep.subr.bf16.mxu1 %v12821_v40 }
 0x6f5   : > { %9406 = vmatpush3.bf16.msra.mxu1 %v12822_v7 }
 0x6f6   : > { %9408 = vmatprep.subr.bf16.mxu1 %v12832_v52 }
 0x6f9   : > { %9410 = vmatpush3.bf16.msra.mxu1 %v12833_v57 }
 0x6fa   : > { %9443 = vmatprep.subr.bf16.mxu1 %v12825_v14 }
 0x6fc   : > { %3491 = vmatmul.mubr.f32.vlgmr.msra.gmra.mrb[132].mxu1 %v3258_v28  ;;  %v7589_v28 = vpop.f32.mrb[124].mxu0 }
 0x6fd   : > { %9445 = vmatpush3.bf16.msra.mxu1 %v12834_v26  ;;  %3495 = vmatprep.mubr.f32.mxu1 %v3266_v20  ;;  %v7590_v20 = vpop.f32.mrb[125].mxu0 }
 0x6fe   : > { %8670 = vmatprep.subr.bf16.mxu1 %v9973_v42 }
 0x700   : > { %3496 = vmatmul.mubr.f32.gmra.mrb[134].mxu1 %v3265_v50  ;;  %v7592_v50 = vpop.f32.mrb[126].mxu0 }
 0x701   : > { %3500 = vmatprep.mubr.f32.mxu1 %v3273_v63  ;;  %v7593_v63 = vpop.f32.mrb[127].mxu0 }
 0x704   : > { %3501 = vmatmul.mubr.f32.gmra.mrb[136].mxu1 %v3272_v17  ;;  %v11947_v17 = vadd.f32 %v7593_v63, %v7592_v50 }
 0x705   : > { %3505 = vmatprep.mubr.f32.mxu1 %v3280_v27  ;;  %v7595_v27 = vpop.f32.mrb[128].mxu0 }
 0x708   : > { %3506 = vmatmul.mubr.f32.gmra.mrb[138].mxu1 %v3279_v54  ;;  %v7596_v54 = vpop.f32.mrb[129].mxu0 }
 0x709   : > { %3510 = vmatprep.mubr.f32.mxu1 %v3287_v47  ;;  %v11949_v47 = vadd.f32 %v7596_v54, %v7595_v27 }
 0x70c   : > { %3511 = vmatmul.mubr.f32.gmra.mrb[140].mxu1 %v3286_v44  ;;  %v7683_v44 = vpop.f32.mrb[130].mxu0 }
 0x70d   : > { %3515 = vmatprep.mubr.f32.mxu1 %v3294_v49  ;;  %v7684_v49 = vpop.f32.mrb[131].mxu0 }
 0x710   : > { %3516 = vmatmul.mubr.f32.gmra.mrb[142].mxu1 %v3293_v5  ;;  %v11951_v5 = vadd.f32 %v7684_v49, %v7683_v44 }
 0x711   : > { %3520 = vmatprep.mubr.f32.mxu1 %v3301_v19  ;;  %v7686_v19 = vpop.f32.mrb[132].mxu0 }
 0x714   : > { %3521 = vmatmul.mubr.f32.gmra.mrb[144].mxu1 %v3300_v58  ;;  %v7687_v58 = vpop.f32.mrb[133].mxu0 }
 0x715   : > { %8649 = vmatprep.mubr.msk.f32.mxu1 %vm10138_vm0, %v12799_v31 }
 0x718   : > { %8650 = vmatmul.mubr.msk.f32.vlgmr.msra.gmra.mrb[146].mxu1 %vm955_vm4, %v3262_v0  ;;  %v11953_v0 = vadd.f32 %v7687_v58, %v7686_v19 }
 0x719   : > { %8671 = vmatpush3.bf16.msra.mxu1 %v9973_v42  ;;  %8652 = vmatprep.mubr.msk.f32.mxu1 %vm10138_vm0, %v12799_v31  ;;  %v11945_v42 = vadd.f32 %v7590_v20, %v7589_v28 }
 0x71a   : > { %8672 = vmatprep.subr.bf16.mxu1 %v9974_v24 }
 0x71c   : > { %8653 = vmatmul.mubr.msk.f32.gmra.mrb[148].mxu1 %vm955_vm4, %v3269_v55 }
 0x71d   : > { %8673 = vmatpush3.bf16.msra.mxu1 %v9974_v24  ;;  %8655 = vmatprep.mubr.msk.f32.mxu1 %vm10138_vm0, %v12799_v31  ;;  %v7689_v24 = vpop.f32.mrb[134].mxu0 }
 0x71e   : > { %8674 = vmatprep.subr.bf16.mxu1 %v9975_v8  ;;  %v7690_v55 = vpop.f32.mrb[135].mxu0 }
 0x720   : > { %8656 = vmatmul.mubr.msk.f32.gmra.mrb[150].mxu1 %vm955_vm4, %v3276_v3  ;;  %v7692_v3 = vpop.f32.mrb[136].mxu0 }
 0x721   : > { %8675 = vmatpush3.bf16.msra.mxu1 %v9975_v8  ;;  %8658 = vmatprep.mubr.msk.f32.mxu1 %vm10138_vm0, %v12799_v31  ;;  %v11955_v8 = vadd.f32 %v7690_v55, %v7689_v24 }
 0x722   : > { %8676 = vmatprep.subr.bf16.mxu1 %v9976_v12 }
 0x724   : > { %8659 = vmatmul.mubr.msk.f32.gmra.mrb[152].mxu1 %vm955_vm4, %v3283_v2 }
 0x725   : > { %8677 = vmatpush3.bf16.msra.mxu1 %v9976_v12  ;;  %8661 = vmatprep.mubr.msk.f32.mxu1 %vm10138_vm0, %v12799_v31  ;;  %v7693_v12 = vpop.f32.mrb[137].mxu0 }
 0x726   : > { %9511 = vmatprep.subr.bf16.mxu1 %v12801_v15  ;;  %v11957_v2 = vadd.f32 %v7693_v12, %v7692_v3 }
 0x728   : > { %8662 = vmatmul.mubr.msk.f32.gmra.mrb[154].mxu1 %vm955_vm4, %v3290_v30  ;;  %v7695_v30 = vpop.f32.mrb[138].mxu0 }
 0x729   : > { %8664 = vmatprep.mubr.msk.f32.mxu1 %vm10138_vm0, %v12799_v31 }
 0x72c   : > { %8665 = vmatmul.mubr.msk.f32.gmra.mrb[156].mxu1 %vm955_vm4, %v3297_v33  ;;  %v7696_v33 = vpop.f32.mrb[139].mxu0 }
 0x72d   : > { %8667 = vmatprep.mubr.msk.f32.mxu1 %vm10138_vm0, %v12799_v31  ;;  %v7698_v59 = vpop.f32.mrb[140].mxu0 }
 0x72e   : > { %v7699_v29 = vpop.f32.mrb[141].mxu0 }
 0x72f   : > { %v11961_v35 = vadd.f32 %v7699_v29, %v7698_v59  ;;  %v7701_v23 = vpop.f32.mrb[142].mxu0 }
 0x730   : > { %8668 = vmatmul.mubr.msk.f32.gmra.mrb[158].mxu1 %vm955_vm4, %v3304_v32  ;;  %v11959_v32 = vadd.f32 %v7696_v33, %v7695_v30  ;;  %v7702_v37 = vpop.f32.mrb[143].mxu0 }
 0x731   : > { %v11963_v38 = vadd.f32 %v7702_v37, %v7701_v23  ;;  %v7753_v51 = vpop.f32.mrb[144].mxu0 }
 0x732   : > { %v7754_v6 = vpop.f32.mrb[145].mxu0 }
 0x733   : > { %v7755_v28 = vadd.f32 %v7754_v6, %v7753_v51  ;;  %v7756_v20 = vpop.f32.mrb[146].mxu0 }
 0x734   : > { %v7757_v50 = vpop.f32.mrb[147].mxu0 }
 0x735   : > { %v7758_v63 = vadd.f32 %v7757_v50, %v7756_v20  ;;  %v7759_v27 = vpop.f32.mrb[148].mxu0 }
 0x736   : > { %v7760_v54 = vpop.f32.mrb[149].mxu0 }
 0x737   : > { %v7761_v44 = vadd.f32 %v7760_v54, %v7759_v27  ;;  %v7762_v49 = vpop.f32.mrb[150].mxu0 }
 0x738   : > { %v7763_v58 = vpop.f32.mrb[151].mxu0 }
 0x739   : > { %v7764_v3 = vadd.f32 %v7763_v58, %v7762_v49  ;;  %v7765_v12 = vpop.f32.mrb[152].mxu0 }
 0x73a   : > { %v7766_v59 = vpop.f32.mrb[153].mxu0 }
 0x73b   : > { %v7767_v23 = vadd.f32 %v7766_v59, %v7765_v12  ;;  %v7768_v37 = vpop.f32.mrb[154].mxu0 }
 0x73c   : > { %v7769_v6 = vpop.f32.mrb[155].mxu0 }
 0x73d   : > { %v7770_v20 = vadd.f32 %v7769_v6, %v7768_v37  ;;  %v7771_v50 = vpop.f32.mrb[156].mxu0 }
 0x73e   : > { %v7772_v27 = vpop.f32.mrb[157].mxu0 }
 0x73f   : > { %v7806_v54 = vpop.f32.mrb[158].mxu0 }
 0x7bb   : > { %v8643_v19 = vpop.f32.mrb[128].mxu1 }
 0x7bc   : > { %v11966_v24 = vadd.f32 %v8643_v19, %v11886_v62  ;;  %v3234_v55 = vpop.f32.mrb[129].mxu1  ;;  %v7773_v62 = vadd.f32 %v7772_v27, %v7771_v50  ;;  %v7807_v19 = vpop.f32.mrb[159].mxu0 }
 0x7bd   : > { %v11969_v30 = vadd.f32 %v3234_v55, %v11889_v9  ;;  %v8644_v33 = vpop.f32.mrb[130].mxu1  ;;  %v7808_v49 = vadd.f32 %v7807_v19, %v7806_v54  ;;  %v7809_v58 = vpop.f32.mrb[160].mxu0 }
 0x7be   : > { %v3237_v29 = vpop.f32.mrb[131].mxu1  ;;  %v7810_v15 = vpop.f32.mrb[161].mxu0 }
 0x7bf   : > { %v11972_v51 = vadd.f32 %v3237_v29, %v11892_v45  ;;  %v11974_v9 = vadd.f32 %v7808_v49, %v7755_v28  ;;  %v7811_v55 = vadd.f32 %v7810_v15, %v7809_v58  ;;  %v7812_v33 = vpop.f32.mrb[162].mxu0 }
 0x7c0   : > { %v7813_v31 = vpop.f32.mrb[163].mxu0 }
 0x7c1   : > { %v11976_v12 = vadd.f32 %v7811_v55, %v7758_v63  ;;  %v7814_v59 = vadd.f32 %v7813_v31, %v7812_v33  ;;  %v7815_v45 = vpop.f32.mrb[164].mxu0 }
 0x7c2   : > { %v7816_v29 = vpop.f32.mrb[165].mxu0 }
 0x7c3   : > { %v11978_v26 = vadd.f32 %v7814_v59, %v7761_v44  ;;  %v7817_v37 = vadd.f32 %v7816_v29, %v7815_v45  ;;  %v7818_v6 = vpop.f32.mrb[166].mxu0 }
 0x7c4   : > { %v7819_v50 = vpop.f32.mrb[167].mxu0 }
 0x7c5   : > { %v11980_v27 = vadd.f32 %v7817_v37, %v7764_v3  ;;  %v7820_v54 = vadd.f32 %v7819_v50, %v7818_v6  ;;  %v7821_v19 = vpop.f32.mrb[168].mxu0 }
 0x7c6   : > { %v7822_v14 = vpop.f32.mrb[169].mxu0 }
 0x7c7   : > { %v11982_v28 = vadd.f32 %v7820_v54, %v7767_v23  ;;  %v7823_v15 = vadd.f32 %v7822_v14, %v7821_v19  ;;  %v7824_v49 = vpop.f32.mrb[170].mxu0 }
 0x7c8   : > { %v7825_v63 = vpop.f32.mrb[171].mxu0 }
 0x7c9   : > { %v11984_v31 = vadd.f32 %v7823_v15, %v7770_v20  ;;  %v7826_v33 = vadd.f32 %v7825_v63, %v7824_v49 }
 0x7cb   : > { %v11986_v59 = vadd.f32 %v7826_v33, %v7773_v62 }
 0x7cf   : > { %v7630_v58 = vpop.f32.mrb[132].mxu1 }
 0x7d0   : > { %v7631_v55 = vpop.f32.mrb[133].mxu1 }
 0x7d1   : > { %v7632_v44 = vadd.f32 %v7631_v55, %v7630_v58 }
 0x7d3   : > { %v3493_v45 = vadd.f32 %v7632_v44, %v11937_v60  ;;  %v7633_v3 = vpop.f32.mrb[134].mxu1 }
 0x7d4   : > { %v7634_v29 = vpop.f32.mrb[135].mxu1 }
 0x7d5   : > { %v7635_v37 = vadd.f32 %v7634_v29, %v7633_v3  ;;  %v3593_v6 = vadd.f32 %v11951_v5, %v3493_v45 }
 0x7d7   : > { %v3498_v23 = vadd.f32 %v7635_v37, %v11939_v13  ;;  %v7636_v14 = vpop.f32.mrb[136].mxu1 }
 0x7d8   : > { %v7637_v50 = vpop.f32.mrb[137].mxu1 }
 0x7d9   : > { %v7638_v54 = vadd.f32 %v7637_v50, %v7636_v14  ;;  %v3598_v19 = vadd.f32 %v11953_v0, %v3498_v23 }
 0x7db   : > { %v3503_v20 = vadd.f32 %v7638_v54, %v11941_v43  ;;  %v7639_v15 = vpop.f32.mrb[138].mxu1 }
 0x7dc   : > { %v7640_v49 = vpop.f32.mrb[139].mxu1 }
 0x7dd   : > { %v7641_v62 = vadd.f32 %v7640_v49, %v7639_v15  ;;  %v3603_v58 = vadd.f32 %v11955_v8, %v3503_v20 }
 0x7df   : > { %v3508_v60 = vadd.f32 %v7641_v62, %v11943_v16  ;;  %v7642_v63 = vpop.f32.mrb[140].mxu1 }
 0x7e0   : > { %v7643_v55 = vpop.f32.mrb[141].mxu1 }
 0x7e1   : > { %v7644_v33 = vadd.f32 %v7643_v55, %v7642_v63  ;;  %v3608_v5 = vadd.f32 %v11957_v2, %v3508_v60 }
 0x7e3   : > { %v3513_v13 = vadd.f32 %v7644_v33, %v11945_v42  ;;  %v7645_v44 = vpop.f32.mrb[142].mxu1 }
 0x7e4   : > { %v7646_v45 = vpop.f32.mrb[143].mxu1 }
 0x7e5   : > { %v7647_v3 = vadd.f32 %v7646_v45, %v7645_v44  ;;  %v3613_v0 = vadd.f32 %v11959_v32, %v3513_v13 }
 0x7e7   : > { %v3518_v43 = vadd.f32 %v7647_v3, %v11947_v17  ;;  %v7648_v29 = vpop.f32.mrb[144].mxu1 }
 0x7e8   : > { %v7649_v37 = vpop.f32.mrb[145].mxu1 }
 0x7e9   : > { %v7650_v23 = vadd.f32 %v7649_v37, %v7648_v29  ;;  %v3618_v8 = vadd.f32 %v11961_v35, %v3518_v43  ;;  %v12836_v43 = vld [vmem:[#allocation25_spill] sm:$0xff]  ;;  %v12837_v29 = vld [vmem:[#allocation31_spill] sm:$0xff]  ;;  %v12838_v37 = vld [vmem:[#allocation32_spill] sm:$0xff] }
 0x7eb   : > { %v3523_v16 = vadd.f32 %v7650_v23, %v11949_v47  ;;  %v3692_v14 = vpop.f32.mrb[146].mxu1  ;;  %v12839_v23 = vld [vmem:[#allocation16_spill] sm:$0xff] }
 0x7ec   : > { %v3693_v50 = vadd.f32 %v3692_v14, %v3593_v6  ;;  %v8651_v54 = vpop.f32.mrb[147].mxu1  ;;  %v12842_v14 = vld [vmem:[#allocation27_spill] sm:$0xff] }
 0x7ed   : > { %v3623_v2 = vadd.f32 %v11963_v38, %v3523_v16  ;;  %v12841_v16 = vld [vmem:[#allocation26_spill] sm:$0xff]  ;;  %v9977_v54 = vld [vmem:[#allocation6 + $0xa0] sm:$0xff]  }
 0x7ef   : > { %v3697_v42 = vpop.f32.mrb[148].mxu1 }
 0x7f0   : > { %v3698_v20 = vadd.f32 %v3697_v42, %v3598_v19  ;;  %v8654_v15 = vpop.f32.mrb[149].mxu1  ;;  %v3851_v42 = vld [vmem:[#allocation4 + $0x7c8] sm:$0xff] }
 0x7f1   : > { %v9978_v15 = vld [vmem:[#allocation6 + $0xa8] sm:$0xff]  }
 0x7f2   : > { %v3726_v49 = vpack.c.bf16 %v3698_v20, %v3693_v50  ;;  %v12843_v50 = vld [vmem:[#allocation49_spill] sm:$0xff]  ;;  %v3859_v20 = vld [vmem:[#allocation4 + $0x808] sm:$0xff] }
 0x7f3   : > { %v3702_v62 = vpop.f32.mrb[150].mxu1 }
 0x7f4   : > { %v3703_v32 = vadd.f32 %v3702_v62, %v3603_v58  ;;  %v8657_v60 = vpop.f32.mrb[151].mxu1  ;;  %8678 = vmatprep.mubr.msk.bf16.mxu1 %vm433_vm1, %v3726_v49  ;;  %v3858_v49 = vld [vmem:[#allocation4 + $0x800] sm:$0xff] }
 0x7f5   : > { %v3866_v62 = vld [vmem:[#allocation4 + $0x840] sm:$0xff]  ;;  %v3865_v60 = vld [vmem:[#allocation4 + $0x838] sm:$0xff] }
 0x7f7   : > { %v3707_v17 = vpop.f32.mrb[152].mxu1 }
 0x7f8   : > { %v3708_v63 = vadd.f32 %v3707_v17, %v3608_v5  ;;  %v8660_v55 = vpop.f32.mrb[153].mxu1  ;;  %v3873_v17 = vld [vmem:[#allocation4 + $0x878] sm:$0xff] }
 0x7f9   : > { %v3872_v55 = vld [vmem:[#allocation4 + $0x870] sm:$0xff] }
 0x7fa   : > { %v3727_v35 = vpack.c.bf16 %v3708_v63, %v3703_v32  ;;  %v9979_v32 = vld [vmem:[#allocation6 + $0xb0] sm:$0xff]   ;;  %v9980_v63 = vld [vmem:[#allocation6 + $0xb8] sm:$0xff]  }
 0x7fb   : > { %v3712_v33 = vpop.f32.mrb[154].mxu1 }
 0x7fc   : > { %v3713_v47 = vadd.f32 %v3712_v33, %v3613_v0  ;;  %8679 = vmatmul.mubr.msk.bf16.vlgmr.msra.gmra.mrb[72].mxu1 %vm433_vm1, %v3727_v35  ;;  %v8663_v6 = vpop.f32.mrb[155].mxu1  ;;  %v3852_v0 = vld [vmem:[#allocation4 + $0x7d0] sm:$0xff]  ;;  %v3879_v33 = vld [vmem:[#allocation4 + $0x8a8] sm:$0xff] }
 0x7fd   : > { %9513 = vmatpush3.bf16.msra.mxu1 %v12803_v21  ;;  %v3880_v35 = vld [vmem:[#allocation4 + $0x8b0] sm:$0xff]  ;;  %v3887_v6 = vld [vmem:[#allocation4 + $0x8e8] sm:$0xff] }
 0x7fe   : > { %9515 = vmatprep.subr.bf16.mxu1 %v12805_v39 }
 0x7ff   : > { %v3717_v38 = vpop.f32.mrb[156].mxu1 }
 0x800   : > { %v3718_v19 = vadd.f32 %v3717_v38, %v3618_v8  ;;  %v8666_v13 = vpop.f32.mrb[157].mxu1  ;;  %v12840_v8 = vld [vmem:[#allocation17_spill] sm:$0xff]  ;;  %v3886_v38 = vld [vmem:[#allocation4 + $0x8e0] sm:$0xff] }
 0x801   : > { %9517 = vmatpush3.bf16.msra.mxu1 %v12806_v41  ;;  %v3893_v13 = vld [vmem:[#allocation4 + $0x918] sm:$0x1] }
 0x802   : > { %v3728_v58 = vpack.c.bf16 %v3718_v19, %v3713_v47  ;;  %9519 = vmatprep.subr.bf16.mxu1 %v12807_v18  ;;  %v12845_v47 = vld [vmem:[#allocation65_spill] sm:$0xff]  ;;  %v3894_v19 = vld [vmem:[#allocation4 + $0x920] sm:$0x1] }
 0x803   : > { %v3722_v5 = vpop.f32.mrb[158].mxu1 }
 0x804   : > { %v3723_v44 = vadd.f32 %v3722_v5, %v3623_v2  ;;  %8682 = vmatprep.mubr.msk.bf16.mxu1 %vm433_vm1, %v3728_v58  ;;  %v8669_v45 = vpop.f32.mrb[159].mxu1  ;;  %v12844_v2 = vld [vmem:[#allocation50_spill] sm:$0xff]  ;;  %v4283_v58 = vpop.f32.mrb[172].mxu0 }
 0x805   : > { %9521 = vmatpush3.bf16.msra.mxu1 %v12808_v53  ;;  %v8692_v5 = vpop.f32.mrb[173].mxu0 }
 0x806   : > { %v3729_v3 = vpack.c.bf16 %v3723_v44, %v3723_v44  ;;  %9523 = vmatprep.subr.bf16.mxu1 %v12809_v34  ;;  %v4288_v44 = vpop.f32.mrb[174].mxu0 }
 0x807   : > { %v8695_v45 = vpop.f32.mrb[175].mxu0 }
 0x808   : > { %8683 = vmatmul.mubr.msk.bf16.gmra.mrb[160].mxu1 %vm433_vm1, %v3729_v3  ;;  %v4293_v3 = vpop.f32.mrb[176].mxu0 }
 0x809   : > { %9525 = vmatpush3.bf16.msra.mxu1 %v12836_v43  ;;  %4181 = vmatprep.mubr.f32.mxu1 %v3852_v0  ;;  %v8698_v0 = vpop.f32.mrb[177].mxu0 }
 0x80a   : > { %9527 = vmatprep.subr.bf16.mxu1 %v12837_v29 }
 0x80d   : > { %9529 = vmatpush3.bf16.msra.mxu1 %v12838_v37 }
 0x80e   : > { %9531 = vmatprep.subr.bf16.mxu1 %v12839_v23 }
 0x811   : > { %9533 = vmatpush3.bf16.msra.mxu1 %v12840_v8 }
 0x812   : > { %9535 = vmatprep.subr.bf16.mxu1 %v12841_v16 }
 0x815   : > { %9537 = vmatpush3.bf16.msra.mxu1 %v12842_v14 }
 0x816   : > { %9539 = vmatprep.subr.bf16.mxu1 %v12843_v50 }
 0x819   : > { %9541 = vmatpush3.bf16.msra.mxu1 %v12844_v2 }
 0x81a   : > { %8711 = vmatprep.subr.bf16.mxu1 %v9977_v54 }
 0x81c   : > { %4182 = vmatmul.mubr.f32.vlgmr.msra.gmra.mrb[164].mxu1 %v3851_v42 }
 0x81d   : > { %8712 = vmatpush3.bf16.msra.mxu1 %v9977_v54  ;;  %4186 = vmatprep.mubr.f32.mxu1 %v3859_v20  ;;  %v4298_v54 = vpop.f32.mrb[178].mxu0 }
 0x81e   : > { %8713 = vmatprep.subr.bf16.mxu1 %v9978_v15  ;;  %v8701_v42 = vpop.f32.mrb[179].mxu0 }
 0x81f   : > { %v4303_v20 = vpop.f32.mrb[180].mxu0 }
 0x820   : > { %4187 = vmatmul.mubr.f32.gmra.mrb[166].mxu1 %v3858_v49 }
 0x821   : > { %8714 = vmatpush3.bf16.msra.mxu1 %v9978_v15  ;;  %4191 = vmatprep.mubr.f32.mxu1 %v3866_v62  ;;  %v8704_v15 = vpop.f32.mrb[181].mxu0 }
 0x822   : > { %8715 = vmatprep.subr.bf16.mxu1 %v9979_v32  ;;  %v4308_v49 = vpop.f32.mrb[182].mxu0 }
 0x823   : > { %v8707_v62 = vpop.f32.mrb[183].mxu0 }
 0x824   : > { %4192 = vmatmul.mubr.f32.gmra.mrb[168].mxu1 %v3865_v60 }
 0x825   : > { %8716 = vmatpush3.bf16.msra.mxu1 %v9979_v32  ;;  %4196 = vmatprep.mubr.f32.mxu1 %v3873_v17  ;;  %v4313_v32 = vpop.f32.mrb[184].mxu0 }
 0x826   : > { %8717 = vmatprep.subr.bf16.mxu1 %v9980_v63  ;;  %v8710_v60 = vpop.f32.mrb[185].mxu0 }
 0x828   : > { %4197 = vmatmul.mubr.f32.gmra.mrb[170].mxu1 %v3872_v55 }
 0x829   : > { %8718 = vmatpush3.bf16.msra.mxu1 %v9980_v63  ;;  %4201 = vmatprep.mubr.f32.mxu1 %v3880_v35 }
 0x82a   : > { %9578 = vmatprep.subr.bf16.mxu1 %v12845_v47 }
 0x82c   : > { %4202 = vmatmul.mubr.f32.gmra.mrb[172].mxu1 %v3879_v33 }
 0x82d   : > { %4206 = vmatprep.mubr.f32.mxu1 %v3887_v6 }
 0x830   : > { %4207 = vmatmul.mubr.f32.gmra.mrb[174].mxu1 %v3886_v38 }
 0x831   : > { %4211 = vmatprep.mubr.f32.mxu1 %v3894_v19 }
 0x834   : > { %4212 = vmatmul.mubr.f32.gmra.mrb[176].mxu1 %v3893_v13 }
 0x8db   : > { %v8684_v17 = vpop.f32.mrb[160].mxu1 }
 0x8dc   : > { %v12023_v63 = vadd.f32 %v8684_v17, %v11966_v24  ;;  %v3825_v55 = vpop.f32.mrb[161].mxu1 }
 0x8dd   : > { %v12026_v35 = vadd.f32 %v3825_v55, %v11969_v30  ;;  %v8685_v33 = vpop.f32.mrb[162].mxu1 }
 0x8de   : > { %v3828_v6 = vpop.f32.mrb[163].mxu1 }
 0x8df   : > { %v12029_v38 = vadd.f32 %v3828_v6, %v11972_v51 }
 0x8ef   : > { %v7859_v19 = vpop.f32.mrb[164].mxu1 }
 0x8f0   : > { %v7860_v13 = vpop.f32.mrb[165].mxu1 }
 0x8f1   : > { %v7861_v5 = vadd.f32 %v7860_v13, %v7859_v19 }
 0x8f3   : > { %v7862_v45 = vpop.f32.mrb[166].mxu1  ;;  %v4184_v0 = vadd.f32 %v7861_v5, %v11974_v9 }
 0x8f4   : > { %v7863_v42 = vpop.f32.mrb[167].mxu1 }
 0x8f5   : > { %v4284_v15 = vadd.f32 %v4283_v58, %v4184_v0  ;;  %v7864_v62 = vadd.f32 %v7863_v42, %v7862_v45 }
 0x8f7   : > { %v7865_v24 = vpop.f32.mrb[168].mxu1  ;;  %v4189_v60 = vadd.f32 %v7864_v62, %v11976_v12  ;;  %v4441_v62 = vld [vmem:[#allocation4 + $0x948] sm:$0xff] }
 0x8f8   : > { %v7866_v17 = vpop.f32.mrb[169].mxu1 }
 0x8f9   : > { %v4289_v30 = vadd.f32 %v4288_v44, %v4189_v60  ;;  %v7867_v55 = vadd.f32 %v7866_v17, %v7865_v24  ;;  %v12847_v24 = vld [vmem:[#allocation64_spill] sm:$0xff]  ;;  %v4447_v60 = vld [vmem:[#allocation4 + $0x978] sm:$0xff] }
 0x8fa   : > { %v4455_v17 = vld [vmem:[#allocation4 + $0x9b8] sm:$0xff] }
 0x8fb   : > { %v4317_v33 = vpack.c.bf16 %v4289_v30, %v4284_v15  ;;  %v7868_v47 = vpop.f32.mrb[170].mxu1  ;;  %v4194_v51 = vadd.f32 %v7867_v55, %v11978_v26  ;;  %v4454_v30 = vld [vmem:[#allocation4 + $0x9b0] sm:$0xff] }
 0x8fc   : > { %v7869_v6 = vpop.f32.mrb[171].mxu1  ;;  %v4462_v55 = vld [vmem:[#allocation4 + $0x9f0] sm:$0xff] }
 0x8fd   : > { %v4294_v2 = vadd.f32 %v4293_v3, %v4194_v51  ;;  %v7870_v50 = vadd.f32 %v7869_v6, %v7868_v47  ;;  %8719 = vmatprep.mubr.msk.bf16.mxu1 %vm433_vm1, %v4317_v33  ;;  %v4461_v33 = vld [vmem:[#allocation4 + $0x9e8] sm:$0xff]  ;;  %v4468_v6 = vld [vmem:[#allocation4 + $0xa20] sm:$0xff] }
 0x8fe   : > { %v4469_v51 = vld [vmem:[#allocation4 + $0xa28] sm:$0xff] }
 0x8ff   : > { %v7871_v19 = vpop.f32.mrb[172].mxu1  ;;  %v4199_v9 = vadd.f32 %v7870_v50, %v11980_v27 }
 0x900   : > { %v7872_v58 = vpop.f32.mrb[173].mxu1 }
 0x901   : > { %v4299_v13 = vadd.f32 %v4298_v54, %v4199_v9  ;;  %v7873_v5 = vadd.f32 %v7872_v58, %v7871_v19  ;;  %v4476_v19 = vld [vmem:[#allocation4 + $0xa60] sm:$0xff]  ;;  %v4475_v9 = vld [vmem:[#allocation4 + $0xa58] sm:$0xff] }
 0x902   : > { %v4483_v58 = vld [vmem:[#allocation4 + $0xa98] sm:$0x1] }
 0x903   : > { %v4318_v45 = vpack.c.bf16 %v4299_v13, %v4294_v2  ;;  %v7874_v12 = vpop.f32.mrb[174].mxu1  ;;  %v4204_v44 = vadd.f32 %v7873_v5, %v11982_v28  ;;  %v4482_v13 = vld [vmem:[#allocation4 + $0xa90] sm:$0x1]  ;;  %v12848_v5 = vmov 0.0  }
 0x904   : > { %v7875_v0 = vpop.f32.mrb[175].mxu1 }
 0x905   : > { %v7876_v42 = vadd.f32 %v7875_v0, %v7874_v12  ;;  %v4304_v15 = vadd.f32 %v4303_v20, %v4204_v44  ;;  %8720 = vmatmul.mubr.msk.bf16.vlgmr.msra.gmra.mrb[72].mxu1 %vm433_vm1, %v4318_v45  ;;  %v4444_v45 = vld [vmem:[#allocation4 + $0x960] sm:$0xff]  ;;  %v9982_v12 = vld [vmem:[#allocation6 + $0xc8] sm:$0xff]   ;;  %v4451_v44 = vld [vmem:[#allocation4 + $0x998] sm:$0xff] }
 0x906   : > { %9580 = vmatpush3.bf16.msra.mxu1 %v10893_v4  ;;  %v9983_v0 = vld [vmem:[#allocation6 + $0xd0] sm:$0xff]  }
 0x907   : > { %9582 = vmatprep.subr.bf16.mxu1 %v10903_v22  ;;  %v7877_v26 = vpop.f32.mrb[176].mxu1  ;;  %v4209_v47 = vadd.f32 %v7876_v42, %v11984_v31  ;;  %v4440_v31 = vld [vmem:[#allocation4 + $0x940] sm:$0xff]  ;;  %v4458_v42 = vld [vmem:[#allocation4 + $0x9d0] sm:$0xff] }
 0x908   : > { %v7878_v27 = vpop.f32.mrb[177].mxu1 }
 0x909   : > { %v7879_v50 = vadd.f32 %v7878_v27, %v7877_v26  ;;  %v4309_v3 = vadd.f32 %v4308_v49, %v4209_v47  ;;  %v4448_v49 = vld [vmem:[#allocation4 + $0x980] sm:$0xff]  ;;  %v4465_v26 = vld [vmem:[#allocation4 + $0xa08] sm:$0xff]  ;;  %v12849_v27 = vld [vmem:[#allocation29_spill] sm:$0xff] }
 0x90a   : > { %9584 = vmatpush3.bf16.msra.mxu1 %v12827_v25  ;;  %v4472_v47 = vld [vmem:[#allocation4 + $0xa40] sm:$0xff] }
 0x90b   : > { %v4319_v2 = vpack.c.bf16 %v4309_v3, %v4304_v15  ;;  %9586 = vmatprep.subr.bf16.mxu1 %v12828_v61  ;;  %v4214_v28 = vadd.f32 %v7879_v50, %v11986_v59  ;;  %v12846_v59 = vmov 0.0|0.0   ;;  %v9984_v15 = vld [vmem:[#allocation6 + $0xd8] sm:$0xff]   ;;  %v4479_v50 = vld [vmem:[#allocation4 + $0xa78] sm:$0xff]  ;;  %v4486_v3 = vld [vmem:[#allocation4 + $0xab0] sm:$0x1] }
 0x90d   : > { %v4314_v54 = vadd.f32 %v4313_v32, %v4214_v28  ;;  %8723 = vmatprep.mubr.msk.bf16.mxu1 %vm433_vm1, %v4319_v2  ;;  %v9981_v32 = vld [vmem:[#allocation6 + $0xc0] sm:$0xff]   ;;  %v7929_v2 = vpop.f32.mrb[186].mxu0 }
 0x90e   : > { %9588 = vmatpush3.bf16.msra.mxu1 %v10959_v1  ;;  %v7930_v28 = vpop.f32.mrb[187].mxu0 }
 0x90f   : > { %v4320_v20 = vpack.c.bf16 %v4314_v54, %v4314_v54  ;;  %9590 = vmatprep.subr.bf16.mxu1 %v12829_v48  ;;  %v12081_v54 = vadd.f32 %v7930_v28, %v7929_v2 }
 0x911   : > { %8724 = vmatmul.mubr.msk.bf16.gmra.mrb[180].mxu1 %vm433_vm1, %v4320_v20  ;;  %v7932_v20 = vpop.f32.mrb[188].mxu0 }
 0x912   : > { %9592 = vmatpush3.bf16.msra.mxu1 %v10990_v36  ;;  %4672 = vmatprep.mubr.f32.mxu1 %v4441_v62  ;;  %v7933_v62 = vpop.f32.mrb[189].mxu0 }
 0x913   : > { %9594 = vmatprep.subr.bf16.mxu1 %v12830_v11 }
 0x916   : > { %9596 = vmatpush3.bf16.msra.mxu1 %v12787_v46 }
 0x917   : > { %9598 = vmatprep.subr.bf16.mxu1 %v12819_v56 }
 0x91a   : > { %9600 = vmatpush3.bf16.msra.mxu1 %v12831_v10 }
 0x91b   : > { %9602 = vmatprep.subr.bf16.mxu1 %v12821_v40 }
 0x91e   : > { %9604 = vmatpush3.bf16.msra.mxu1 %v12822_v7 }
 0x91f   : > { %9606 = vmatprep.subr.bf16.mxu1 %v12832_v52 }
 0x922   : > { %9608 = vmatpush3.bf16.msra.mxu1 %v12833_v57 }
 0x923   : > { %9641 = vmatprep.subr.bf16.mxu1 %v12846_v59 }
 0x925   : > { %4673 = vmatmul.mubr.f32.vlgmr.msra.gmra.mrb[178].mxu1 %v4440_v31  ;;  %v12083_v31 = vadd.f32 %v7933_v62, %v7932_v20 }
 0x926   : > { %9643 = vmatpush3.bf16.msra.mxu1 %v12847_v24  ;;  %4677 = vmatprep.mubr.f32.mxu1 %v4448_v49  ;;  %v7935_v49 = vpop.f32.mrb[190].mxu0 }
 0x927   : > { %8752 = vmatprep.subr.bf16.mxu1 %v9981_v32 }
 0x929   : > { %4678 = vmatmul.mubr.f32.gmra.mrb[184].mxu1 %v4447_v60 }
 0x92a   : > { %4682 = vmatprep.mubr.f32.mxu1 %v4455_v17 }
 0x92d   : > { %4683 = vmatmul.mubr.f32.gmra.mrb[186].mxu1 %v4454_v30 }
 0x92e   : > { %4687 = vmatprep.mubr.f32.mxu1 %v4462_v55 }
 0x931   : > { %4688 = vmatmul.mubr.f32.gmra.mrb[188].mxu1 %v4461_v33 }
 0x932   : > { %4692 = vmatprep.mubr.f32.mxu1 %v4469_v51 }
 0x935   : > { %4693 = vmatmul.mubr.f32.gmra.mrb[190].mxu1 %v4468_v6 }
 0x936   : > { %4697 = vmatprep.mubr.f32.mxu1 %v4476_v19 }
 0x939   : > { %4698 = vmatmul.mubr.f32.gmra.mrb[192].mxu1 %v4475_v9 }
 0x93a   : > { %4702 = vmatprep.mubr.f32.mxu1 %v4483_v58 }
 0x93d   : > { %4703 = vmatmul.mubr.f32.gmra.mrb[194].mxu1 %v4482_v13 }
 0x93e   : > { %8731 = vmatprep.mubr.msk.f32.mxu1 %vm10138_vm0, %v12848_v5 }
 0x941   : > { %8732 = vmatmul.mubr.msk.f32.vlgmr.msra.gmra.mrb[196].mxu1 %vm955_vm4, %v4444_v45 }
 0x942   : > { %8753 = vmatpush3.bf16.msra.mxu1 %v9981_v32  ;;  %8734 = vmatprep.mubr.msk.f32.mxu1 %vm10138_vm0, %v12848_v5  ;;  %v7936_v32 = vpop.f32.mrb[191].mxu0 }
 0x943   : > { %8754 = vmatprep.subr.bf16.mxu1 %v9982_v12  ;;  %v12085_v60 = vadd.f32 %v7936_v32, %v7935_v49  ;;  %v7938_v17 = vpop.f32.mrb[192].mxu0 }
 0x944   : > { %v7939_v30 = vpop.f32.mrb[193].mxu0 }
 0x945   : > { %8735 = vmatmul.mubr.msk.f32.gmra.mrb[198].mxu1 %vm955_vm4, %v4451_v44  ;;  %v12087_v55 = vadd.f32 %v7939_v30, %v7938_v17  ;;  %v7941_v33 = vpop.f32.mrb[194].mxu0 }
 0x946   : > { %8755 = vmatpush3.bf16.msra.mxu1 %v9982_v12  ;;  %8737 = vmatprep.mubr.msk.f32.mxu1 %vm10138_vm0, %v12848_v5  ;;  %v7942_v51 = vpop.f32.mrb[195].mxu0 }
 0x947   : > { %8756 = vmatprep.subr.bf16.mxu1 %v9983_v0  ;;  %v12089_v6 = vadd.f32 %v7942_v51, %v7941_v33  ;;  %v7944_v19 = vpop.f32.mrb[196].mxu0 }
 0x948   : > { %v7945_v9 = vpop.f32.mrb[197].mxu0 }
 0x949   : > { %8738 = vmatmul.mubr.msk.f32.gmra.mrb[200].mxu1 %vm955_vm4, %v4458_v42  ;;  %v12091_v58 = vadd.f32 %v7945_v9, %v7944_v19  ;;  %v7947_v13 = vpop.f32.mrb[198].mxu0 }
 0x94a   : > { %8757 = vmatpush3.bf16.msra.mxu1 %v9983_v0  ;;  %8740 = vmatprep.mubr.msk.f32.mxu1 %vm10138_vm0, %v12848_v5  ;;  %v7948_v45 = vpop.f32.mrb[199].mxu0 }
 0x94b   : > { %8758 = vmatprep.subr.bf16.mxu1 %v9984_v15  ;;  %v12093_v12 = vadd.f32 %v7948_v45, %v7947_v13  ;;  %v8035_v44 = vpop.f32.mrb[200].mxu0 }
 0x94c   : > { %v8036_v0 = vpop.f32.mrb[201].mxu0 }
 0x94d   : > { %8741 = vmatmul.mubr.msk.f32.gmra.mrb[202].mxu1 %vm955_vm4, %v4465_v26  ;;  %v12095_v42 = vadd.f32 %v8036_v0, %v8035_v44 }
 0x94e   : > { %8759 = vmatpush3.bf16.msra.mxu1 %v9984_v15  ;;  %8743 = vmatprep.mubr.msk.f32.mxu1 %vm10138_vm0, %v12848_v5  ;;  %v8038_v15 = vpop.f32.mrb[202].mxu0 }
 0x94f   : > { %9709 = vmatprep.subr.bf16.mxu1 %v12849_v27  ;;  %v8039_v26 = vpop.f32.mrb[203].mxu0 }
 0x950   : > { %v8041_v27 = vpop.f32.mrb[204].mxu0 }
 0x951   : > { %8744 = vmatmul.mubr.msk.f32.gmra.mrb[204].mxu1 %vm955_vm4, %v4472_v47  ;;  %v12097_v47 = vadd.f32 %v8039_v26, %v8038_v15 }
 0x952   : > { %8746 = vmatprep.mubr.msk.f32.mxu1 %vm10138_vm0, %v12848_v5 }
 0x955   : > { %8747 = vmatmul.mubr.msk.f32.gmra.mrb[206].mxu1 %vm955_vm4, %v4479_v50  ;;  %v8042_v50 = vpop.f32.mrb[205].mxu0 }
 0x956   : > { %8749 = vmatprep.mubr.msk.f32.mxu1 %vm10138_vm0, %v12848_v5  ;;  %v8044_v2 = vpop.f32.mrb[206].mxu0 }
 0x957   : > { %v8045_v28 = vpop.f32.mrb[207].mxu0 }
 0x958   : > { %v12101_v20 = vadd.f32 %v8045_v28, %v8044_v2  ;;  %v8047_v62 = vpop.f32.mrb[208].mxu0 }
 0x959   : > { %8750 = vmatmul.mubr.msk.f32.gmra.mrb[208].mxu1 %vm955_vm4, %v4486_v3  ;;  %v12099_v3 = vadd.f32 %v8042_v50, %v8041_v27  ;;  %v8048_v49 = vpop.f32.mrb[209].mxu0 }
 0x95a   : > { %v12103_v32 = vadd.f32 %v8048_v49, %v8047_v62  ;;  %v8050_v17 = vpop.f32.mrb[210].mxu0 }
 0x95b   : > { %v8051_v30 = vpop.f32.mrb[211].mxu0 }
 0x95c   : > { %v12105_v33 = vadd.f32 %v8051_v30, %v8050_v17  ;;  %v8053_v51 = vpop.f32.mrb[212].mxu0 }
 0x95d   : > { %v8054_v19 = vpop.f32.mrb[213].mxu0 }
 0x95e   : > { %v12107_v9 = vadd.f32 %v8054_v19, %v8053_v51  ;;  %v8105_v13 = vpop.f32.mrb[214].mxu0 }
 0x95f   : > { %v8106_v45 = vpop.f32.mrb[215].mxu0 }
 0x960   : > { %v8107_v44 = vadd.f32 %v8106_v45, %v8105_v13  ;;  %v8108_v0 = vpop.f32.mrb[216].mxu0 }
 0x961   : > { %v8109_v15 = vpop.f32.mrb[217].mxu0 }
 0x962   : > { %v8110_v26 = vadd.f32 %v8109_v15, %v8108_v0  ;;  %v8111_v27 = vpop.f32.mrb[218].mxu0 }
 0x963   : > { %v8112_v50 = vpop.f32.mrb[219].mxu0 }
 0x964   : > { %v8113_v2 = vadd.f32 %v8112_v50, %v8111_v27  ;;  %v8114_v28 = vpop.f32.mrb[220].mxu0 }
 0x965   : > { %v8115_v49 = vpop.f32.mrb[221].mxu0 }
 0x966   : > { %v8116_v30 = vadd.f32 %v8115_v49, %v8114_v28  ;;  %v8117_v59 = vpop.f32.mrb[222].mxu0 }
 0x967   : > { %v8118_v13 = vpop.f32.mrb[223].mxu0 }
 0x968   : > { %v8119_v57 = vadd.f32 %v8118_v13, %v8117_v59  ;;  %v8120_v0 = vpop.f32.mrb[224].mxu0 }
 0x969   : > { %v8121_v27 = vpop.f32.mrb[225].mxu0 }
 0x96a   : > { %v8122_v50 = vadd.f32 %v8121_v27, %v8120_v0  ;;  %v8123_v52 = vpop.f32.mrb[226].mxu0 }
 0x96b   : > { %v8124_v7 = vpop.f32.mrb[227].mxu0 }
 0x9e4   : > { %v8725_v62 = vpop.f32.mrb[180].mxu1 }
 0x9e5   : > { %v12110_v24 = vadd.f32 %v8725_v62, %v12023_v63  ;;  %v4416_v17 = vpop.f32.mrb[181].mxu1  ;;  %v8125_v63 = vadd.f32 %v8124_v7, %v8123_v52  ;;  %v8158_v62 = vpop.f32.mrb[228].mxu0 }
 0x9e6   : > { %v12113_v51 = vadd.f32 %v4416_v17, %v12026_v35  ;;  %v8726_v19 = vpop.f32.mrb[182].mxu1  ;;  %v8159_v40 = vpop.f32.mrb[229].mxu0 }
 0x9e7   : > { %v4419_v45 = vpop.f32.mrb[183].mxu1  ;;  %v8160_v28 = vadd.f32 %v8159_v40, %v8158_v62  ;;  %v8161_v49 = vpop.f32.mrb[230].mxu0 }
 0x9e8   : > { %v12116_v15 = vadd.f32 %v4419_v45, %v12029_v38  ;;  %v8162_v10 = vpop.f32.mrb[231].mxu0 }
 0x9e9   : > { %v12118_v35 = vadd.f32 %v8160_v28, %v8107_v44  ;;  %v8163_v17 = vadd.f32 %v8162_v10, %v8161_v49  ;;  %v8164_v19 = vpop.f32.mrb[232].mxu0 }
 0x9ea   : > { %v8165_v56 = vpop.f32.mrb[233].mxu0 }
 0x9eb   : > { %v12120_v59 = vadd.f32 %v8163_v17, %v8110_v26  ;;  %v8166_v13 = vadd.f32 %v8165_v56, %v8164_v19  ;;  %v8167_v38 = vpop.f32.mrb[234].mxu0 }
 0x9ec   : > { %v8168_v45 = vpop.f32.mrb[235].mxu0 }
 0x9ed   : > { %v12122_v46 = vadd.f32 %v8166_v13, %v8113_v2  ;;  %v8169_v0 = vadd.f32 %v8168_v45, %v8167_v38  ;;  %v8170_v27 = vpop.f32.mrb[236].mxu0 }
 0x9ee   : > { %v8171_v7 = vpop.f32.mrb[237].mxu0 }
 0x9ef   : > { %v12124_v52 = vadd.f32 %v8169_v0, %v8116_v30  ;;  %v8172_v40 = vadd.f32 %v8171_v7, %v8170_v27  ;;  %v8173_v62 = vpop.f32.mrb[238].mxu0 }
 0x9f0   : > { %v8174_v11 = vpop.f32.mrb[239].mxu0 }
 0x9f1   : > { %v12126_v44 = vadd.f32 %v8172_v40, %v8119_v57  ;;  %v8175_v10 = vadd.f32 %v8174_v11, %v8173_v62  ;;  %v8176_v28 = vpop.f32.mrb[240].mxu0 }
 0x9f2   : > { %v8177_v26 = vpop.f32.mrb[241].mxu0 }
 0x9f3   : > { %v12128_v56 = vadd.f32 %v8175_v10, %v8122_v50  ;;  %v8178_v19 = vadd.f32 %v8177_v26, %v8176_v28 }
 0x9f5   : > { %v12130_v13 = vadd.f32 %v8178_v19, %v8125_v63 }
 0x9f8   : > { %v7982_v49 = vpop.f32.mrb[178].mxu1 }
 0x9f9   : > { %v7983_v17 = vpop.f32.mrb[179].mxu1 }
 0x9fa   : > { %v7984_v2 = vadd.f32 %v7983_v17, %v7982_v49 }
 0x9fc   : > { %v4675_v38 = vadd.f32 %v7984_v2, %v12081_v54  ;;  %v7985_v30 = vpop.f32.mrb[184].mxu1 }
 0x9fd   : > { %v7986_v45 = vpop.f32.mrb[185].mxu1 }
 0x9fe   : > { %v7987_v0 = vadd.f32 %v7986_v45, %v7985_v30  ;;  %v4775_v27 = vadd.f32 %v12095_v42, %v4675_v38 }
 0xa00   : > { %v4680_v57 = vadd.f32 %v7987_v0, %v12083_v31  ;;  %v7988_v11 = vpop.f32.mrb[186].mxu1 }
 0xa01   : > { %v7989_v7 = vpop.f32.mrb[187].mxu1 }
 0xa02   : > { %v7990_v40 = vadd.f32 %v7989_v7, %v7988_v11  ;;  %v4780_v62 = vadd.f32 %v12097_v47, %v4680_v57 }
 0xa04   : > { %v4685_v50 = vadd.f32 %v7990_v40, %v12085_v60  ;;  %v7991_v10 = vpop.f32.mrb[188].mxu1 }
 0xa05   : > { %v7992_v28 = vpop.f32.mrb[189].mxu1 }
 0xa06   : > { %v7993_v63 = vadd.f32 %v7992_v28, %v7991_v10  ;;  %v4785_v49 = vadd.f32 %v12099_v3, %v4685_v50 }
 0xa08   : > { %v4690_v54 = vadd.f32 %v7993_v63, %v12087_v55  ;;  %v7994_v26 = vpop.f32.mrb[190].mxu1 }
 0xa09   : > { %v7995_v17 = vpop.f32.mrb[191].mxu1 }
 0xa0a   : > { %v7996_v19 = vadd.f32 %v7995_v17, %v7994_v26  ;;  %v4790_v42 = vadd.f32 %v12101_v20, %v4690_v54 }
 0xa0c   : > { %v4695_v31 = vadd.f32 %v7996_v19, %v12089_v6  ;;  %v7997_v2 = vpop.f32.mrb[192].mxu1 }
 0xa0d   : > { %v7998_v38 = vpop.f32.mrb[193].mxu1 }
 0xa0e   : > { %v7999_v30 = vadd.f32 %v7998_v38, %v7997_v2  ;;  %v4795_v47 = vadd.f32 %v12103_v32, %v4695_v31 }
 0xa10   : > { %v4700_v60 = vadd.f32 %v7999_v30, %v12091_v58  ;;  %v8000_v45 = vpop.f32.mrb[194].mxu1 }
 0xa11   : > { %v8001_v0 = vpop.f32.mrb[195].mxu1 }
 0xa12   : > { %v8002_v57 = vadd.f32 %v8001_v0, %v8000_v45  ;;  %v4800_v3 = vadd.f32 %v12105_v33, %v4700_v60  ;;  %v5062_v60 = vld [vmem:[#allocation4 + $0xbc0] sm:$0xff]  ;;  %v5061_v45 = vld [vmem:[#allocation4 + $0xbb8] sm:$0xff] }
 0xa13   : > { %v12852_v0 = vld [vmem:[#allocation65_spill] sm:$0xff] }
 0xa14   : > { %v4705_v55 = vadd.f32 %v8002_v57, %v12093_v12  ;;  %v4874_v11 = vpop.f32.mrb[196].mxu1  ;;  %v5069_v57 = vld [vmem:[#allocation4 + $0xbf8] sm:$0xff] }
 0xa15   : > { %v4875_v7 = vadd.f32 %v4874_v11, %v4775_v27  ;;  %v8733_v40 = vpop.f32.mrb[197].mxu1  ;;  %v5075_v11 = vld [vmem:[#allocation4 + $0xc28] sm:$0x1] }
 0xa16   : > { %v4805_v20 = vadd.f32 %v12107_v9, %v4705_v55  ;;  %v5076_v55 = vld [vmem:[#allocation4 + $0xc30] sm:$0x1] }
 0xa18   : > { %v4879_v6 = vpop.f32.mrb[198].mxu1 }
 0xa19   : > { %v4880_v50 = vadd.f32 %v4879_v6, %v4780_v62  ;;  %v8736_v10 = vpop.f32.mrb[199].mxu1 }
 0xa1b   : > { %v4908_v28 = vpack.c.bf16 %v4880_v50, %v4875_v7  ;;  %v12166_v7 = vpop.f32.mrb[242].mxu0 }
 0xa1c   : > { %v4884_v63 = vpop.f32.mrb[200].mxu1  ;;  %v8774_v40 = vpop.f32.mrb[243].mxu0 }
 0xa1d   : > { %v4885_v32 = vadd.f32 %v4884_v63, %v4785_v49  ;;  %v8739_v54 = vpop.f32.mrb[201].mxu1  ;;  %8760 = vmatprep.mubr.msk.bf16.mxu1 %vm433_vm1, %v4908_v28 }
 0xa20   : > { %v4889_v58 = vpop.f32.mrb[202].mxu1 }
 0xa21   : > { %v4890_v26 = vadd.f32 %v4889_v58, %v4790_v42  ;;  %v8742_v17 = vpop.f32.mrb[203].mxu1 }
 0xa23   : > { %v4909_v33 = vpack.c.bf16 %v4890_v26, %v4885_v32 }
 0xa24   : > { %v4894_v19 = vpop.f32.mrb[204].mxu1 }
 0xa25   : > { %v4895_v12 = vadd.f32 %v4894_v19, %v4795_v47  ;;  %8761 = vmatmul.mubr.msk.bf16.vlgmr.msra.gmra.mrb[72].mxu1 %vm433_vm1, %v4909_v33  ;;  %v8745_v27 = vpop.f32.mrb[205].mxu1  ;;  %v5054_v47 = vld [vmem:[#allocation4 + $0xb80] sm:$0xff] }
 0xa26   : > { %9711 = vmatpush3.bf16.msra.mxu1 %v12803_v21  ;;  %v5034_v21 = vld [vmem:[#allocation4 + $0xae0] sm:$0xff]  ;;  %v5635_v27 = vld [vmem:[#allocation4 + $0xcb8] sm:$0xff] }
 0xa27   : > { %9713 = vmatprep.subr.bf16.mxu1 %v12805_v39  ;;  %v12850_v39 = vld [vmem:[#allocation49_spill] sm:$0xff]  ;;  %v5628_v19 = vld [vmem:[#allocation4 + $0xc80] sm:$0xff] }
 0xa28   : > { %v4899_v9 = vpop.f32.mrb[206].mxu1  ;;  %5759 = vmatprep.mubr.f32.mxu0 %v5628_v19 }
 0xa29   : > { %v4900_v62 = vadd.f32 %v4899_v9, %v4800_v3  ;;  %v8748_v31 = vpop.f32.mrb[207].mxu1  ;;  %v5068_v3 = vld [vmem:[#allocation4 + $0xbf0] sm:$0xff] }
 0xa2a   : > { %9715 = vmatpush3.bf16.msra.mxu1 %v12806_v41  ;;  %v9985_v41 = vld [vmem:[#allocation6 + $0xe0] sm:$0xff]   ;;  %v5634_v9 = vld [vmem:[#allocation4 + $0xcb0] sm:$0xff] }
 0xa2b   : > { %v4910_v49 = vpack.c.bf16 %v4900_v62, %v4895_v12  ;;  %9717 = vmatprep.subr.bf16.mxu1 %v12807_v18  ;;  %v12851_v18 = vld [vmem:[#allocation50_spill] sm:$0xff]  ;;  %v5642_v62 = vld [vmem:[#allocation4 + $0xcf0] sm:$0xff]  ;;  %v5641_v31 = vld [vmem:[#allocation4 + $0xce8] sm:$0xff] }
 0xa2c   : > { %v4904_v42 = vpop.f32.mrb[208].mxu1  ;;  %v5627_v12 = vld [vmem:[#allocation4 + $0xc78] sm:$0xff] }
 0xa2d   : > { %v4905_v2 = vadd.f32 %v4904_v42, %v4805_v20  ;;  %8764 = vmatprep.mubr.msk.bf16.mxu1 %vm433_vm1, %v4910_v49  ;;  %v8751_v38 = vpop.f32.mrb[209].mxu1  ;;  %v12168_v20 = vpop.f32.mrb[244].mxu0  ;;  %5760 = vmatmul.mubr.f32.gmra.mrb[2].mxu0 %v5627_v12  ;;  %v5649_v49 = vld [vmem:[#allocation4 + $0xd28] sm:$0xff]  ;;  %v5648_v42 = vld [vmem:[#allocation4 + $0xd20] sm:$0xff] }
 0xa2e   : > { %9719 = vmatpush3.bf16.msra.mxu1 %v12808_v53  ;;  %v5033_v53 = vld [vmem:[#allocation4 + $0xad8] sm:$0xff]  ;;  %v8777_v6 = vpop.f32.mrb[245].mxu0  ;;  %5764 = vmatprep.mubr.f32.mxu0 %v5635_v27 }
 0xa2f   : > { %v4911_v30 = vpack.c.bf16 %v4905_v2, %v4905_v2  ;;  %9721 = vmatprep.subr.bf16.mxu1 %v12809_v34  ;;  %v5041_v34 = vld [vmem:[#allocation4 + $0xb18] sm:$0xff]  ;;  %v12170_v50 = vpop.f32.mrb[246].mxu0  ;;  %v5656_v2 = vld [vmem:[#allocation4 + $0xd60] sm:$0xff] }
 0xa30   : > { %v8780_v10 = vpop.f32.mrb[247].mxu0  ;;  %v5655_v38 = vld [vmem:[#allocation4 + $0xd58] sm:$0xff] }
 0xa31   : > { %8765 = vmatmul.mubr.msk.bf16.gmra.mrb[212].mxu1 %vm433_vm1, %v4911_v30  ;;  %v12172_v28 = vpop.f32.mrb[248].mxu0  ;;  %5765 = vmatmul.mubr.f32.gmra.mrb[4].mxu0 %v5634_v9  ;;  %v5663_v30 = vld [vmem:[#allocation4 + $0xd98] sm:$0x1] }
 0xa32   : > { %9723 = vmatpush3.bf16.msra.mxu1 %v12836_v43  ;;  %5363 = vmatprep.mubr.f32.mxu1 %v5034_v21  ;;  %v9986_v43 = vld [vmem:[#allocation6 + $0xe8] sm:$0xff]   ;;  %v8783_v63 = vpop.f32.mrb[249].mxu0 }
 0xa33   : > { %9725 = vmatprep.subr.bf16.mxu1 %v12837_v29  ;;  %v5040_v29 = vld [vmem:[#allocation4 + $0xb10] sm:$0xff]  ;;  %v12174_v32 = vpop.f32.mrb[250].mxu0  ;;  %5769 = vmatprep.mubr.f32.mxu0 %v5642_v62 }
 0xa34   : > { %v8786_v54 = vpop.f32.mrb[251].mxu0  ;;  %v5662_v21 = vld [vmem:[#allocation4 + $0xd90] sm:$0x1] }
 0xa35   : > { %v12176_v58 = vpop.f32.mrb[252].mxu0  ;;  %5770 = vmatmul.mubr.f32.gmra.mrb[6].mxu0 %v5641_v31 }
 0xa36   : > { %9727 = vmatpush3.bf16.msra.mxu1 %v12838_v37  ;;  %v5048_v37 = vld [vmem:[#allocation4 + $0xb50] sm:$0xff]  ;;  %v8789_v26 = vpop.f32.mrb[253].mxu0  ;;  %5774 = vmatprep.mubr.f32.mxu0 %v5649_v49 }
 0xa37   : > { %9729 = vmatprep.subr.bf16.mxu1 %v12839_v23  ;;  %v9987_v23 = vld [vmem:[#allocation6 + $0xf0] sm:$0xff]   ;;  %v12178_v17 = vpop.f32.mrb[254].mxu0 }
 0xa38   : > { %v8792_v33 = vpop.f32.mrb[255].mxu0 }
 0xa39   : > { %5775 = vmatmul.mubr.f32.gmra.mrb[8].mxu0 %v5648_v42 }
 0xa3a   : > { %9731 = vmatpush3.bf16.msra.mxu1 %v12840_v8  ;;  %v5047_v8 = vld [vmem:[#allocation4 + $0xb48] sm:$0xff]  ;;  %5779 = vmatprep.mubr.f32.mxu0 %v5656_v2 }
 0xa3b   : > { %9733 = vmatprep.subr.bf16.mxu1 %v12841_v16  ;;  %v5055_v16 = vld [vmem:[#allocation4 + $0xb88] sm:$0xff] }
 0xa3d   : > { %5780 = vmatmul.mubr.f32.gmra.mrb[10].mxu0 %v5655_v38 }
 0xa3e   : > { %9735 = vmatpush3.bf16.msra.mxu1 %v12842_v14  ;;  %v9988_v14 = vld [vmem:[#allocation6 + $0xf8] sm:$0xff]   ;;  %5784 = vmatprep.mubr.f32.mxu0 %v5663_v30 }
 0xa3f   : > { %9737 = vmatprep.subr.bf16.mxu1 %v12850_v39  ;;  %v5625_v39 = vld [vmem:[#allocation4 + $0xc68] sm:$0xff] }
 0xa41   : > { %5785 = vmatmul.mubr.f32.gmra.mrb[12].mxu0 %v5662_v21 }
 0xa42   : > { %9739 = vmatpush3.bf16.msra.mxu1 %v12851_v18  ;;  %5954 = vmatprep.mubr.f32.mxu0 %v5625_v39  ;;  %v5632_v18 = vld [vmem:[#allocation4 + $0xca0] sm:$0xff] }
 0xa43   : > { %8793 = vmatprep.subr.bf16.mxu1 %v9985_v41 }
 0xa45   : > { %5364 = vmatmul.mubr.f32.vlgmr.msra.gmra.mrb[210].mxu1 %v5033_v53  ;;  %v5631_v53 = vld [vmem:[#allocation4 + $0xc98] sm:$0xff] }
 0xa46   : > { %8794 = vmatpush3.bf16.msra.mxu1 %v9985_v41  ;;  %5368 = vmatprep.mubr.f32.mxu1 %v5041_v34  ;;  %v5624_v41 = vld [vmem:[#allocation4 + $0xc60] sm:$0xff]  ;;  %v5639_v34 = vld [vmem:[#allocation4 + $0xcd8] sm:$0xff] }
 0xa47   : > { %8795 = vmatprep.subr.bf16.mxu1 %v9986_v43  ;;  %5955 = vmatmul.mubr.f32.vlgmr.msra.gmra.mrb[14].mxu0 %v5624_v41 }
 0xa48   : > { %5959 = vmatprep.mubr.f32.mxu0 %v5632_v18 }
 0xa49   : > { %5369 = vmatmul.mubr.f32.gmra.mrb[216].mxu1 %v5040_v29  ;;  %v5646_v29 = vld [vmem:[#allocation4 + $0xd10] sm:$0xff] }
 0xa4a   : > { %8796 = vmatpush3.bf16.msra.mxu1 %v9986_v43  ;;  %5373 = vmatprep.mubr.f32.mxu1 %v5048_v37  ;;  %v5638_v43 = vld [vmem:[#allocation4 + $0xcd0] sm:$0xff]  ;;  %v5645_v37 = vld [vmem:[#allocation4 + $0xd08] sm:$0xff] }
 0xa4b   : > { %8797 = vmatprep.subr.bf16.mxu1 %v9987_v23  ;;  %5960 = vmatmul.mubr.f32.gmra.mrb[16].mxu0 %v5631_v53 }
 0xa4c   : > { %5964 = vmatprep.mubr.f32.mxu0 %v5639_v34 }
 0xa4d   : > { %5374 = vmatmul.mubr.f32.gmra.mrb[218].mxu1 %v5047_v8  ;;  %v5652_v8 = vld [vmem:[#allocation4 + $0xd40] sm:$0xff] }
 0xa4e   : > { %8798 = vmatpush3.bf16.msra.mxu1 %v9987_v23  ;;  %5378 = vmatprep.mubr.f32.mxu1 %v5055_v16  ;;  %v5653_v23 = vld [vmem:[#allocation4 + $0xd48] sm:$0xff]  ;;  %v5660_v16 = vld [vmem:[#allocation4 + $0xd80] sm:$0xff] }
 0xa4f   : > { %8799 = vmatprep.subr.bf16.mxu1 %v9988_v14  ;;  %5965 = vmatmul.mubr.f32.gmra.mrb[18].mxu0 %v5638_v43 }
 0xa50   : > { %5969 = vmatprep.mubr.f32.mxu0 %v5646_v29 }
 0xa51   : > { %5379 = vmatmul.mubr.f32.gmra.mrb[220].mxu1 %v5054_v47  ;;  %v5667_v47 = vld [vmem:[#allocation4 + $0xdb8] sm:$0x1] }
 0xa52   : > { %8800 = vmatpush3.bf16.msra.mxu1 %v9988_v14  ;;  %5383 = vmatprep.mubr.f32.mxu1 %v5062_v60  ;;  %v5659_v14 = vld [vmem:[#allocation4 + $0xd78] sm:$0xff]  ;;  %v5666_v60 = vld [vmem:[#allocation4 + $0xdb0] sm:$0x1] }
 0xa53   : > { %9776 = vmatprep.subr.bf16.mxu1 %v12852_v0  ;;  %5970 = vmatmul.mubr.f32.gmra.mrb[20].mxu0 %v5645_v37  ;;  %v5622_v37 = vld [vmem:[#allocation4 + $0xc50] sm:$0xff] }
 0xa54   : > { %5974 = vmatprep.mubr.f32.mxu0 %v5653_v23  ;;  %v12861_v23 = vmov 0.0|0.0  }
 0xa55   : > { %5384 = vmatmul.mubr.f32.gmra.mrb[222].mxu1 %v5061_v45 }
 0xa56   : > { %5388 = vmatprep.mubr.f32.mxu1 %v5069_v57 }
 0xa57   : > { %5975 = vmatmul.mubr.f32.gmra.mrb[22].mxu0 %v5652_v8  ;;  %v12862_v8 = vld [vmem:[#allocation64_spill] sm:$0xff] }
 0xa58   : > { %5979 = vmatprep.mubr.f32.mxu0 %v5660_v16  ;;  %v5629_v16 = vld [vmem:[#allocation4 + $0xc88] sm:$0xff] }
 0xa59   : > { %5389 = vmatmul.mubr.f32.gmra.mrb[224].mxu1 %v5068_v3 }
 0xa5a   : > { %5393 = vmatprep.mubr.f32.mxu1 %v5076_v55 }
 0xa5b   : > { %5980 = vmatmul.mubr.f32.gmra.mrb[24].mxu0 %v5659_v14  ;;  %v5637_v14 = vld [vmem:[#allocation4 + $0xcc8] sm:$0xff] }
 0xa5c   : > { %5984 = vmatprep.mubr.f32.mxu0 %v5667_v47  ;;  %v5636_v47 = vld [vmem:[#allocation4 + $0xcc0] sm:$0xff] }
 0xa5d   : > { %5394 = vmatmul.mubr.f32.gmra.mrb[226].mxu1 %v5075_v11 }
 0xa5f   : > { %5985 = vmatmul.mubr.f32.gmra.mrb[26].mxu0 %v5666_v60  ;;  %v5644_v60 = vld [vmem:[#allocation4 + $0xd00] sm:$0xff] }
 0xa60   : > { %8864 = vmatprep.mubr.msk.f32.mxu0 %vm10138_vm0, %v12848_v5 }
 0xb04   : > { %v8766_v45 = vpop.f32.mrb[212].mxu1 }
 0xb05   : > { %v12183_v0 = vadd.f32 %v8766_v45, %v12110_v24  ;;  %v5007_v57 = vpop.f32.mrb[213].mxu1  ;;  %v5643_v45 = vld [vmem:[#allocation4 + $0xcf8] sm:$0xff] }
 0xb06   : > { %v12186_v3 = vadd.f32 %v5007_v57, %v12113_v51  ;;  %v8767_v55 = vpop.f32.mrb[214].mxu1  ;;  %v5651_v57 = vld [vmem:[#allocation4 + $0xd38] sm:$0xff] }
 0xb07   : > { %v5010_v11 = vpop.f32.mrb[215].mxu1  ;;  %v5650_v55 = vld [vmem:[#allocation4 + $0xd30] sm:$0xff] }
 0xb08   : > { %v12189_v40 = vadd.f32 %v5010_v11, %v12116_v15  ;;  %v5658_v11 = vld [vmem:[#allocation4 + $0xd70] sm:$0xff] }
 0xb18   : > { %v8211_v6 = vpop.f32.mrb[210].mxu1 }
 0xb19   : > { %v8212_v10 = vpop.f32.mrb[211].mxu1 }
 0xb1a   : > { %v8213_v63 = vadd.f32 %v8212_v10, %v8211_v6  ;;  %v5657_v6 = vld [vmem:[#allocation4 + $0xd68] sm:$0xff] }
 0xb1b   : > { %v5665_v10 = vld [vmem:[#allocation4 + $0xda8] sm:$0x1] }
 0xb1c   : > { %v8214_v54 = vpop.f32.mrb[216].mxu1  ;;  %v5366_v26 = vadd.f32 %v8213_v63, %v12118_v35  ;;  %v5664_v63 = vld [vmem:[#allocation4 + $0xda0] sm:$0x1] }
 0xb1d   : > { %v8215_v33 = vpop.f32.mrb[217].mxu1 }
 0xb1e   : > { %v5466_v19 = vadd.f32 %v12166_v7, %v5366_v26  ;;  %v8216_v24 = vadd.f32 %v8215_v33, %v8214_v54  ;;  %v5626_v54 = vld [vmem:[#allocation4 + $0xc70] sm:$0xff]  ;;  %v5633_v26 = vld [vmem:[#allocation4 + $0xca8] sm:$0xff]  ;;  %v5640_v33 = vld [vmem:[#allocation4 + $0xce0] sm:$0xff] }
 0xb20   : > { %v8217_v12 = vpop.f32.mrb[218].mxu1  ;;  %v5371_v27 = vadd.f32 %v8216_v24, %v12120_v59  ;;  %v5654_v24 = vld [vmem:[#allocation4 + $0xd50] sm:$0xff] }
 0xb21   : > { %v8218_v51 = vpop.f32.mrb[219].mxu1 }
 0xb22   : > { %v5471_v9 = vadd.f32 %v12168_v20, %v5371_v27  ;;  %v8219_v62 = vadd.f32 %v8218_v51, %v8217_v12  ;;  %v5661_v12 = vld [vmem:[#allocation4 + $0xd88] sm:$0xff]  ;;  %v5668_v27 = vld [vmem:[#allocation4 + $0xdc0] sm:$0x1]  ;;  %v8281_v51 = vpop.f32.mrb[0].mxu0 }
 0xb24   : > { %v5499_v31 = vpack.c.bf16 %v5471_v9, %v5466_v19  ;;  %v8220_v15 = vpop.f32.mrb[220].mxu1  ;;  %v5376_v49 = vadd.f32 %v8219_v62, %v12122_v46  ;;  %v5647_v19 = vld [vmem:[#allocation4 + $0xd18] sm:$0xff]  ;;  %v8282_v9 = vpop.f32.mrb[1].mxu0 }
 0xb25   : > { %v8221_v42 = vpop.f32.mrb[221].mxu1  ;;  %v8283_v62 = vadd.f32 %v8282_v9, %v8281_v51 }
 0xb26   : > { %v5476_v2 = vadd.f32 %v12170_v50, %v5376_v49  ;;  %v8222_v38 = vadd.f32 %v8221_v42, %v8220_v15  ;;  %8801 = vmatprep.mubr.msk.bf16.mxu1 %vm433_vm1, %v5499_v31  ;;  %v8284_v31 = vpop.f32.mrb[2].mxu0 }
 0xb27   : > { %v8285_v15 = vpop.f32.mrb[3].mxu0 }
 0xb28   : > { %v8223_v35 = vpop.f32.mrb[222].mxu1  ;;  %v5381_v7 = vadd.f32 %v8222_v38, %v12124_v52  ;;  %v12247_v49 = vadd.f32 %v8285_v15, %v8284_v31  ;;  %v8287_v42 = vpop.f32.mrb[4].mxu0 }
 0xb29   : > { %v8224_v30 = vpop.f32.mrb[223].mxu1 }
 0xb2a   : > { %v5481_v59 = vadd.f32 %v12172_v28, %v5381_v7  ;;  %v8225_v21 = vadd.f32 %v8224_v30, %v8223_v35 }
 0xb2c   : > { %v5500_v39 = vpack.c.bf16 %v5481_v59, %v5476_v2  ;;  %v8226_v20 = vpop.f32.mrb[224].mxu1  ;;  %v5386_v41 = vadd.f32 %v8225_v21, %v12126_v44  ;;  %v8288_v2 = vpop.f32.mrb[5].mxu0 }
 0xb2d   : > { %v8227_v18 = vpop.f32.mrb[225].mxu1  ;;  %v12249_v38 = vadd.f32 %v8288_v2, %v8287_v42  ;;  %v8290_v35 = vpop.f32.mrb[6].mxu0 }
 0xb2e   : > { %v8228_v53 = vadd.f32 %v8227_v18, %v8226_v20  ;;  %v5486_v46 = vadd.f32 %v12174_v32, %v5386_v41  ;;  %8802 = vmatmul.mubr.msk.bf16.vlgmr.msra.gmra.mrb[72].mxu1 %vm433_vm1, %v5500_v39  ;;  %v8291_v7 = vpop.f32.mrb[7].mxu0 }
 0xb2f   : > { %9778 = vmatpush3.bf16.msra.mxu1 %v10893_v4  ;;  %v12251_v30 = vadd.f32 %v8291_v7, %v8290_v35  ;;  %v8293_v59 = vpop.f32.mrb[8].mxu0 }
 0xb30   : > { %9780 = vmatprep.subr.bf16.mxu1 %v10903_v22  ;;  %v8229_v50 = vpop.f32.mrb[226].mxu1  ;;  %v5391_v52 = vadd.f32 %v8228_v53, %v12128_v56  ;;  %v5623_v22 = vld [vmem:[#allocation4 + $0xc58] sm:$0xff]  ;;  %v12855_v56 = vld [vmem:[#allocation12_spill] sm:$0xff]  ;;  %v8294_v21 = vpop.f32.mrb[9].mxu0 }
 0xb31   : > { %v8230_v34 = vpop.f32.mrb[227].mxu1  ;;  %v12253_v39 = vadd.f32 %v8294_v21, %v8293_v59  ;;  %v8296_v20 = vpop.f32.mrb[10].mxu0 }
 0xb32   : > { %v8231_v28 = vadd.f32 %v8230_v34, %v8229_v50  ;;  %v5491_v43 = vadd.f32 %v12176_v58, %v5391_v52  ;;  %v12857_v58 = vld [vmem:[#allocation18_spill] sm:$0xff]  ;;  %v8297_v41 = vpop.f32.mrb[11].mxu0 }
 0xb33   : > { %9782 = vmatpush3.bf16.msra.mxu1 %v12827_v25  ;;  %v12853_v25 = vld [vmem:[#allocation69_spill] sm:$0xff]  ;;  %v12255_v18 = vadd.f32 %v8297_v41, %v8296_v20  ;;  %v8299_v53 = vpop.f32.mrb[12].mxu0 }
 0xb34   : > { %v5501_v44 = vpack.c.bf16 %v5491_v43, %v5486_v46  ;;  %9784 = vmatprep.subr.bf16.mxu1 %v12828_v61  ;;  %v5396_v32 = vadd.f32 %v8231_v28, %v12130_v13  ;;  %v12854_v61 = vld [vmem:[#allocation28_spill] sm:$0xff]  ;;  %v12856_v13 = vld [vmem:[#allocation13_spill] sm:$0xff]  ;;  %v8300_v46 = vpop.f32.mrb[13].mxu0 }
 0xb35   : > { %v12257_v50 = vadd.f32 %v8300_v46, %v8299_v53  ;;  %v8387_v52 = vpop.f32.mrb[14].mxu0 }
 0xb36   : > { %v5496_v29 = vadd.f32 %v12178_v17, %v5396_v32  ;;  %8805 = vmatprep.mubr.msk.bf16.mxu1 %vm433_vm1, %v5501_v44  ;;  %v12859_v17 = vld [vmem:[#allocation22_spill] sm:$0xff]  ;;  %v8388_v34 = vpop.f32.mrb[15].mxu0 }
 0xb37   : > { %9786 = vmatpush3.bf16.msra.mxu1 %v10959_v1  ;;  %v12858_v1 = vld [vmem:[#allocation19_spill] sm:$0xff]  ;;  %v8389_v28 = vadd.f32 %v8388_v34, %v8387_v52  ;;  %v8390_v43 = vpop.f32.mrb[16].mxu0 }
 0xb38   : > { %v5502_v4 = vpack.c.bf16 %v5496_v29, %v5496_v29  ;;  %9788 = vmatprep.subr.bf16.mxu1 %v12829_v48  ;;  %v12860_v48 = vld [vmem:[#allocation23_spill] sm:$0xff]  ;;  %v8391_v44 = vpop.f32.mrb[17].mxu0 }
 0xb39   : > { %v8392_v32 = vadd.f32 %v8391_v44, %v8390_v43  ;;  %v8393_v29 = vpop.f32.mrb[18].mxu0 }
 0xb3a   : > { %8806 = vmatmul.mubr.msk.bf16.gmra.mrb[228].mxu1 %vm433_vm1, %v5502_v4  ;;  %v8394_v4 = vpop.f32.mrb[19].mxu0 }
 0xb3b   : > { %9790 = vmatpush3.bf16.msra.mxu1 %v10990_v36  ;;  %5854 = vmatprep.mubr.f32.mxu1 %v5623_v22  ;;  %v5630_v36 = vld [vmem:[#allocation4 + $0xc90] sm:$0xff]  ;;  %v8395_v22 = vadd.f32 %v8394_v4, %v8393_v29 }
 0xb3c   : > { %9792 = vmatprep.subr.bf16.mxu1 %v12853_v25  ;;  %v8396_v25 = vpop.f32.mrb[20].mxu0 }
 0xb3f   : > { %9794 = vmatpush3.bf16.msra.mxu1 %v12854_v61  ;;  %v8397_v61 = vpop.f32.mrb[21].mxu0 }
 0xb40   : > { %9796 = vmatprep.subr.bf16.mxu1 %v12855_v56  ;;  %v8398_v56 = vadd.f32 %v8397_v61, %v8396_v25 }
 0xb43   : > { %9798 = vmatpush3.bf16.msra.mxu1 %v12856_v13  ;;  %v8399_v13 = vpop.f32.mrb[22].mxu0 }
 0xb44   : > { %9800 = vmatprep.subr.bf16.mxu1 %v12857_v58  ;;  %v8400_v58 = vpop.f32.mrb[23].mxu0 }
 0xb47   : > { %9802 = vmatpush3.bf16.msra.mxu1 %v12858_v1  ;;  %v8401_v1 = vadd.f32 %v8400_v58, %v8399_v13 }
 0xb48   : > { %9804 = vmatprep.subr.bf16.mxu1 %v12859_v17  ;;  %v8402_v17 = vpop.f32.mrb[24].mxu0 }
 0xb4b   : > { %9806 = vmatpush3.bf16.msra.mxu1 %v12860_v48  ;;  %v8403_v48 = vpop.f32.mrb[25].mxu0 }
 0xb4c   : > { %9839 = vmatprep.subr.bf16.mxu1 %v12861_v23 }
 0xb4e   : > { %5855 = vmatmul.mubr.f32.vlgmr.msra.gmra.mrb[232].mxu1 %v5622_v37  ;;  %v8404_v37 = vadd.f32 %v8403_v48, %v8402_v17 }
 0xb4f   : > { %9841 = vmatpush3.bf16.msra.mxu1 %v12862_v8  ;;  %5859 = vmatprep.mubr.f32.mxu1 %v5630_v36  ;;  %v8405_v36 = vpop.f32.mrb[26].mxu0 }
 0xb50   : > { %v8406_v8 = vpop.f32.mrb[27].mxu0 }
 0xb52   : > { %5860 = vmatmul.mubr.f32.gmra.mrb[234].mxu1 %v5629_v16  ;;  %v9989_v16 = vld [vmem:[#allocation6 + $0x100] sm:$0xff]  }
 0xb53   : > { %5864 = vmatprep.mubr.f32.mxu1 %v5637_v14  ;;  %v8407_v14 = vadd.f32 %v8406_v8, %v8405_v36  ;;  %8834 = vmatprep.subr.bf16.mxu1 %v9989_v16 }
 0xb56   : > { %5865 = vmatmul.mubr.f32.gmra.mrb[236].mxu1 %v5636_v47  ;;  %v9990_v47 = vld [vmem:[#allocation6 + $0x108] sm:$0xff]  }
 0xb57   : > { %5869 = vmatprep.mubr.f32.mxu1 %v5644_v60  ;;  %v9991_v60 = vld [vmem:[#allocation6 + $0x110] sm:$0xff]  }
 0xb5a   : > { %5870 = vmatmul.mubr.f32.gmra.mrb[238].mxu1 %v5643_v45  ;;  %v9992_v45 = vld [vmem:[#allocation6 + $0x118] sm:$0xff]  }
 0xb5b   : > { %5874 = vmatprep.mubr.f32.mxu1 %v5651_v57 }
 0xb5e   : > { %5875 = vmatmul.mubr.f32.gmra.mrb[240].mxu1 %v5650_v55 }
 0xb5f   : > { %5879 = vmatprep.mubr.f32.mxu1 %v5658_v11 }
 0xb62   : > { %5880 = vmatmul.mubr.f32.gmra.mrb[242].mxu1 %v5657_v6 }
 0xb63   : > { %5884 = vmatprep.mubr.f32.mxu1 %v5665_v10 }
 0xb66   : > { %5885 = vmatmul.mubr.f32.gmra.mrb[244].mxu1 %v5664_v63 }
 0xb67   : > { %8813 = vmatprep.mubr.msk.f32.mxu1 %vm10138_vm0, %v12848_v5 }
 0xb6a   : > { %8814 = vmatmul.mubr.msk.f32.vlgmr.msra.gmra.mrb[246].mxu1 %vm955_vm4, %v5626_v54 }
 0xb6b   : > { %8816 = vmatprep.mubr.msk.f32.mxu1 %vm10138_vm0, %v12848_v5  ;;  %8835 = vmatpush3.bf16.msra.mxu1 %v9989_v16 }
 0xb6c   : > { %8836 = vmatprep.subr.bf16.mxu1 %v9990_v47 }
 0xb6e   : > { %8817 = vmatmul.mubr.msk.f32.gmra.mrb[248].mxu1 %vm955_vm4, %v5633_v26 }
 0xb6f   : > { %8819 = vmatprep.mubr.msk.f32.mxu1 %vm10138_vm0, %v12848_v5  ;;  %8837 = vmatpush3.bf16.msra.mxu1 %v9990_v47 }
 0xb70   : > { %8838 = vmatprep.subr.bf16.mxu1 %v9991_v60 }
 0xb72   : > { %8820 = vmatmul.mubr.msk.f32.gmra.mrb[250].mxu1 %vm955_vm4, %v5640_v33 }
 0xb73   : > { %8822 = vmatprep.mubr.msk.f32.mxu1 %vm10138_vm0, %v12848_v5  ;;  %8839 = vmatpush3.bf16.msra.mxu1 %v9991_v60 }
 0xb74   : > { %8840 = vmatprep.subr.bf16.mxu1 %v9992_v45 }
 0xb76   : > { %8823 = vmatmul.mubr.msk.f32.gmra.mrb[252].mxu1 %vm955_vm4, %v5647_v19 }
 0xb77   : > { %8825 = vmatprep.mubr.msk.f32.mxu1 %vm10138_vm0, %v12848_v5  ;;  %8841 = vmatpush3.bf16.msra.mxu1 %v9992_v45 }
 0xb7a   : > { %8826 = vmatmul.mubr.msk.f32.gmra.mrb[254].mxu1 %vm955_vm4, %v5654_v24 }
 0xb7b   : > { %8828 = vmatprep.mubr.msk.f32.mxu1 %vm10138_vm0, %v12848_v5 }
 0xb7e   : > { %8829 = vmatmul.mubr.msk.f32.gmra.mrb[0].mxu1 %vm955_vm4, %v5661_v12 }
 0xb7f   : > { %8831 = vmatprep.mubr.msk.f32.mxu1 %vm10138_vm0, %v12848_v5 }
 0xb82   : > { %8832 = vmatmul.mubr.msk.f32.gmra.mrb[2].mxu1 %vm955_vm4, %v5668_v27 }
 0xc0d   : > { %v8807_v57 = vpop.f32.mrb[228].mxu1 }
 0xc0e   : > { %v12260_v55 = vadd.f32 %v8807_v57, %v12183_v0  ;;  %v5598_v11 = vpop.f32.mrb[229].mxu1 }
 0xc0f   : > { %v12263_v6 = vadd.f32 %v5598_v11, %v12186_v3  ;;  %v8808_v10 = vpop.f32.mrb[230].mxu1 }
 0xc10   : > { %v5601_v63 = vpop.f32.mrb[231].mxu1 }
 0xc11   : > { %v12266_v54 = vadd.f32 %v5601_v63, %v12189_v40 }
 0xc21   : > { %v8334_v26 = vpop.f32.mrb[232].mxu1 }
 0xc22   : > { %v8335_v33 = vpop.f32.mrb[233].mxu1 }
 0xc23   : > { %v8336_v19 = vadd.f32 %v8335_v33, %v8334_v26  ;;  %v6801_v33 = vld [vmem:[#allocation7] ss:$0 sm:$0xff] }
 0xc25   : > { %v5857_v24 = vadd.f32 %v8336_v19, %v8283_v62  ;;  %v8337_v12 = vpop.f32.mrb[234].mxu1 }
 0xc26   : > { %v8338_v27 = vpop.f32.mrb[235].mxu1 }
 0xc27   : > { %v8339_v51 = vadd.f32 %v8338_v27, %v8337_v12  ;;  %v5957_v9 = vadd.f32 %v8389_v28, %v5857_v24 }
 0xc29   : > { %v5862_v0 = vadd.f32 %v8339_v51, %v12247_v49  ;;  %v8340_v31 = vpop.f32.mrb[236].mxu1 }
 0xc2a   : > { %v8341_v15 = vpop.f32.mrb[237].mxu1 }
 0xc2b   : > { %v8342_v42 = vadd.f32 %v8341_v15, %v8340_v31  ;;  %v5962_v3 = vadd.f32 %v8392_v32, %v5862_v0 }
 0xc2d   : > { %v5867_v2 = vadd.f32 %v8342_v42, %v12249_v38  ;;  %v8343_v35 = vpop.f32.mrb[238].mxu1 }
 0xc2e   : > { %v8344_v7 = vpop.f32.mrb[239].mxu1 }
 0xc2f   : > { %v8345_v40 = vadd.f32 %v8344_v7, %v8343_v35  ;;  %v5967_v59 = vadd.f32 %v8395_v22, %v5867_v2 }
 0xc31   : > { %v5872_v21 = vadd.f32 %v8345_v40, %v12251_v30  ;;  %v8346_v20 = vpop.f32.mrb[240].mxu1 }
 0xc32   : > { %v8347_v62 = vpop.f32.mrb[241].mxu1 }
 0xc33   : > { %v8348_v41 = vadd.f32 %v8347_v62, %v8346_v20  ;;  %v5972_v53 = vadd.f32 %v8398_v56, %v5872_v21 }
 0xc35   : > { %v5877_v46 = vadd.f32 %v8348_v41, %v12253_v39  ;;  %v8349_v52 = vpop.f32.mrb[242].mxu1 }
 0xc36   : > { %v8350_v49 = vpop.f32.mrb[243].mxu1 }
 0xc37   : > { %v8351_v34 = vadd.f32 %v8350_v49, %v8349_v52  ;;  %v5977_v28 = vadd.f32 %v8401_v1, %v5877_v46 }
 0xc39   : > { %v5882_v43 = vadd.f32 %v8351_v34, %v12255_v18  ;;  %v8352_v44 = vpop.f32.mrb[244].mxu1 }
 0xc3a   : > { %v8353_v38 = vpop.f32.mrb[245].mxu1 }
 0xc3b   : > { %v8354_v32 = vadd.f32 %v8353_v38, %v8352_v44  ;;  %v5982_v29 = vadd.f32 %v8404_v37, %v5882_v43  ;;  %v6234_v44 = vld [vmem:[%s12496_s6 + $0x18] sm:$0xff]  ;;  %v6235_v38 = vld [vmem:[%s12496_s6 + $0x20] sm:$0xff] }
 0xc3d   : > { %v5887_v4 = vadd.f32 %v8354_v32, %v12257_v50  ;;  %v6056_v22 = vpop.f32.mrb[246].mxu1  ;;  %v6236_v32 = vld [vmem:[%s12496_s6 + $0x28] sm:$0xff] }
 0xc3e   : > { %v6057_v30 = vadd.f32 %v6056_v22, %v5957_v9  ;;  %v8815_v25 = vpop.f32.mrb[247].mxu1  ;;  %v6239_v22 = vld [vmem:[%s12496_s6 + $0x40] sm:$0xff] }
 0xc3f   : > { %v5987_v61 = vadd.f32 %v8407_v14, %v5887_v4  ;;  %v6238_v4 = vld [vmem:[%s12496_s6 + $0x38] sm:$0xff]  ;;  %v6241_v25 = vld [vmem:[%s12496_s6 + $0x50] sm:$0xff] }
 0xc41   : > { %v6061_v13 = vpop.f32.mrb[248].mxu1 }
 0xc42   : > { %v6062_v56 = vadd.f32 %v6061_v13, %v5962_v3  ;;  %v8818_v58 = vpop.f32.mrb[249].mxu1  ;;  %v6243_v13 = vld [vmem:[%s12496_s6 + $0x60] sm:$0xff] }
 0xc43   : > { %v6245_v58 = vld [vmem:[%s12496_s6 + $0x70] sm:$0xff] }
 0xc44   : > { %v6090_v39 = vpack.c.bf16 %v6062_v56, %v6057_v30  ;;  %v6240_v30 = vld [vmem:[%s12496_s6 + $0x48] sm:$0xff] }
 0xc45   : > { %v6066_v17 = vpop.f32.mrb[250].mxu1  ;;  %v6244_v56 = vld [vmem:[%s12496_s6 + $0x68] sm:$0xff] }
 0xc46   : > { %v6067_v48 = vadd.f32 %v6066_v17, %v5967_v59  ;;  %v8821_v36 = vpop.f32.mrb[251].mxu1  ;;  %8842 = vmatprep.mubr.msk.bf16.mxu1 %vm433_vm1, %v6090_v39  ;;  %v6246_v39 = vld [vmem:[%s12496_s6 + $0x78] sm:$0xff]  ;;  %v6247_v17 = vld [vmem:[%s12496_s6 + $0x80] sm:$0xff] }
 0xc47   : > { %v6249_v36 = vld [vmem:[%s12496_s6 + $0x90] sm:$0xff] }
 0xc49   : > { %v6071_v18 = vpop.f32.mrb[252].mxu1 }
 0xc4a   : > { %v6072_v1 = vadd.f32 %v6071_v18, %v5972_v53  ;;  %v8824_v8 = vpop.f32.mrb[253].mxu1  ;;  %v6250_v18 = vld [vmem:[%s12496_s6 + $0x98] sm:$0xff] }
 0xc4b   : > { %v6252_v8 = vld [vmem:[%s12496_s6 + $0xa8] sm:$0xff] }
 0xc4c   : > { %v6091_v16 = vpack.c.bf16 %v6072_v1, %v6067_v48  ;;  %v6248_v48 = vld [vmem:[%s12496_s6 + $0x88] sm:$0xff]  ;;  %v6251_v1 = vld [vmem:[%s12496_s6 + $0xa0] sm:$0xff] }
 0xc4d   : > { %v6076_v37 = vpop.f32.mrb[254].mxu1 }
 0xc4e   : > { %v6077_v47 = vadd.f32 %v6076_v37, %v5977_v28  ;;  %v8827_v50 = vpop.f32.mrb[255].mxu1  ;;  %8843 = vmatmul.mubr.msk.bf16.vlgmr.msra.gmra.mrb[72].mxu1 %vm433_vm1, %v6091_v16  ;;  %v6253_v16 = vld [vmem:[%s12496_s6 + $0xb0] sm:$0xff]  ;;  %v6254_v37 = vld [vmem:[%s12496_s6 + $0xb8] sm:$0xff] }
 0xc51   : > { %v6081_v60 = vpop.f32.mrb[0].mxu1 }
 0xc52   : > { %v6082_v14 = vadd.f32 %v6081_v60, %v5982_v29  ;;  %v8830_v45 = vpop.f32.mrb[1].mxu1  ;;  %v6237_v29 = vld [vmem:[%s12496_s6 + $0x30] sm:$0xff] }
 0xc54   : > { %v6092_v57 = vpack.c.bf16 %v6082_v14, %v6077_v47  ;;  %v6255_v47 = vld [vmem:[%s12496_s6 + $0xc0] sm:$0xf] }
 0xc55   : > { %v6086_v11 = vpop.f32.mrb[2].mxu1 }
 0xc56   : > { %v6087_v10 = vadd.f32 %v6086_v11, %v5987_v61  ;;  %v8833_v63 = vpop.f32.mrb[3].mxu1  ;;  %8846 = vmatprep.mubr.msk.bf16.mxu1 %vm433_vm1, %v6092_v57  ;;  %v6242_v61 = vld [vmem:[%s12496_s6 + $0x58] sm:$0xff] }
 0xc58   : > { %v6093_v26 = vpack.c.bf16 %v6087_v10, %v6087_v10 }
 0xc5a   : > { %8847 = vmatmul.mubr.msk.bf16.gmra.mrb[4].mxu1 %vm433_vm1, %v6093_v26 }
 0xd21   : > { %v8844_v19 = vpop.f32.mrb[72].mxu1 }
 0xd22   : > { %v6219_v24 = vadd.f32 %v8844_v19, %v6801_v33  ;;  %v6173_v12 = vpop.f32.mrb[73].mxu1 }
 0xd23   : > { %v6217_v27 = vadd.f32 %v6801_v33, %v6173_v12  ;;  %v8845_v51 = vpop.f32.mrb[74].mxu1 }
 0xd24   : > { %v6220_v9 = vadd.f32 %v8845_v51, %v6801_v33  ;;  %v6176_v0 = vpop.f32.mrb[75].mxu1  ;;  %v6226_v15 = vmax.f32 %v6219_v24, 0.0 }
 0xd25   : > { %v6218_v31 = vadd.f32 %v6801_v33, %v6176_v0  ;;  %v6224_v3 = vmax.f32 %v6217_v27, 0.0 }
 0xd26   : > { %v6227_v42 = vmax.f32 %v6220_v9, 0.0 }
 0xd27   : > { %v6225_v2 = vmax.f32 %v6218_v31, 0.0 }
 0xd28   : > { %v9846_v35 = vpack.c.bf16 %v6227_v42, %v6226_v15 }
 0xd29   : > { %v9843_v7 = vpack.c.bf16 %v6225_v2, %v6224_v3 }
 0xd2b   : > { %9844 = vmatpush3.bf16.msra.mxu0 %v9843_v7 }
 0xd2c   : > { %9845 = vmatprep.subr.bf16.mxu0 %v12861_v23 }
 0xd2d   : > { %v8848_v40 = vpop.f32.mrb[4].mxu1 }
 0xd2e   : > { %v6209_v59 = vadd.f32 %v8848_v40, %v12260_v55  ;;  %v6189_v21 = vpop.f32.mrb[5].mxu1 }
 0xd2f   : > { %v6207_v20 = vadd.f32 %v6189_v21, %v12263_v6  ;;  %v8849_v62 = vpop.f32.mrb[6].mxu1  ;;  %9847 = vmatpush3.bf16.msra.mxu0 %v9846_v35  ;;  %v6231_v6 = vld [vmem:[%s12496_s6] sm:$0xff] }
 0xd30   : > { %v6192_v41 = vpop.f32.mrb[7].mxu1  ;;  %9848 = vmatprep.subr.bf16.mxu0 %v12861_v23  ;;  %v6223_v28 = vadd.f32 %v6801_v33, %v6209_v59  ;;  %v6232_v23 = vld [vmem:[%s12496_s6 + $0x8] sm:$0xff] }
 0xd31   : > { %v6221_v53 = vadd.f32 %v6801_v33, %v6207_v20  ;;  %v6208_v46 = vadd.f32 %v6192_v41, %v12266_v54  ;;  %v6233_v54 = vld [vmem:[%s12496_s6 + $0x10] sm:$0xff] }
 0xd32   : > { %v6230_v55 = vmax.f32 %v6223_v28, 0.0 }
 0xd33   : > { %v6222_v52 = vadd.f32 %v6801_v33, %v6208_v46  ;;  %v6228_v49 = vmax.f32 %v6221_v53, 0.0 }
 0xd35   : > { %v6229_v34 = vmax.f32 %v6222_v52, 0.0 }
 0xd37   : > { %v9849_v43 = vpack.c.bf16 %v6229_v34, %v6228_v49 }
 0xd39   : > { %9850 = vmatpush3.bf16.msra.mxu0 %v9849_v43 }
 0xd3a   : > { %8862 = vmatprep.subr.mxu0 %v12848_v5 }
 0xd3d   : > { %8863 = vmatpush3.msk.msra.mxu0 %vm6332_vm5, %v6230_v55 }
 0xd3e   : > { %8865 = vmatmul.mubr.msk.f32.vlgmr.msra.gmra.mrb[28].mxu0 %vm6256_vm6, %v6231_v6 }
 0xd3f   : > { %8867 = vmatprep.mubr.msk.f32.mxu0 %vm10138_vm0, %v12848_v5 }
 0xd42   : > { %8868 = vmatmul.mubr.msk.f32.gmra.mrb[30].mxu0 %vm6256_vm6, %v6232_v23 }
 0xd43   : > { %8870 = vmatprep.mubr.msk.f32.mxu0 %vm10138_vm0, %v12848_v5 }
 0xd46   : > { %8871 = vmatmul.mubr.msk.f32.gmra.mrb[32].mxu0 %vm6256_vm6, %v6233_v54 }
 0xd47   : > { %8873 = vmatprep.mubr.msk.f32.mxu0 %vm10138_vm0, %v12848_v5 }
 0xd4a   : > { %8874 = vmatmul.mubr.msk.f32.gmra.mrb[34].mxu0 %vm6256_vm6, %v6234_v44 }
 0xd4b   : > { %8876 = vmatprep.mubr.msk.f32.mxu0 %vm10138_vm0, %v12848_v5 }
 0xd4e   : > { %8877 = vmatmul.mubr.msk.f32.gmra.mrb[36].mxu0 %vm6256_vm6, %v6235_v38 }
 0xd4f   : > { %8879 = vmatprep.mubr.msk.f32.mxu0 %vm10138_vm0, %v12848_v5 }
 0xd52   : > { %8880 = vmatmul.mubr.msk.f32.gmra.mrb[38].mxu0 %vm6256_vm6, %v6236_v32 }
 0xd53   : > { %8882 = vmatprep.mubr.msk.f32.mxu0 %vm10138_vm0, %v12848_v5 }
 0xd56   : > { %8883 = vmatmul.mubr.msk.f32.gmra.mrb[40].mxu0 %vm6256_vm6, %v6237_v29 }
 0xd57   : > { %8885 = vmatprep.mubr.msk.f32.mxu0 %vm10138_vm0, %v12848_v5 }
 0xd5a   : > { %8886 = vmatmul.mubr.msk.f32.gmra.mrb[42].mxu0 %vm6256_vm6, %v6238_v4 }
 0xd5b   : > { %8888 = vmatprep.mubr.msk.f32.mxu0 %vm10138_vm0, %v12848_v5 }
 0xd5e   : > { %8889 = vmatmul.mubr.msk.f32.gmra.mrb[44].mxu0 %vm6256_vm6, %v6239_v22 }
 0xd5f   : > { %8891 = vmatprep.mubr.msk.f32.mxu0 %vm10138_vm0, %v12848_v5 }
 0xd62   : > { %8892 = vmatmul.mubr.msk.f32.gmra.mrb[46].mxu0 %vm6256_vm6, %v6240_v30 }
 0xd63   : > { %8894 = vmatprep.mubr.msk.f32.mxu0 %vm10138_vm0, %v12848_v5 }
 0xd66   : > { %8895 = vmatmul.mubr.msk.f32.gmra.mrb[48].mxu0 %vm6256_vm6, %v6241_v25 }
 0xd67   : > { %8897 = vmatprep.mubr.msk.f32.mxu0 %vm10138_vm0, %v12848_v5 }
 0xd6a   : > { %8898 = vmatmul.mubr.msk.f32.gmra.mrb[50].mxu0 %vm6256_vm6, %v6242_v61 }
 0xd6b   : > { %8900 = vmatprep.mubr.msk.f32.mxu0 %vm10138_vm0, %v12848_v5 }
 0xd6e   : > { %8901 = vmatmul.mubr.msk.f32.gmra.mrb[52].mxu0 %vm6256_vm6, %v6243_v13 }
 0xd6f   : > { %8903 = vmatprep.mubr.msk.f32.mxu0 %vm10138_vm0, %v12848_v5 }
 0xd72   : > { %8904 = vmatmul.mubr.msk.f32.gmra.mrb[54].mxu0 %vm6256_vm6, %v6244_v56 }
 0xd73   : > { %8906 = vmatprep.mubr.msk.f32.mxu0 %vm10138_vm0, %v12848_v5 }
 0xd76   : > { %8907 = vmatmul.mubr.msk.f32.gmra.mrb[56].mxu0 %vm6256_vm6, %v6245_v58 }
 0xd77   : > { %8909 = vmatprep.mubr.msk.f32.mxu0 %vm10138_vm0, %v12848_v5 }
 0xd7a   : > { %8910 = vmatmul.mubr.msk.f32.gmra.mrb[58].mxu0 %vm6256_vm6, %v6246_v39 }
 0xd7b   : > { %8912 = vmatprep.mubr.msk.f32.mxu0 %vm10138_vm0, %v12848_v5 }
 0xd7e   : > { %8913 = vmatmul.mubr.msk.f32.gmra.mrb[60].mxu0 %vm6256_vm6, %v6247_v17 }
 0xd7f   : > { %8915 = vmatprep.mubr.msk.f32.mxu0 %vm10138_vm0, %v12848_v5 }
 0xd82   : > { %8916 = vmatmul.mubr.msk.f32.gmra.mrb[62].mxu0 %vm6256_vm6, %v6248_v48 }
 0xd83   : > { %8918 = vmatprep.mubr.msk.f32.mxu0 %vm10138_vm0, %v12848_v5 }
 0xd86   : > { %8919 = vmatmul.mubr.msk.f32.gmra.mrb[64].mxu0 %vm6256_vm6, %v6249_v36 }
 0xd87   : > { %8921 = vmatprep.mubr.msk.f32.mxu0 %vm10138_vm0, %v12848_v5 }
 0xd8a   : > { %8922 = vmatmul.mubr.msk.f32.gmra.mrb[66].mxu0 %vm6256_vm6, %v6250_v18 }
 0xd8b   : > { %8924 = vmatprep.mubr.msk.f32.mxu0 %vm10138_vm0, %v12848_v5 }
 0xd8e   : > { %8925 = vmatmul.mubr.msk.f32.gmra.mrb[68].mxu0 %vm6256_vm6, %v6251_v1 }
 0xd8f   : > { %8927 = vmatprep.mubr.msk.f32.mxu0 %vm10138_vm0, %v12848_v5 }
 0xd92   : > { %8928 = vmatmul.mubr.msk.f32.gmra.mrb[70].mxu0 %vm6256_vm6, %v6252_v8 }
 0xd93   : > { %8930 = vmatprep.mubr.msk.f32.mxu0 %vm10138_vm0, %v12848_v5 }
 0xd96   : > { %8931 = vmatmul.mubr.msk.f32.gmra.mrb[72].mxu0 %vm6256_vm6, %v6253_v16 }
 0xd97   : > { %8933 = vmatprep.mubr.msk.f32.mxu0 %vm10138_vm0, %v12848_v5 }
 0xd9a   : > { %8934 = vmatmul.mubr.msk.f32.gmra.mrb[74].mxu0 %vm6256_vm6, %v6254_v37 }
 0xd9b   : > { %8936 = vmatprep.mubr.msk.f32.mxu0 %vm10138_vm0, %v12848_v5 }
 0xd9e   : > { %8937 = vmatmul.mubr.msk.f32.gmra.mrb[76].mxu0 %vm6256_vm6, %v6255_v47 }
 0xe11   : > { %v6402_v50 = vpop.f32.mrb[28].mxu0 }
 0xe12   : > { %6526 = vst.msk [vmem:[%s12436_s26] sm:$0xff] %vm433_vm1, %v6402_v50  ;;  %v8866_v5 = vpop.f32.mrb[29].mxu0 }
 0xe15   : > { %v6407_v60 = vpop.f32.mrb[30].mxu0 }
 0xe16   : > { %6527 = vst.msk [vmem:[%s12436_s26 + $0x8] sm:$0xff] %vm433_vm1, %v6407_v60  ;;  %v8869_v14 = vpop.f32.mrb[31].mxu0 }
 0xe19   : > { %v6412_v45 = vpop.f32.mrb[32].mxu0 }
 0xe1a   : > { %6528 = vst.msk [vmem:[%s12436_s26 + $0x10] sm:$0xff] %vm433_vm1, %v6412_v45  ;;  %v8872_v57 = vpop.f32.mrb[33].mxu0 }
 0xe1d   : > { %v6417_v11 = vpop.f32.mrb[34].mxu0 }
 0xe1e   : > { %6529 = vst.msk [vmem:[%s12436_s26 + $0x18] sm:$0xff] %vm433_vm1, %v6417_v11  ;;  %v8875_v10 = vpop.f32.mrb[35].mxu0 }
 0xe21   : > { %v6422_v63 = vpop.f32.mrb[36].mxu0 }
 0xe22   : > { %6530 = vst.msk [vmem:[%s12436_s26 + $0x20] sm:$0xff] %vm433_vm1, %v6422_v63  ;;  %v8878_v26 = vpop.f32.mrb[37].mxu0 }
 0xe25   : > { %v6427_v33 = vpop.f32.mrb[38].mxu0 }
 0xe26   : > { %6531 = vst.msk [vmem:[%s12436_s26 + $0x28] sm:$0xff] %vm433_vm1, %v6427_v33  ;;  %v8881_v19 = vpop.f32.mrb[39].mxu0 }
 0xe29   : > { %v6432_v24 = vpop.f32.mrb[40].mxu0 }
 0xe2a   : > { %6532 = vst.msk [vmem:[%s12436_s26 + $0x30] sm:$0xff] %vm433_vm1, %v6432_v24  ;;  %v8884_v12 = vpop.f32.mrb[41].mxu0 }
 0xe2d   : > { %v6437_v27 = vpop.f32.mrb[42].mxu0 }
 0xe2e   : > { %6533 = vst.msk [vmem:[%s12436_s26 + $0x38] sm:$0xff] %vm433_vm1, %v6437_v27  ;;  %v8887_v51 = vpop.f32.mrb[43].mxu0 }
 0xe31   : > { %v6442_v9 = vpop.f32.mrb[44].mxu0 }
 0xe32   : > { %6534 = vst.msk [vmem:[%s12436_s26 + $0x40] sm:$0xff] %vm433_vm1, %v6442_v9  ;;  %v8890_v0 = vpop.f32.mrb[45].mxu0 }
 0xe35   : > { %v6447_v31 = vpop.f32.mrb[46].mxu0 }
 0xe36   : > { %6535 = vst.msk [vmem:[%s12436_s26 + $0x48] sm:$0xff] %vm433_vm1, %v6447_v31  ;;  %v8893_v15 = vpop.f32.mrb[47].mxu0 }
 0xe39   : > { %v6452_v42 = vpop.f32.mrb[48].mxu0 }
 0xe3a   : > { %6536 = vst.msk [vmem:[%s12436_s26 + $0x50] sm:$0xff] %vm433_vm1, %v6452_v42  ;;  %v8896_v3 = vpop.f32.mrb[49].mxu0 }
 0xe3d   : > { %v6457_v2 = vpop.f32.mrb[50].mxu0 }
 0xe3e   : > { %6537 = vst.msk [vmem:[%s12436_s26 + $0x58] sm:$0xff] %vm433_vm1, %v6457_v2  ;;  %v8899_v35 = vpop.f32.mrb[51].mxu0 }
 0xe41   : > { %v6462_v7 = vpop.f32.mrb[52].mxu0 }
 0xe42   : > { %6538 = vst.msk [vmem:[%s12436_s26 + $0x60] sm:$0xff] %vm433_vm1, %v6462_v7  ;;  %v8902_v40 = vpop.f32.mrb[53].mxu0 }
 0xe45   : > { %v6467_v59 = vpop.f32.mrb[54].mxu0 }
 0xe46   : > { %6539 = vst.msk [vmem:[%s12436_s26 + $0x68] sm:$0xff] %vm433_vm1, %v6467_v59  ;;  %v8905_v21 = vpop.f32.mrb[55].mxu0 }
 0xe49   : > { %v6472_v20 = vpop.f32.mrb[56].mxu0 }
 0xe4a   : > { %6540 = vst.msk [vmem:[%s12436_s26 + $0x70] sm:$0xff] %vm433_vm1, %v6472_v20  ;;  %v8908_v62 = vpop.f32.mrb[57].mxu0 }
 0xe4d   : > { %v6477_v41 = vpop.f32.mrb[58].mxu0 }
 0xe4e   : > { %6541 = vst.msk [vmem:[%s12436_s26 + $0x78] sm:$0xff] %vm433_vm1, %v6477_v41  ;;  %v8911_v53 = vpop.f32.mrb[59].mxu0 }
 0xe51   : > { %v6482_v46 = vpop.f32.mrb[60].mxu0 }
 0xe52   : > { %6542 = vst.msk [vmem:[%s12436_s26 + $0x80] sm:$0xff] %vm433_vm1, %v6482_v46  ;;  %v8914_v52 = vpop.f32.mrb[61].mxu0 }
 0xe55   : > { %v6487_v49 = vpop.f32.mrb[62].mxu0 }
 0xe56   : > { %6543 = vst.msk [vmem:[%s12436_s26 + $0x88] sm:$0xff] %vm433_vm1, %v6487_v49  ;;  %v8917_v34 = vpop.f32.mrb[63].mxu0 }
 0xe59   : > { %v6492_v28 = vpop.f32.mrb[64].mxu0 }
 0xe5a   : > { %6544 = vst.msk [vmem:[%s12436_s26 + $0x90] sm:$0xff] %vm433_vm1, %v6492_v28  ;;  %v8920_v43 = vpop.f32.mrb[65].mxu0 }
 0xe5d   : > { %v6497_v55 = vpop.f32.mrb[66].mxu0 }
 0xe5e   : > { %6545 = vst.msk [vmem:[%s12436_s26 + $0x98] sm:$0xff] %vm433_vm1, %v6497_v55  ;;  %v8923_v6 = vpop.f32.mrb[67].mxu0 }
 0xe61   : > { %v6502_v23 = vpop.f32.mrb[68].mxu0 }
 0xe62   : > { %6546 = vst.msk [vmem:[%s12436_s26 + $0xa0] sm:$0xff] %vm433_vm1, %v6502_v23  ;;  %v8926_v54 = vpop.f32.mrb[69].mxu0 }
 0xe65   : > { %v6507_v44 = vpop.f32.mrb[70].mxu0 }
 0xe66   : > { %6547 = vst.msk [vmem:[%s12436_s26 + $0xa8] sm:$0xff] %vm433_vm1, %v6507_v44  ;;  %v8929_v38 = vpop.f32.mrb[71].mxu0 }
 0xe69   : > { %v6512_v32 = vpop.f32.mrb[72].mxu0 }
 0xe6a   : > { %6548 = vst.msk [vmem:[%s12436_s26 + $0xb0] sm:$0xff] %vm433_vm1, %v6512_v32  ;;  %v8932_v29 = vpop.f32.mrb[73].mxu0 }
 0xe6d   : > { %v6517_v4 = vpop.f32.mrb[74].mxu0 }
 0xe6e   : > { %6549 = vst.msk [vmem:[%s12436_s26 + $0xb8] sm:$0xff] %vm433_vm1, %v6517_v4  ;;  %v8935_v22 = vpop.f32.mrb[75].mxu0 }
 0xe71   : > { %v6522_v30 = vpop.f32.mrb[76].mxu0 }
 0xe72   : > { %6551 = vst.msk [vmem:[%s12436_s26 + $0xc0] sm:$0xf] %vm6550_vm7, %v6522_v30  ;;  %v8938_v25 = vpop.f32.mrb[77].mxu0 }
 0xe73 PF: > { %s20_s24 = sadd.s32 1, %s10127_s24  }
 0xe74   : > { %p17_p6 = scmp.ge.s32.totalorder %s20_s24, 4  }
 0xe76   :  { %19 = sbr.rel (!%p17_p6) target bundleno = 3 (0x3), region = 111 }
 0xe7d   :  { %6573 = vsyncpa [#allocation3], 1 }
 0xe7e   :  { %6575 = vsyncpa [#allocation3 + $0x1], 1 }
 0xe7f   :  { %6576 = vsyncpa [#allocation5], 1 }
 0xe80   :  { %6577 = vsyncpa [#allocation8], 1 }

</bundles_post_ra>
